<compile_context>
chip_gen: v6e
topology: v6e:2x2x1
jax: 0.10.0
libtpu: 0.0.40
codegen_flags: <defaults>
</compile_context>

<pallas_src>
import functools
import math

import jax
import jax.numpy as jnp
import numpy as np
from jax import lax
from jax.experimental import pallas as pl
from jax.experimental.pallas import tpu as pltpu

F32 = jnp.float32
BF16 = jnp.bfloat16
LN_EPS = 1e-5
VMEM_LIMIT = 32 * 1024 * 1024   # <= physical VMEM on every TPU generation


# --------------------------------------------------------------------------
# small helpers
# --------------------------------------------------------------------------
def _round_up(x, m):
    return ((x + m - 1) // m) * m


def _pick_tile(dim, target, quantum):
    """Largest tile <= target that divides dim and is a multiple of quantum (else full dim)."""
    if dim <= target:
        return dim
    t = (target // quantum) * quantum
    while t >= quantum:
        if dim % t == 0:
            return t
        t -= quantum
    return dim


def _detect_roll_convention():
    """Probe pltpu.roll once.  Returns (roll_like_np, shift_dtype): whether pltpu.roll
    follows np.roll's shift direction, and the dtype to use for the in-kernel
    relative-shift rotations (bf16 if bf16 lane-rolls lower cleanly, else f32)."""
    def probe(dtype):
        def kern(x_ref, o_ref):
            o_ref[...] = pltpu.roll(x_ref[...], 1, axis=1)

        x = jnp.tile(jnp.arange(128, dtype=jnp.float32)[None, :], (8, 1)).astype(dtype)
        out = np.asarray(pl.pallas_call(
            kern, out_shape=jax.ShapeDtypeStruct((8, 128), dtype))(x)).astype(np.float32)
        xn = np.asarray(x.astype(jnp.float32))
        if np.array_equal(out, np.roll(xn, 1, axis=1)):
            return True
        if np.array_equal(out, np.roll(xn, -1, axis=1)):
            return False
        raise ValueError("unexpected pltpu.roll semantics")

    try:
        return probe(jnp.bfloat16), jnp.bfloat16
    except Exception:
        pass
    try:
        return probe(jnp.float32), jnp.float32
    except Exception:
        # TODO(synk): could not probe pltpu.roll; assuming np.roll convention, f32 shifts.
        return True, jnp.float32


# --------------------------------------------------------------------------
# (optionally LayerNorm-fused) linear kernel: 1-D row grid, weight resident in VMEM,
# bf16 MXU / f32 acc; optional GELU; optional gate-LN statistics epilogue (cgMLP).
# --------------------------------------------------------------------------
def _linear_kernel(*refs, ln, has_bias, gelu, eps, stats_c):
    idx = 0
    x_ref = refs[idx]; idx += 1
    w_ref = refs[idx]; idx += 1
    if ln:
        g_ref = refs[idx]; b_ref = refs[idx + 1]; idx += 2
    if has_bias:
        bias_ref = refs[idx]; idx += 1
    o_ref = refs[idx]; idx += 1
    if stats_c:
        mean_ref = refs[idx]; rstd_ref = refs[idx + 1]

    x = x_ref[...]
    if ln:
        xf = x.astype(jnp.float32)
        mu = jnp.mean(xf, axis=-1, keepdims=True)
        var = jnp.mean(jnp.square(xf - mu), axis=-1, keepdims=True)
        xf = (xf - mu) * lax.rsqrt(var + eps)
        xf = xf * g_ref[...].astype(jnp.float32) + b_ref[...].astype(jnp.float32)
        a = xf.astype(jnp.bfloat16)
    else:
        a = x.astype(jnp.bfloat16)

    acc = jnp.dot(a, w_ref[...], preferred_element_type=jnp.float32)
    if has_bias:
        acc = acc + bias_ref[...].astype(jnp.float32)
    if gelu:
        # exact (erf) GELU, matching torch.nn.GELU default
        acc = 0.5 * acc * (1.0 + lax.erf(acc * 0.7071067811865476))
    o_ref[...] = acc.astype(o_ref.dtype)

    if stats_c:
        # gate-LN statistics over the gate half (columns [C, 2C)), fused here so the
        # csgu kernel does not need a separate pass over u3.
        g = acc[:, stats_c:2 * stats_c]
        mu_g = jnp.mean(g, axis=-1, keepdims=True)
        var_g = jnp.mean(g * g, axis=-1, keepdims=True) - mu_g * mu_g
        mean_ref[...] = mu_g
        rstd_ref[...] = lax.rsqrt(jnp.maximum(var_g, 0.0) + eps)


def linear(x, w, bias=None, *, ln_gamma=None, ln_beta=None, gelu=False,
           gate_stats_c=None, out_dtype=BF16, tile_m=256, eps=LN_EPS):
    # x: (M, K); w: (K, N) (torch weight transposed, stored bf16); bias: (N,)
    M, K = x.shape
    N = w.shape[1]
    tm = _pick_tile(M, tile_m, 8)
    ln = ln_gamma is not None

    ins = [x, w]
    in_specs = [pl.BlockSpec((tm, K), lambda i: (i, 0)),
                pl.BlockSpec((K, N), lambda i: (0, 0))]     # constant index -> single DMA
    if ln:
        ins += [ln_gamma.reshape(1, K), ln_beta.reshape(1, K)]
        in_specs += [pl.BlockSpec((1, K), lambda i: (0, 0)),
                     pl.BlockSpec((1, K), lambda i: (0, 0))]
    if bias is not None:
        ins.append(bias.reshape(1, N))
        in_specs.append(pl.BlockSpec((1, N), lambda i: (0, 0)))

    if gate_stats_c is None:
        out_shape = jax.ShapeDtypeStruct((M, N), out_dtype)
        out_specs = pl.BlockSpec((tm, N), lambda i: (i, 0))
    else:
        out_shape = (jax.ShapeDtypeStruct((M, N), out_dtype),
                     jax.ShapeDtypeStruct((M, 1), jnp.float32),
                     jax.ShapeDtypeStruct((M, 1), jnp.float32))
        out_specs = (pl.BlockSpec((tm, N), lambda i: (i, 0)),
                     pl.BlockSpec((tm, 1), lambda i: (i, 0)),
                     pl.BlockSpec((tm, 1), lambda i: (i, 0)))

    kernel = functools.partial(_linear_kernel, ln=ln, has_bias=bias is not None,
                               gelu=gelu, eps=eps, stats_c=gate_stats_c)
    return pl.pallas_call(
        kernel,
        out_shape=out_shape,
        grid=(M // tm,),
        in_specs=in_specs,
        out_specs=out_specs,
        compiler_params=pltpu.CompilerParams(
            dimension_semantics=("parallel",), vmem_limit_bytes=VMEM_LIMIT),
    )(*ins)


# --------------------------------------------------------------------------
# merge projection without concatenate: x + x1 @ w1 + x2 @ w2 + b  (residual fused)
# 1-D row grid; both merge weights VMEM-resident.
# --------------------------------------------------------------------------
def _merge_kernel(x_ref, a_ref, b_ref, wa_ref, wb_ref, bias_ref, o_ref):
    acc = jnp.dot(a_ref[...], wa_ref[...], preferred_element_type=jnp.float32)
    acc = acc + jnp.dot(b_ref[...], wb_ref[...], preferred_element_type=jnp.float32)
    acc = acc + bias_ref[...].astype(jnp.float32)
    o_ref[...] = (x_ref[...].astype(jnp.float32) + acc).astype(o_ref.dtype)


def merge_residual(x, x1, x2, w1, w2, bias, tile_m=256):
    M, D = x.shape
    K1 = x1.shape[1]
    K2 = x2.shape[1]
    tm = _pick_tile(M, tile_m, 8)
    return pl.pallas_call(
        _merge_kernel,
        out_shape=jax.ShapeDtypeStruct((M, D), jnp.float32),
        grid=(M // tm,),
        in_specs=[
            pl.BlockSpec((tm, D), lambda i: (i, 0)),    # residual x
            pl.BlockSpec((tm, K1), lambda i: (i, 0)),   # x1
            pl.BlockSpec((tm, K2), lambda i: (i, 0)),   # x2
            pl.BlockSpec((K1, D), lambda i: (0, 0)),    # w_merge[:D]   (resident)
            pl.BlockSpec((K2, D), lambda i: (0, 0)),    # w_merge[D:]   (resident)
            pl.BlockSpec((1, D), lambda i: (0, 0)),     # bias
        ],
        out_specs=pl.BlockSpec((tm, D), lambda i: (i, 0)),
        compiler_params=pltpu.CompilerParams(
            dimension_semantics=("parallel",), vmem_limit_bytes=VMEM_LIMIT),
    )(x, x1, x2, w1, w2, bias.reshape(1, D))


# --------------------------------------------------------------------------
# Fused RelPosMHAXL attention kernel, tiled over (batch, head, query-tile)
# --------------------------------------------------------------------------
def _rel_shift_qtile(bd_full, q0, T, roll_like_np):
    """Transformer-XL relative shift for a query tile, fully in VMEM.

    bd_full: (tq, M) with M >= 2T-1 (lane-padded to a multiple of 128).  Returns
    (tq, T) with out[r, j] = bd_full[r, j + (T-1) - (q0 + r)], via a barrel shifter of
    per-row lane rotations (XLU work, no HBM).  q0 may be a traced scalar.
    """
    tq, M = bd_full.shape
    r = lax.broadcasted_iota(jnp.int32, (tq, 1), 0)
    # per-row right-roll amount in np.roll convention
    shift = jnp.mod(q0 + r - (T - 1), M)
    x = bd_full
    nbits = max(1, (M - 1).bit_length())
    for b in range(nbits):
        amt = 1 << b
        if not roll_like_np:
            amt = (M - amt) % M          # hardware roll == np.roll with negated shift
        rolled = pltpu.roll(x, amt, axis=1)
        x = jnp.where(((shift >> b) & 1) == 1, rolled, x)
    return x[:, :T]


def _attn_kernel(q_ref, k_ref, v_ref, pk_ref, bu_ref, bv_ref, mask_ref, o_ref, *,
                 T, tq, scale, roll_like_np, shift_dtype):
    q0 = pl.program_id(2) * tq

    q = q_ref[0].astype(jnp.float32)                       # (tq, Dhp)
    bu = bu_ref[...].astype(jnp.float32)                   # (1, Dhp)
    bv = bv_ref[...].astype(jnp.float32)
    # scale folded into q (2 * tq * Dhp mults instead of tq*T per head)
    qu = ((q + bu) * scale).astype(jnp.bfloat16)
    qv = ((q + bv) * scale).astype(jnp.bfloat16)

    k = k_ref[0]                                           # (T, Dhp)  bf16
    v = v_ref[0]                                           # (T, Dhp)  bf16
    pk = pk_ref[...]                                       # (Mpad, Dhp) bf16

    ac = lax.dot_general(qu, k, (((1,), (1,)), ((), ())),
                         preferred_element_type=jnp.float32)          # (tq, T)
    bd_full = lax.dot_general(qv, pk, (((1,), (1,)), ((), ())),
                              preferred_element_type=jnp.float32)     # (tq, Mpad)
    bd = _rel_shift_qtile(bd_full.astype(shift_dtype), q0, T, roll_like_np)

    s = ac + bd.astype(jnp.float32)
    pad = mask_ref[0]                                      # (1, T) f32; 1.0 == padded
    # single-select masked softmax: m over all keys (shift-invariant), zero e for
    # padded keys before the row sum, denominator floored for fully-padded rows.
    m = jnp.max(s, axis=-1, keepdims=True)
    e = jnp.where(pad > 0.5, 0.0, jnp.exp(s - m))
    denom = jnp.maximum(jnp.sum(e, axis=-1, keepdims=True), 1e-30)
    probs = e * pl.reciprocal(denom, approx=True)

    o_ref[0] = jnp.dot(probs.astype(jnp.bfloat16), v,
                       preferred_element_type=jnp.float32).astype(o_ref.dtype)


def attention(qkv, pk, pos_bias_u, pos_bias_v, pad_mask, *, num_heads, head_dim_p,
              scale, roll_like_np, shift_dtype, tile_q=256):
    B, T, _ = qkv.shape
    H = num_heads
    Dhp = head_dim_p
    Mpad = pk.shape[0]
    assert Mpad >= 2 * T - 1
    tq = _pick_tile(T, tile_q, 8)
    kernel = functools.partial(_attn_kernel, T=T, tq=tq, scale=scale,
                               roll_like_np=roll_like_np, shift_dtype=shift_dtype)
    return pl.pallas_call(
        kernel,
        out_shape=jax.ShapeDtypeStruct((B, T, H * Dhp), BF16),
        grid=(B, H, T // tq),
        in_specs=[
            # qkv is laid out per head as [q|k|v] blocks of width Dhp (128-lane aligned);
            # k/v/pk index maps are independent of the query-tile axis, so their blocks
            # stay resident across the inner qi loop (no re-DMA).
            pl.BlockSpec((1, tq, Dhp), lambda b, h, qi: (b, qi, 3 * h)),      # q tile
            pl.BlockSpec((1, T, Dhp), lambda b, h, qi: (b, 0, 3 * h + 1)),    # k (full)
            pl.BlockSpec((1, T, Dhp), lambda b, h, qi: (b, 0, 3 * h + 2)),    # v (full)
            pl.BlockSpec((Mpad, Dhp), lambda b, h, qi: (0, h)),               # pos proj head
            pl.BlockSpec((1, Dhp), lambda b, h, qi: (0, h)),                  # pos_bias_u
            pl.BlockSpec((1, Dhp), lambda b, h, qi: (0, h)),                  # pos_bias_v
            pl.BlockSpec((1, 1, T), lambda b, h, qi: (b, 0, 0)),              # pad mask
        ],
        out_specs=pl.BlockSpec((1, tq, Dhp), lambda b, h, qi: (b, qi, h)),
        compiler_params=pltpu.CompilerParams(
            dimension_semantics=("parallel", "parallel", "arbitrary"),
            vmem_limit_bytes=VMEM_LIMIT),
    )(qkv, qkv, qkv, pk, pos_bias_u, pos_bias_v, pad_mask)


# --------------------------------------------------------------------------
# CSGU: channel-tiled gated depthwise time conv (gate-LN stats come from cp1 epilogue)
# --------------------------------------------------------------------------
def _csgu_kernel(xr_ref, xg_ref, mean_ref, rstd_ref, g_ref, b_ref, w_ref, cb_ref,
                 o_ref, pad_ref, *, ksize):
    T = xr_ref.shape[1]
    tc = xr_ref.shape[2]
    halo = (ksize - 1) // 2

    xg = xg_ref[0].astype(jnp.float32)                              # (T, tc)
    xgn = (xg - mean_ref[0]) * rstd_ref[0]
    xgn = xgn * g_ref[...].astype(jnp.float32) + b_ref[...].astype(jnp.float32)

    # zero-padded time window in VMEM: plain shifted reads, no per-tap masks / iota
    if halo:
        zeros = jnp.zeros((halo, tc), jnp.float32)
        pad_ref[:halo, :] = zeros
        pad_ref[halo + T:, :] = zeros
    pad_ref[halo:halo + T, :] = xgn

    acc = jnp.zeros((T, tc), jnp.float32)
    for kk in range(ksize):                     # static unroll over depthwise taps
        acc = acc + pad_ref[kk:kk + T, :] * w_ref[kk:kk + 1, :].astype(jnp.float32)
    acc = acc + cb_ref[...].astype(jnp.float32)

    o_ref[0] = (xr_ref[0].astype(jnp.float32) * acc).astype(o_ref.dtype)


def csgu(u3, mean, rstd, gamma, beta, conv_w, conv_b, tc, out_dtype=BF16):
    # u3: (B, T, 2C); x_r = channels [0, C), x_g = channels [C, 2C) via BlockSpec offsets.
    B, T, U2 = u3.shape
    C = U2 // 2
    K = conv_w.shape[0]
    assert K % 2 == 1
    n_off = C // tc
    return pl.pallas_call(
        functools.partial(_csgu_kernel, ksize=K),
        out_shape=jax.ShapeDtypeStruct((B, T, C), out_dtype),
        grid=(B, C // tc),
        in_specs=[
            pl.BlockSpec((1, T, tc), lambda b, c: (b, 0, c)),          # x_r half
            pl.BlockSpec((1, T, tc), lambda b, c: (b, 0, n_off + c)),  # x_g half
            pl.BlockSpec((1, T, 1), lambda b, c: (b, 0, 0)),           # gate-LN mean
            pl.BlockSpec((1, T, 1), lambda b, c: (b, 0, 0)),           # gate-LN rstd
            pl.BlockSpec((1, tc), lambda b, c: (0, c)),                # gate-LN gamma
            pl.BlockSpec((1, tc), lambda b, c: (0, c)),                # gate-LN beta
            pl.BlockSpec((K, tc), lambda b, c: (0, c)),                # depthwise taps
            pl.BlockSpec((1, tc), lambda b, c: (0, c)),                # conv bias
        ],
        out_specs=pl.BlockSpec((1, T, tc), lambda b, c: (b, 0, c)),
        scratch_shapes=[pltpu.VMEM((T + K - 1, tc), jnp.float32)],
        compiler_params=pltpu.CompilerParams(
            dimension_semantics=("parallel", "parallel"),
            vmem_limit_bytes=VMEM_LIMIT),
    )(u3, u3, mean, rstd, gamma.reshape(1, C), beta.reshape(1, C),
      conv_w, conv_b.reshape(1, C))


# --------------------------------------------------------------------------
# One BranchformerEncoderLayer (RelPosMHAXL branch + CSGU conv branch + merge)
# --------------------------------------------------------------------------
def branchformer_layer(x, pos_pad, pad_mask, p, num_heads, roll_like_np, shift_dtype):
    B, T, D = x.shape
    H = num_heads
    Dh = D // H
    Dhp = Dh if Dh % 128 == 0 else _round_up(Dh, 128)       # 128-lane aligned head slices
    xf = x.reshape(B * T, D)

    # zero-pad the head dimension of the attention weights/biases to Dhp
    w_in = jnp.pad(p["w_in_t"].reshape(D, H, 3, Dh),
                   ((0, 0), (0, 0), (0, 0), (0, Dhp - Dh))).reshape(D, 3 * H * Dhp)
    w_pos = jnp.pad(p["w_pos_t"].reshape(D, H, Dh),
                    ((0, 0), (0, 0), (0, Dhp - Dh))).reshape(D, H * Dhp)
    bu = jnp.pad(p["pos_bias_u"], ((0, 0), (0, Dhp - Dh))).reshape(1, H * Dhp)
    bv = jnp.pad(p["pos_bias_v"], ((0, 0), (0, Dhp - Dh))).reshape(1, H * Dhp)
    w_out = jnp.pad(p["w_out_t"].reshape(H, Dh, D),
                    ((0, 0), (0, Dhp - Dh), (0, 0))).reshape(H * Dhp, D)

    # ---- branch 1: RelPosMHAXL self-attention (LN fused into the qkv projection) ----
    qkv = linear(xf, w_in, ln_gamma=p["ln_mhsa_g"], ln_beta=p["ln_mhsa_b"])
    pk = linear(pos_pad, w_pos)                                       # (Mpad, H*Dhp), no bias
    attn = attention(qkv.reshape(B, T, 3 * H * Dhp), pk, bu, bv, pad_mask,
                     num_heads=H, head_dim_p=Dhp,
                     scale=1.0 / math.sqrt(D),                        # RelPosMHAXL: embed_dim
                     roll_like_np=roll_like_np, shift_dtype=shift_dtype)
    x1 = linear(attn.reshape(B * T, H * Dhp), w_out, p["b_out"])

    # ---- branch 2: cgMLP (LN + GELU + gate-LN stats fused into channel_proj1) ----
    C = p["w_cp1_t"].shape[1] // 2
    u, mean, rstd = linear(xf, p["w_cp1_t"], p["b_cp1"],
                           ln_gamma=p["ln_csgu_g"], ln_beta=p["ln_csgu_b"],
                           gelu=True, gate_stats_c=C)                  # (B*T, 2C), (B*T,1)x2
    u3 = u.reshape(B, T, 2 * C)
    tc = _pick_tile(C, 512, 128)
    gated = csgu(u3, mean.reshape(B, T, 1), rstd.reshape(B, T, 1),
                 p["csgu_ln_g"], p["csgu_ln_b"], p["conv_w"], p["conv_b"], tc)
    x2 = linear(gated.reshape(B * T, C), p["w_cp2_t"], p["b_cp2"])

    # ---- merge (concat-free) + residual, fused in one kernel ----
    out = merge_residual(xf, x1, x2, p["w_m1_t"], p["w_m2_t"], p["b_merge"])
    return out.reshape(B, T, D)


def branchformer_forward(x_tbd, pos, src_key_padding_mask, layer_params,
                         num_heads, roll_like_np=True, shift_dtype=jnp.bfloat16):
    # x_tbd: (T, B, D) -> batch-first internally; output (T, B, D)
    x = jnp.transpose(x_tbd, (1, 0, 2)).astype(F32)
    B, T, D = x.shape
    pad_mask = src_key_padding_mask.astype(F32).reshape(B, 1, T)
    pos2 = pos.reshape(-1, D)                                 # (2T-1, D)
    P = pos2.shape[0]
    Mpad = _round_up(P, 128)                                  # lane-pad so the in-kernel
    if Mpad > P:                                              # rel-shift rotations are 128-aligned
        pos2 = jnp.pad(pos2, ((0, Mpad - P), (0, 0)))
    out = x
    for p in layer_params:
        # NOTE: faithfully reproduces the reference loop, which feeds the ORIGINAL `x`
        # to every layer and returns only the last layer's output.
        out = branchformer_layer(x, pos2, pad_mask, p, num_heads, roll_like_np,
                                 shift_dtype)
    return jnp.transpose(out, (1, 0, 2))


# --------------------------------------------------------------------------
# Pure-JAX (f32) reference, used only for a numerical check in __main__
# --------------------------------------------------------------------------
def _rel_shift_ref(x):
    B, H, T, P = x.shape
    x = jnp.pad(x, ((0, 0), (0, 0), (0, 0), (1, 0)))
    x = x.reshape(B, H, P + 1, T)
    x = x[:, :, 1:, :].reshape(B, H, T, P)
    return x[..., : (P + 1) // 2]


def reference_forward(x_tbd, pos, src_key_padding_mask, layer_params, num_heads):
    x = jnp.transpose(x_tbd, (1, 0, 2)).astype(jnp.float32)
    B, T, D = x.shape
    H = num_heads
    Dh = D // H
    pos2 = pos.reshape(-1, D).astype(jnp.float32)
    P = pos2.shape[0]
    pad = src_key_padding_mask.astype(jnp.float32)[:, None, None, :]   # (B,1,1,T)

    def ln(v, g, b, eps=LN_EPS):
        mu = jnp.mean(v, -1, keepdims=True)
        var = jnp.mean(jnp.square(v - mu), -1, keepdims=True)
        return (v - mu) * lax.rsqrt(var + eps) * g + b

    def gelu(v):
        return 0.5 * v * (1.0 + lax.erf(v * 0.7071067811865476))

    out = x
    for p in layer_params:
        x1n = ln(x, p["ln_mhsa_g"], p["ln_mhsa_b"])
        qkv = (x1n @ p["w_in_t"].astype(jnp.float32)).reshape(B, T, H, 3 * Dh)
        q, k, v = [jnp.transpose(t, (0, 2, 1, 3)) for t in jnp.split(qkv, 3, axis=-1)]
        pk = (pos2 @ p["w_pos_t"].astype(jnp.float32)).reshape(P, H, Dh).transpose(1, 0, 2)
        qu = q + p["pos_bias_u"][None, :, None, :]
        qv = q + p["pos_bias_v"][None, :, None, :]
        ac = jnp.einsum("bhtd,bhsd->bhts", qu, k)
        bd = _rel_shift_ref(jnp.einsum("bhtd,hpd->bhtp", qv, pk))
        s = (ac + bd) * (1.0 / math.sqrt(D))
        s = jnp.where(pad > 0.5, -1e30, s)
        probs = jax.nn.softmax(s, axis=-1)
        probs = jnp.where(pad > 0.5, 0.0, probs)
        attn = jnp.einsum("bhts,bhsd->bhtd", probs, v).transpose(0, 2, 1, 3).reshape(B, T, D)
        x1 = attn @ p["w_out_t"].astype(jnp.float32) + p["b_out"]

        x2n = ln(x, p["ln_csgu_g"], p["ln_csgu_b"])
        u = gelu(x2n @ p["w_cp1_t"].astype(jnp.float32) + p["b_cp1"])
        C = u.shape[-1] // 2
        xr, xg = u[..., :C], u[..., C:]
        xgn = ln(xg, p["csgu_ln_g"], p["csgu_ln_b"])
        K = p["conv_w"].shape[0]
        halo = (K - 1) // 2
        xp = jnp.pad(xgn, ((0, 0), (halo, halo), (0, 0)))
        conv = sum(xp[:, kk:kk + T, :] * p["conv_w"][kk] for kk in range(K)) + p["conv_b"]
        x2 = (xr * conv) @ p["w_cp2_t"].astype(jnp.float32) + p["b_cp2"]

        merged = (x1 @ p["w_m1_t"].astype(jnp.float32)
                  + x2 @ p["w_m2_t"].astype(jnp.float32) + p["b_merge"])
        out = x + merged
    return jnp.transpose(out, (1, 0, 2))


# --------------------------------------------------------------------------
# Deterministic synthetic parameter init (shapes from the module __init__)
# --------------------------------------------------------------------------
def init_layer_params(key, D, H, U, K):
    C = U // 2
    Dh = D // H
    ks = jax.random.split(key, 15)
    s = 0.05
    rnd = lambda kk, shape: jax.random.normal(kk, shape, F32) * s
    return dict(
        ln_mhsa_g=jnp.ones((D,), F32), ln_mhsa_b=jnp.zeros((D,), F32),
        ln_csgu_g=jnp.ones((D,), F32), ln_csgu_b=jnp.zeros((D,), F32),
        w_in_t=rnd(ks[0], (D, 3 * D)).astype(BF16),     # in_proj weight^T, per-head [q|k|v]
        w_pos_t=rnd(ks[1], (D, D)).astype(BF16),        # linear_pos.weight^T (no bias)
        pos_bias_u=rnd(ks[2], (H, Dh)),
        pos_bias_v=rnd(ks[3], (H, Dh)),
        w_out_t=rnd(ks[4], (D, D)).astype(BF16), b_out=rnd(ks[5], (D,)),
        w_cp1_t=rnd(ks[6], (D, U)).astype(BF16), b_cp1=rnd(ks[7], (U,)),
        csgu_ln_g=jnp.ones((C,), F32), csgu_ln_b=jnp.zeros((C,), F32),
        conv_w=rnd(ks[8], (K, C)),                      # depthwise Conv1d weight (C,1,K) as (K,C)
        conv_b=rnd(ks[9], (C,)),
        w_cp2_t=rnd(ks[10], (C, D)).astype(BF16), b_cp2=rnd(ks[11], (D,)),
        w_m1_t=rnd(ks[12], (D, D)).astype(BF16),        # merge_proj weight^T, split in halves
        w_m2_t=rnd(ks[13], (D, D)).astype(BF16),
        b_merge=rnd(ks[14], (D,)),
    )


if __name__ == "__main__":
    T, B, D, H = 8, 2, 32, 4         # seq, batch, input_dim, num_heads
    num_layers = 2
    ksize = 7                         # depthwise_conv_kernel_size
    U = 3072                          # csgu_linear_units (hardcoded in the module)

    roll_like_np, shift_dtype = _detect_roll_convention()

    key = jax.random.PRNGKey(0)
    k_x, k_pos, k_p = jax.random.split(key, 3)
    x = jax.random.normal(k_x, (T, B, D), F32)                    # (T, B, D)
    pos = jax.random.normal(k_pos, (1, 2 * T - 1, D), F32)        # RelPosEncXL-style embeddings
    mask = jnp.zeros((B, T), jnp.bool_).at[:, T - 2:].set(True)   # True == padded

    layer_keys = jax.random.split(k_p, num_layers)
    layer_params = [init_layer_params(kk, D, H, U, ksize) for kk in layer_keys]

    fwd = jax.jit(functools.partial(branchformer_forward, num_heads=H,
                                    roll_like_np=roll_like_np,
                                    shift_dtype=shift_dtype))
    out = fwd(x, pos, mask, layer_params)
    jax.block_until_ready(out)
    assert out.shape == (T, B, D) and bool(jnp.all(jnp.isfinite(out)))

    ref = reference_forward(x, pos, mask, layer_params, H)
    err = float(jnp.max(jnp.abs(out.astype(F32) - ref)))
    assert err < 2e-2, f"kernel vs reference mismatch: max|diff|={err}"
    print("KERNEL_OK")
</pallas_src>

<mosaic_0001>
module attributes {stable_mosaic.version = 11 : i64} {
  func.func @kern(%arg0: memref<8x128xbf16, #tpu.memory_space<vmem>>, %arg1: memref<8x128xbf16, #tpu.memory_space<vmem>>) attributes {dimension_semantics = [], scalar_prefetch = 0 : i64, scratch_operands = 0 : i64, tpu.core_type = #tpu.core_type<tc>} {
    %c0 = arith.constant 0 : index
    %c0_0 = arith.constant 0 : index
    %0 = vector.load %arg0[%c0, %c0_0] : memref<8x128xbf16, #tpu.memory_space<vmem>>, vector<8x128xbf16>
    %c1_i32 = arith.constant 1 : i32
    %1 = tpu.dynamic_rotate %0 by %c1_i32 dim 1 : vector<8x128xbf16>, i32 -> vector<8x128xbf16>
    %c0_1 = arith.constant 0 : index
    %c0_2 = arith.constant 0 : index
    %2 = vector.load %arg1[%c0_1, %c0_2] : memref<8x128xbf16, #tpu.memory_space<vmem>>, vector<8x128xbf16>
    tpu.vector_store %arg1[%c0_1, %c0_2], %1 {strides = array<i32>} : memref<8x128xbf16, #tpu.memory_space<vmem>>, vector<8x128xbf16>,
    return
  }
}

module attributes {stable_mosaic.version = 11 : i64} {
  func.func @kern(%arg0: memref<8x128xf32, #tpu.memory_space<vmem>>, %arg1: memref<8x128xf32, #tpu.memory_space<vmem>>) attributes {dimension_semantics = [], scalar_prefetch = 0 : i64, scratch_operands = 0 : i64, tpu.core_type = #tpu.core_type<tc>} {
    %c0 = arith.constant 0 : index
    %c0_0 = arith.constant 0 : index
    %0 = vector.load %arg0[%c0, %c0_0] : memref<8x128xf32, #tpu.memory_space<vmem>>, vector<8x128xf32>
    %c1_i32 = arith.constant 1 : i32
    %1 = tpu.dynamic_rotate %0 by %c1_i32 dim 1 : vector<8x128xf32>, i32 -> vector<8x128xf32>
    %c0_1 = arith.constant 0 : index
    %c0_2 = arith.constant 0 : index
    %2 = vector.load %arg1[%c0_1, %c0_2] : memref<8x128xf32, #tpu.memory_space<vmem>>, vector<8x128xf32>
    tpu.vector_store %arg1[%c0_1, %c0_2], %1 {strides = array<i32>} : memref<8x128xf32, #tpu.memory_space<vmem>>, vector<8x128xf32>,
    return
  }
}

module attributes {stable_mosaic.version = 11 : i64} {
  func.func @_linear_kernel(%arg0: i32, %arg1: memref<16x32xf32, #tpu.memory_space<vmem>>, %arg2: memref<32x1536xbf16, #tpu.memory_space<vmem>>, %arg3: memref<1x32xf32, #tpu.memory_space<vmem>>, %arg4: memref<1x32xf32, #tpu.memory_space<vmem>>, %arg5: memref<16x1536xbf16, #tpu.memory_space<vmem>>) attributes {dimension_semantics = [#tpu.dimension_semantics<parallel>], iteration_bounds = array<i64: 1>, scalar_prefetch = 0 : i64, scratch_operands = 0 : i64, tpu.core_type = #tpu.core_type<tc>, window_params = [{transform_indices = @transform_0, window_bounds = array<i64: 16, 32>}, {pipeline_mode = #tpu.pipeline_mode<synchronous>, transform_indices = @transform_1, window_bounds = array<i64: 32, 1536>}, {pipeline_mode = #tpu.pipeline_mode<synchronous>, transform_indices = @transform_2, window_bounds = array<i64: 1, 32>}, {pipeline_mode = #tpu.pipeline_mode<synchronous>, transform_indices = @transform_3, window_bounds = array<i64: 1, 32>}, {transform_indices = @transform_4, window_bounds = array<i64: 16, 1536>}]} {
    %c0 = arith.constant 0 : index
    %c0_0 = arith.constant 0 : index
    %0 = vector.load %arg1[%c0, %c0_0] : memref<16x32xf32, #tpu.memory_space<vmem>>, vector<16x32xf32>
    %cst = arith.constant dense<0.000000e+00> : vector<16xf32>
    %1 = vector.multi_reduction <add>, %0, %cst [1] : vector<16x32xf32> to vector<16xf32>
    %2 = vector.shape_cast %1 : vector<16xf32> to vector<16x1xf32>
    %cst_1 = arith.constant 3.200000e+01 : f32
    %3 = vector.broadcast %cst_1 : f32 to vector<16x1xf32>
    %4 = arith.divf %2, %3 : vector<16x1xf32>
    %5 = vector.broadcast %4 : vector<16x1xf32> to vector<16x32xf32>
    %6 = arith.subf %0, %5 : vector<16x32xf32>
    %7 = arith.mulf %6, %6 : vector<16x32xf32>
    %cst_2 = arith.constant dense<0.000000e+00> : vector<16xf32>
    %8 = vector.multi_reduction <add>, %7, %cst_2 [1] : vector<16x32xf32> to vector<16xf32>
    %9 = vector.shape_cast %8 : vector<16xf32> to vector<16x1xf32>
    %cst_3 = arith.constant 3.200000e+01 : f32
    %10 = vector.broadcast %cst_3 : f32 to vector<16x1xf32>
    %11 = arith.divf %9, %10 : vector<16x1xf32>
    %12 = vector.broadcast %4 : vector<16x1xf32> to vector<16x32xf32>
    %13 = arith.subf %0, %12 : vector<16x32xf32>
    %cst_4 = arith.constant 9.99999974E-6 : f32
    %14 = vector.broadcast %cst_4 : f32 to vector<16x1xf32>
    %15 = arith.addf %11, %14 : vector<16x1xf32>
    %16 = math.rsqrt %15 : vector<16x1xf32>
    %17 = vector.broadcast %16 : vector<16x1xf32> to vector<16x32xf32>
    %18 = arith.mulf %13, %17 : vector<16x32xf32>
    %c0_5 = arith.constant 0 : index
    %c0_6 = arith.constant 0 : index
    %19 = vector.load %arg3[%c0_5, %c0_6] : memref<1x32xf32, #tpu.memory_space<vmem>>, vector<1x32xf32>
    %20 = vector.broadcast %19 : vector<1x32xf32> to vector<16x32xf32>
    %21 = arith.mulf %18, %20 : vector<16x32xf32>
    %c0_7 = arith.constant 0 : index
    %c0_8 = arith.constant 0 : index
    %22 = vector.load %arg4[%c0_7, %c0_8] : memref<1x32xf32, #tpu.memory_space<vmem>>, vector<1x32xf32>
    %23 = vector.broadcast %22 : vector<1x32xf32> to vector<16x32xf32>
    %24 = arith.addf %21, %23 : vector<16x32xf32>
    %25 = arith.truncf %24 : vector<16x32xf32> to vector<16x32xbf16>
    %c0_9 = arith.constant 0 : index
    %c0_10 = arith.constant 0 : index
    %26 = vector.load %arg2[%c0_9, %c0_10] : memref<32x1536xbf16, #tpu.memory_space<vmem>>, vector<32x1536xbf16>
    %cst_11 = arith.constant dense<0.000000e+00> : vector<16x1536xf32>
    %27 = tpu.matmul %25, %26, %cst_11 {dimension_numbers = #tpu.dot_dimension_numbers<[1], [0], [0], [1], [0, 0, 1, 1], [], []>} : vector<16x32xbf16>, vector<32x1536xbf16>, vector<16x1536xf32> -> vector<16x1536xf32>
    %28 = arith.truncf %27 : vector<16x1536xf32> to vector<16x1536xbf16>
    %c0_12 = arith.constant 0 : index
    %c0_13 = arith.constant 0 : index
    %29 = vector.load %arg5[%c0_12, %c0_13] : memref<16x1536xbf16, #tpu.memory_space<vmem>>, vector<16x1536xbf16>
    tpu.vector_store %arg5[%c0_12, %c0_13], %28 {strides = array<i32>} : memref<16x1536xbf16, #tpu.memory_space<vmem>>, vector<16x1536xbf16>,
    return
  }
  func.func @transform_0(%arg0: i32) -> (i32, i32) {
    %c0_i32 = arith.constant 0 : i32
    %c0_i32_0 = arith.constant 0 : i32
    return %arg0, %c0_i32 : i32, i32
  }
  func.func @transform_1(%arg0: i32) -> (i32, i32) {
    %c0_i32 = arith.constant 0 : i32
    %c0_i32_0 = arith.constant 0 : i32
    %c0_i32_1 = arith.constant 0 : i32
    return %c0_i32, %c0_i32_0 : i32, i32
  }
  func.func @transform_2(%arg0: i32) -> (i32, i32) {
    %c0_i32 = arith.constant 0 : i32
    %c0_i32_0 = arith.constant 0 : i32
    %c0_i32_1 = arith.constant 0 : i32
    return %c0_i32, %c0_i32_0 : i32, i32
  }
  func.func @transform_3(%arg0: i32) -> (i32, i32) {
    %c0_i32 = arith.constant 0 : i32
    %c0_i32_0 = arith.constant 0 : i32
    %c0_i32_1 = arith.constant 0 : i32
    return %c0_i32, %c0_i32_0 : i32, i32
  }
  func.func @transform_4(%arg0: i32) -> (i32, i32) {
    %c0_i32 = arith.constant 0 : i32
    %c0_i32_0 = arith.constant 0 : i32
    return %arg0, %c0_i32 : i32, i32
  }
}

module attributes {stable_mosaic.version = 11 : i64} {
  func.func @_linear_kernel(%arg0: i32, %arg1: memref<128x32xf32, #tpu.memory_space<vmem>>, %arg2: memref<32x512xbf16, #tpu.memory_space<vmem>>, %arg3: memref<128x512xbf16, #tpu.memory_space<vmem>>) attributes {dimension_semantics = [#tpu.dimension_semantics<parallel>], iteration_bounds = array<i64: 1>, scalar_prefetch = 0 : i64, scratch_operands = 0 : i64, tpu.core_type = #tpu.core_type<tc>, window_params = [{transform_indices = @transform_0, window_bounds = array<i64: 128, 32>}, {pipeline_mode = #tpu.pipeline_mode<synchronous>, transform_indices = @transform_1, window_bounds = array<i64: 32, 512>}, {transform_indices = @transform_2, window_bounds = array<i64: 128, 512>}]} {
    %c0 = arith.constant 0 : index
    %c0_0 = arith.constant 0 : index
    %0 = vector.load %arg1[%c0, %c0_0] : memref<128x32xf32, #tpu.memory_space<vmem>>, vector<128x32xf32>
    %1 = arith.truncf %0 : vector<128x32xf32> to vector<128x32xbf16>
    %c0_1 = arith.constant 0 : index
    %c0_2 = arith.constant 0 : index
    %2 = vector.load %arg2[%c0_1, %c0_2] : memref<32x512xbf16, #tpu.memory_space<vmem>>, vector<32x512xbf16>
    %cst = arith.constant dense<0.000000e+00> : vector<128x512xf32>
    %3 = tpu.matmul %1, %2, %cst {dimension_numbers = #tpu.dot_dimension_numbers<[1], [0], [0], [1], [0, 0, 1, 1], [], []>} : vector<128x32xbf16>, vector<32x512xbf16>, vector<128x512xf32> -> vector<128x512xf32>
    %4 = arith.truncf %3 : vector<128x512xf32> to vector<128x512xbf16>
    %c0_3 = arith.constant 0 : index
    %c0_4 = arith.constant 0 : index
    %5 = vector.load %arg3[%c0_3, %c0_4] : memref<128x512xbf16, #tpu.memory_space<vmem>>, vector<128x512xbf16>
    tpu.vector_store %arg3[%c0_3, %c0_4], %4 {strides = array<i32>} : memref<128x512xbf16, #tpu.memory_space<vmem>>, vector<128x512xbf16>,
    return
  }
  func.func @transform_0(%arg0: i32) -> (i32, i32) {
    %c0_i32 = arith.constant 0 : i32
    %c0_i32_0 = arith.constant 0 : i32
    return %arg0, %c0_i32 : i32, i32
  }
  func.func @transform_1(%arg0: i32) -> (i32, i32) {
    %c0_i32 = arith.constant 0 : i32
    %c0_i32_0 = arith.constant 0 : i32
    %c0_i32_1 = arith.constant 0 : i32
    return %c0_i32, %c0_i32_0 : i32, i32
  }
  func.func @transform_2(%arg0: i32) -> (i32, i32) {
    %c0_i32 = arith.constant 0 : i32
    %c0_i32_0 = arith.constant 0 : i32
    return %arg0, %c0_i32 : i32, i32
  }
}

module attributes {stable_mosaic.version = 11 : i64} {
  func.func @_attn_kernel(%arg0: i32, %arg1: i32, %arg2: i32, %arg3: memref<1x8x128xbf16, #tpu.memory_space<vmem>>, %arg4: memref<1x8x128xbf16, #tpu.memory_space<vmem>>, %arg5: memref<1x8x128xbf16, #tpu.memory_space<vmem>>, %arg6: memref<128x128xbf16, #tpu.memory_space<vmem>>, %arg7: memref<1x128xf32, #tpu.memory_space<vmem>>, %arg8: memref<1x128xf32, #tpu.memory_space<vmem>>, %arg9: memref<1x1x8xf32, #tpu.memory_space<vmem>>, %arg10: memref<1x8x128xbf16, #tpu.memory_space<vmem>>) attributes {dimension_semantics = [#tpu.dimension_semantics<parallel>, #tpu.dimension_semantics<parallel>, #tpu.dimension_semantics<arbitrary>], iteration_bounds = array<i64: 2, 4, 1>, scalar_prefetch = 0 : i64, scratch_operands = 0 : i64, tpu.core_type = #tpu.core_type<tc>, window_params = [{transform_indices = @transform_0, window_bounds = array<i64: 1, 8, 128>}, {transform_indices = @transform_1, window_bounds = array<i64: 1, 8, 128>}, {transform_indices = @transform_2, window_bounds = array<i64: 1, 8, 128>}, {transform_indices = @transform_3, window_bounds = array<i64: 128, 128>}, {transform_indices = @transform_4, window_bounds = array<i64: 1, 128>}, {transform_indices = @transform_5, window_bounds = array<i64: 1, 128>}, {transform_indices = @transform_6, window_bounds = array<i64: 1, 1, 8>}, {transform_indices = @transform_7, window_bounds = array<i64: 1, 8, 128>}]} {
    %c8_i32 = arith.constant 8 : i32
    %0 = arith.muli %arg2, %c8_i32 : i32
    %c0 = arith.constant 0 : index
    %c0_0 = arith.constant 0 : index
    %c0_1 = arith.constant 0 : index
    %1 = vector.load %arg3[%c0, %c0_0, %c0_1] : memref<1x8x128xbf16, #tpu.memory_space<vmem>>, vector<1x8x128xbf16>
    %2 = vector.shape_cast %1 : vector<1x8x128xbf16> to vector<8x128xbf16>
    %3 = arith.extf %2 : vector<8x128xbf16> to vector<8x128xf32>
    %c0_2 = arith.constant 0 : index
    %c0_3 = arith.constant 0 : index
    %4 = vector.load %arg7[%c0_2, %c0_3] : memref<1x128xf32, #tpu.memory_space<vmem>>, vector<1x128xf32>
    %c0_4 = arith.constant 0 : index
    %c0_5 = arith.constant 0 : index
    %5 = vector.load %arg8[%c0_4, %c0_5] : memref<1x128xf32, #tpu.memory_space<vmem>>, vector<1x128xf32>
    %6 = vector.broadcast %4 : vector<1x128xf32> to vector<8x128xf32>
    %7 = arith.addf %3, %6 : vector<8x128xf32>
    %cst = arith.constant 0.176776692 : f32
    %8 = vector.broadcast %cst : f32 to vector<8x128xf32>
    %9 = arith.mulf %7, %8 : vector<8x128xf32>
    %10 = arith.truncf %9 : vector<8x128xf32> to vector<8x128xbf16>
    %11 = vector.broadcast %5 : vector<1x128xf32> to vector<8x128xf32>
    %12 = arith.addf %3, %11 : vector<8x128xf32>
    %cst_6 = arith.constant 0.176776692 : f32
    %13 = vector.broadcast %cst_6 : f32 to vector<8x128xf32>
    %14 = arith.mulf %12, %13 : vector<8x128xf32>
    %15 = arith.truncf %14 : vector<8x128xf32> to vector<8x128xbf16>
    %c0_7 = arith.constant 0 : index
    %c0_8 = arith.constant 0 : index
    %c0_9 = arith.constant 0 : index
    %16 = vector.load %arg4[%c0_7, %c0_8, %c0_9] : memref<1x8x128xbf16, #tpu.memory_space<vmem>>, vector<1x8x128xbf16>
    %17 = vector.shape_cast %16 : vector<1x8x128xbf16> to vector<8x128xbf16>
    %c0_10 = arith.constant 0 : index
    %c0_11 = arith.constant 0 : index
    %c0_12 = arith.constant 0 : index
    %18 = vector.load %arg5[%c0_10, %c0_11, %c0_12] : memref<1x8x128xbf16, #tpu.memory_space<vmem>>, vector<1x8x128xbf16>
    %19 = vector.shape_cast %18 : vector<1x8x128xbf16> to vector<8x128xbf16>
    %c0_13 = arith.constant 0 : index
    %c0_14 = arith.constant 0 : index
    %20 = vector.load %arg6[%c0_13, %c0_14] : memref<128x128xbf16, #tpu.memory_space<vmem>>, vector<128x128xbf16>
    %cst_15 = arith.constant dense<0.000000e+00> : vector<8x8xf32>
    %21 = tpu.matmul %10, %17, %cst_15 {dimension_numbers = #tpu.dot_dimension_numbers<[1], [1], [0], [0], [0, 0, 1, 0], [], []>} : vector<8x128xbf16>, vector<8x128xbf16>, vector<8x8xf32> -> vector<8x8xf32>
    %cst_16 = arith.constant dense<0.000000e+00> : vector<8x128xf32>
    %22 = tpu.matmul %15, %20, %cst_16 {dimension_numbers = #tpu.dot_dimension_numbers<[1], [1], [0], [0], [0, 0, 1, 0], [], []>} : vector<8x128xbf16>, vector<128x128xbf16>, vector<8x128xf32> -> vector<8x128xf32>
    %23 = tpu.iota {dimensions = array<i32: 0>} : vector<8x1xi32>
    %24 = vector.broadcast %0 : i32 to vector<8x1xi32>
    %25 = arith.addi %24, %23 : vector<8x1xi32>
    %c7_i32 = arith.constant 7 : i32
    %26 = vector.broadcast %c7_i32 : i32 to vector<8x1xi32>
    %27 = arith.subi %25, %26 : vector<8x1xi32>
    %c128_i32 = arith.constant 128 : i32
    %c0_i32 = arith.constant 0 : i32
    %28 = arith.cmpi eq, %c128_i32, %c0_i32 : i32
    %c1_i32 = arith.constant 1 : i32
    %29 = arith.select %28, %c1_i32, %c128_i32 : i32
    %30 = vector.broadcast %29 : i32 to vector<8x1xi32>
    %31 = arith.remsi %27, %30 : vector<8x1xi32>
    %c0_i32_17 = arith.constant 0 : i32
    %32 = vector.broadcast %c0_i32_17 : i32 to vector<8x1xi32>
    %33 = arith.cmpi ne, %31, %32 : vector<8x1xi32>
    %c0_i32_18 = arith.constant 0 : i32
    %34 = vector.broadcast %c0_i32_18 : i32 to vector<8x1xi32>
    %35 = arith.cmpi slt, %31, %34 : vector<8x1xi32>
    %c0_i32_19 = arith.constant 0 : i32
    %36 = arith.cmpi slt, %29, %c0_i32_19 : i32
    %37 = vector.broadcast %36 : i1 to vector<8x1xi1>
    %38 = vector.broadcast %37 : vector<8x1xi1> to vector<8x1xi1>
    %39 = arith.xori %35, %38 : vector<8x1xi1>
    %40 = arith.andi %39, %33 : vector<8x1xi1>
    %41 = vector.broadcast %29 : i32 to vector<8x1xi32>
    %42 = arith.addi %31, %41 : vector<8x1xi32>
    %43 = arith.select %40, %42, %31 : vector<8x1xi1>, vector<8x1xi32>
    %c1_i32_20 = arith.constant 1 : i32
    %44 = tpu.dynamic_rotate %22 by %c1_i32_20 dim 1 : vector<8x128xf32>, i32 -> vector<8x128xf32>
    %c0_i32_21 = arith.constant 0 : i32
    %45 = vector.broadcast %c0_i32_21 : i32 to vector<8x1xi32>
    %46 = arith.shrsi %43, %45 : vector<8x1xi32>
    %c1_i32_22 = arith.constant 1 : i32
    %47 = vector.broadcast %c1_i32_22 : i32 to vector<8x1xi32>
    %48 = arith.andi %46, %47 : vector<8x1xi32>
    %c1_i32_23 = arith.constant 1 : i32
    %49 = vector.broadcast %c1_i32_23 : i32 to vector<8x1xi32>
    %50 = arith.cmpi eq, %48, %49 : vector<8x1xi32>
    %51 = vector.shape_cast %50 : vector<8x1xi1> to vector<8x1xi1>
    %52 = vector.broadcast %51 : vector<8x1xi1> to vector<8x128xi1>
    %53 = arith.select %52, %44, %22 : vector<8x128xi1>, vector<8x128xf32>
    %c2_i32 = arith.constant 2 : i32
    %54 = tpu.dynamic_rotate %53 by %c2_i32 dim 1 : vector<8x128xf32>, i32 -> vector<8x128xf32>
    %c1_i32_24 = arith.constant 1 : i32
    %55 = vector.broadcast %c1_i32_24 : i32 to vector<8x1xi32>
    %56 = arith.shrsi %43, %55 : vector<8x1xi32>
    %c1_i32_25 = arith.constant 1 : i32
    %57 = vector.broadcast %c1_i32_25 : i32 to vector<8x1xi32>
    %58 = arith.andi %56, %57 : vector<8x1xi32>
    %c1_i32_26 = arith.constant 1 : i32
    %59 = vector.broadcast %c1_i32_26 : i32 to vector<8x1xi32>
    %60 = arith.cmpi eq, %58, %59 : vector<8x1xi32>
    %61 = vector.shape_cast %60 : vector<8x1xi1> to vector<8x1xi1>
    %62 = vector.broadcast %61 : vector<8x1xi1> to vector<8x128xi1>
    %63 = arith.select %62, %54, %53 : vector<8x128xi1>, vector<8x128xf32>
    %c4_i32 = arith.constant 4 : i32
    %64 = tpu.dynamic_rotate %63 by %c4_i32 dim 1 : vector<8x128xf32>, i32 -> vector<8x128xf32>
    %c2_i32_27 = arith.constant 2 : i32
    %65 = vector.broadcast %c2_i32_27 : i32 to vector<8x1xi32>
    %66 = arith.shrsi %43, %65 : vector<8x1xi32>
    %c1_i32_28 = arith.constant 1 : i32
    %67 = vector.broadcast %c1_i32_28 : i32 to vector<8x1xi32>
    %68 = arith.andi %66, %67 : vector<8x1xi32>
    %c1_i32_29 = arith.constant 1 : i32
    %69 = vector.broadcast %c1_i32_29 : i32 to vector<8x1xi32>
    %70 = arith.cmpi eq, %68, %69 : vector<8x1xi32>
    %71 = vector.shape_cast %70 : vector<8x1xi1> to vector<8x1xi1>
    %72 = vector.broadcast %71 : vector<8x1xi1> to vector<8x128xi1>
    %73 = arith.select %72, %64, %63 : vector<8x128xi1>, vector<8x128xf32>
    %c8_i32_30 = arith.constant 8 : i32
    %74 = tpu.dynamic_rotate %73 by %c8_i32_30 dim 1 : vector<8x128xf32>, i32 -> vector<8x128xf32>
    %c3_i32 = arith.constant 3 : i32
    %75 = vector.broadcast %c3_i32 : i32 to vector<8x1xi32>
    %76 = arith.shrsi %43, %75 : vector<8x1xi32>
    %c1_i32_31 = arith.constant 1 : i32
    %77 = vector.broadcast %c1_i32_31 : i32 to vector<8x1xi32>
    %78 = arith.andi %76, %77 : vector<8x1xi32>
    %c1_i32_32 = arith.constant 1 : i32
    %79 = vector.broadcast %c1_i32_32 : i32 to vector<8x1xi32>
    %80 = arith.cmpi eq, %78, %79 : vector<8x1xi32>
    %81 = vector.shape_cast %80 : vector<8x1xi1> to vector<8x1xi1>
    %82 = vector.broadcast %81 : vector<8x1xi1> to vector<8x128xi1>
    %83 = arith.select %82, %74, %73 : vector<8x128xi1>, vector<8x128xf32>
    %c16_i32 = arith.constant 16 : i32
    %84 = tpu.dynamic_rotate %83 by %c16_i32 dim 1 : vector<8x128xf32>, i32 -> vector<8x128xf32>
    %c4_i32_33 = arith.constant 4 : i32
    %85 = vector.broadcast %c4_i32_33 : i32 to vector<8x1xi32>
    %86 = arith.shrsi %43, %85 : vector<8x1xi32>
    %c1_i32_34 = arith.constant 1 : i32
    %87 = vector.broadcast %c1_i32_34 : i32 to vector<8x1xi32>
    %88 = arith.andi %86, %87 : vector<8x1xi32>
    %c1_i32_35 = arith.constant 1 : i32
    %89 = vector.broadcast %c1_i32_35 : i32 to vector<8x1xi32>
    %90 = arith.cmpi eq, %88, %89 : vector<8x1xi32>
    %91 = vector.shape_cast %90 : vector<8x1xi1> to vector<8x1xi1>
    %92 = vector.broadcast %91 : vector<8x1xi1> to vector<8x128xi1>
    %93 = arith.select %92, %84, %83 : vector<8x128xi1>, vector<8x128xf32>
    %c32_i32 = arith.constant 32 : i32
    %94 = tpu.dynamic_rotate %93 by %c32_i32 dim 1 : vector<8x128xf32>, i32 -> vector<8x128xf32>
    %c5_i32 = arith.constant 5 : i32
    %95 = vector.broadcast %c5_i32 : i32 to vector<8x1xi32>
    %96 = arith.shrsi %43, %95 : vector<8x1xi32>
    %c1_i32_36 = arith.constant 1 : i32
    %97 = vector.broadcast %c1_i32_36 : i32 to vector<8x1xi32>
    %98 = arith.andi %96, %97 : vector<8x1xi32>
    %c1_i32_37 = arith.constant 1 : i32
    %99 = vector.broadcast %c1_i32_37 : i32 to vector<8x1xi32>
    %100 = arith.cmpi eq, %98, %99 : vector<8x1xi32>
    %101 = vector.shape_cast %100 : vector<8x1xi1> to vector<8x1xi1>
    %102 = vector.broadcast %101 : vector<8x1xi1> to vector<8x128xi1>
    %103 = arith.select %102, %94, %93 : vector<8x128xi1>, vector<8x128xf32>
    %c64_i32 = arith.constant 64 : i32
    %104 = tpu.dynamic_rotate %103 by %c64_i32 dim 1 : vector<8x128xf32>, i32 -> vector<8x128xf32>
    %c6_i32 = arith.constant 6 : i32
    %105 = vector.broadcast %c6_i32 : i32 to vector<8x1xi32>
    %106 = arith.shrsi %43, %105 : vector<8x1xi32>
    %c1_i32_38 = arith.constant 1 : i32
    %107 = vector.broadcast %c1_i32_38 : i32 to vector<8x1xi32>
    %108 = arith.andi %106, %107 : vector<8x1xi32>
    %c1_i32_39 = arith.constant 1 : i32
    %109 = vector.broadcast %c1_i32_39 : i32 to vector<8x1xi32>
    %110 = arith.cmpi eq, %108, %109 : vector<8x1xi32>
    %111 = vector.shape_cast %110 : vector<8x1xi1> to vector<8x1xi1>
    %112 = vector.broadcast %111 : vector<8x1xi1> to vector<8x128xi1>
    %113 = arith.select %112, %104, %103 : vector<8x128xi1>, vector<8x128xf32>
    %114 = vector.extract_strided_slice %113 {offsets = [0, 0], sizes = [8, 8], strides = [1, 1]} : vector<8x128xf32> to vector<8x8xf32>
    %115 = arith.addf %21, %114 : vector<8x8xf32>
    %c0_40 = arith.constant 0 : index
    %c0_41 = arith.constant 0 : index
    %c0_42 = arith.constant 0 : index
    %116 = vector.load %arg9[%c0_40, %c0_41, %c0_42] : memref<1x1x8xf32, #tpu.memory_space<vmem>>, vector<1x1x8xf32>
    %117 = vector.shape_cast %116 : vector<1x1x8xf32> to vector<1x8xf32>
    %cst_43 = arith.constant dense<0xFF800000> : vector<8xf32>
    %118 = vector.multi_reduction <maximumf>, %115, %cst_43 [1] : vector<8x8xf32> to vector<8xf32>
    %119 = vector.shape_cast %118 : vector<8xf32> to vector<8x1xf32>
    %cst_44 = arith.constant 5.000000e-01 : f32
    %120 = vector.broadcast %cst_44 : f32 to vector<1x8xf32>
    %121 = arith.cmpf ogt, %117, %120 : vector<1x8xf32>
    %122 = vector.broadcast %119 : vector<8x1xf32> to vector<8x8xf32>
    %123 = arith.subf %115, %122 : vector<8x8xf32>
    %124 = math.exp %123 : vector<8x8xf32>
    %cst_45 = arith.constant 0.000000e+00 : f32
    %125 = vector.shape_cast %121 : vector<1x8xi1> to vector<1x8xi1>
    %126 = vector.broadcast %125 : vector<1x8xi1> to vector<8x8xi1>
    %127 = vector.broadcast %cst_45 : f32 to vector<8x8xf32>
    %128 = arith.select %126, %127, %124 : vector<8x8xi1>, vector<8x8xf32>
    %cst_46 = arith.constant dense<0.000000e+00> : vector<8xf32>
    %129 = vector.multi_reduction <add>, %128, %cst_46 [1] : vector<8x8xf32> to vector<8xf32>
    %130 = vector.shape_cast %129 : vector<8xf32> to vector<8x1xf32>
    %cst_47 = arith.constant 1.000000e-30 : f32
    %131 = vector.broadcast %cst_47 : f32 to vector<8x1xf32>
    %132 = arith.maximumf %130, %131 : vector<8x1xf32>
    %133 = tpu.reciprocal %132 {approx = true} : vector<8x1xf32> -> vector<8x1xf32>
    %134 = vector.broadcast %133 : vector<8x1xf32> to vector<8x8xf32>
    %135 = arith.mulf %128, %134 : vector<8x8xf32>
    %136 = arith.truncf %135 : vector<8x8xf32> to vector<8x8xbf16>
    %cst_48 = arith.constant dense<0.000000e+00> : vector<8x128xf32>
    %137 = tpu.matmul %136, %19, %cst_48 {dimension_numbers = #tpu.dot_dimension_numbers<[1], [0], [0], [1], [0, 0, 1, 1], [], []>} : vector<8x8xbf16>, vector<8x128xbf16>, vector<8x128xf32> -> vector<8x128xf32>
    %138 = arith.truncf %137 : vector<8x128xf32> to vector<8x128xbf16>
    %c0_49 = arith.constant 0 : index
    %c0_50 = arith.constant 0 : index
    %c0_51 = arith.constant 0 : index
    %139 = vector.load %arg10[%c0_49, %c0_50, %c0_51] : memref<1x8x128xbf16, #tpu.memory_space<vmem>>, vector<1x8x128xbf16>
    %140 = vector.shape_cast %139 : vector<1x8x128xbf16> to vector<8x128xbf16>
    %141 = vector.shape_cast %138 : vector<8x128xbf16> to vector<1x8x128xbf16>
    tpu.vector_store %arg10[%c0_49, %c0_50, %c0_51], %141 {strides = array<i32>} : memref<1x8x128xbf16, #tpu.memory_space<vmem>>, vector<1x8x128xbf16>,
    return
  }
  func.func @transform_0(%arg0: i32, %arg1: i32, %arg2: i32) -> (i32, i32, i32) {
    %c3_i32 = arith.constant 3 : i32
    %0 = arith.muli %c3_i32, %arg1 : i32
    %c0_i32 = arith.constant 0 : i32
    return %arg0, %arg2, %0 : i32, i32, i32
  }
  func.func @transform_1(%arg0: i32, %arg1: i32, %arg2: i32) -> (i32, i32, i32) {
    %c3_i32 = arith.constant 3 : i32
    %0 = arith.muli %c3_i32, %arg1 : i32
    %c1_i32 = arith.constant 1 : i32
    %1 = arith.addi %0, %c1_i32 : i32
    %c0_i32 = arith.constant 0 : i32
    %c0_i32_0 = arith.constant 0 : i32
    return %arg0, %c0_i32, %1 : i32, i32, i32
  }
  func.func @transform_2(%arg0: i32, %arg1: i32, %arg2: i32) -> (i32, i32, i32) {
    %c3_i32 = arith.constant 3 : i32
    %0 = arith.muli %c3_i32, %arg1 : i32
    %c2_i32 = arith.constant 2 : i32
    %1 = arith.addi %0, %c2_i32 : i32
    %c0_i32 = arith.constant 0 : i32
    %c0_i32_0 = arith.constant 0 : i32
    return %arg0, %c0_i32, %1 : i32, i32, i32
  }
  func.func @transform_3(%arg0: i32, %arg1: i32, %arg2: i32) -> (i32, i32) {
    %c0_i32 = arith.constant 0 : i32
    %c0_i32_0 = arith.constant 0 : i32
    return %c0_i32, %arg1 : i32, i32
  }
  func.func @transform_4(%arg0: i32, %arg1: i32, %arg2: i32) -> (i32, i32) {
    %c0_i32 = arith.constant 0 : i32
    %c0_i32_0 = arith.constant 0 : i32
    return %c0_i32, %arg1 : i32, i32
  }
  func.func @transform_5(%arg0: i32, %arg1: i32, %arg2: i32) -> (i32, i32) {
    %c0_i32 = arith.constant 0 : i32
    %c0_i32_0 = arith.constant 0 : i32
    return %c0_i32, %arg1 : i32, i32
  }
  func.func @transform_6(%arg0: i32, %arg1: i32, %arg2: i32) -> (i32, i32, i32) {
    %c0_i32 = arith.constant 0 : i32
    %c0_i32_0 = arith.constant 0 : i32
    %c0_i32_1 = arith.constant 0 : i32
    return %arg0, %c0_i32, %c0_i32_0 : i32, i32, i32
  }
  func.func @transform_7(%arg0: i32, %arg1: i32, %arg2: i32) -> (i32, i32, i32) {
    %c0_i32 = arith.constant 0 : i32
    return %arg0, %arg2, %arg1 : i32, i32, i32
  }
}

module attributes {stable_mosaic.version = 11 : i64} {
  func.func @_linear_kernel(%arg0: i32, %arg1: memref<16x512xbf16, #tpu.memory_space<vmem>>, %arg2: memref<512x32xbf16, #tpu.memory_space<vmem>>, %arg3: memref<1x32xf32, #tpu.memory_space<vmem>>, %arg4: memref<16x32xbf16, #tpu.memory_space<vmem>>) attributes {dimension_semantics = [#tpu.dimension_semantics<parallel>], iteration_bounds = array<i64: 1>, scalar_prefetch = 0 : i64, scratch_operands = 0 : i64, tpu.core_type = #tpu.core_type<tc>, window_params = [{transform_indices = @transform_0, window_bounds = array<i64: 16, 512>}, {pipeline_mode = #tpu.pipeline_mode<synchronous>, transform_indices = @transform_1, window_bounds = array<i64: 512, 32>}, {pipeline_mode = #tpu.pipeline_mode<synchronous>, transform_indices = @transform_2, window_bounds = array<i64: 1, 32>}, {transform_indices = @transform_3, window_bounds = array<i64: 16, 32>}]} {
    %c0 = arith.constant 0 : index
    %c0_0 = arith.constant 0 : index
    %0 = vector.load %arg1[%c0, %c0_0] : memref<16x512xbf16, #tpu.memory_space<vmem>>, vector<16x512xbf16>
    %c0_1 = arith.constant 0 : index
    %c0_2 = arith.constant 0 : index
    %1 = vector.load %arg2[%c0_1, %c0_2] : memref<512x32xbf16, #tpu.memory_space<vmem>>, vector<512x32xbf16>
    %cst = arith.constant dense<0.000000e+00> : vector<16x32xf32>
    %2 = tpu.matmul %0, %1, %cst {dimension_numbers = #tpu.dot_dimension_numbers<[1], [0], [0], [1], [0, 0, 1, 1], [], []>} : vector<16x512xbf16>, vector<512x32xbf16>, vector<16x32xf32> -> vector<16x32xf32>
    %c0_3 = arith.constant 0 : index
    %c0_4 = arith.constant 0 : index
    %3 = vector.load %arg3[%c0_3, %c0_4] : memref<1x32xf32, #tpu.memory_space<vmem>>, vector<1x32xf32>
    %4 = vector.broadcast %3 : vector<1x32xf32> to vector<16x32xf32>
    %5 = arith.addf %2, %4 : vector<16x32xf32>
    %6 = arith.truncf %5 : vector<16x32xf32> to vector<16x32xbf16>
    %c0_5 = arith.constant 0 : index
    %c0_6 = arith.constant 0 : index
    %7 = vector.load %arg4[%c0_5, %c0_6] : memref<16x32xbf16, #tpu.memory_space<vmem>>, vector<16x32xbf16>
    tpu.vector_store %arg4[%c0_5, %c0_6], %6 {strides = array<i32>} : memref<16x32xbf16, #tpu.memory_space<vmem>>, vector<16x32xbf16>,
    return
  }
  func.func @transform_0(%arg0: i32) -> (i32, i32) {
    %c0_i32 = arith.constant 0 : i32
    %c0_i32_0 = arith.constant 0 : i32
    return %arg0, %c0_i32 : i32, i32
  }
  func.func @transform_1(%arg0: i32) -> (i32, i32) {
    %c0_i32 = arith.constant 0 : i32
    %c0_i32_0 = arith.constant 0 : i32
    %c0_i32_1 = arith.constant 0 : i32
    return %c0_i32, %c0_i32_0 : i32, i32
  }
  func.func @transform_2(%arg0: i32) -> (i32, i32) {
    %c0_i32 = arith.constant 0 : i32
    %c0_i32_0 = arith.constant 0 : i32
    %c0_i32_1 = arith.constant 0 : i32
    return %c0_i32, %c0_i32_0 : i32, i32
  }
  func.func @transform_3(%arg0: i32) -> (i32, i32) {
    %c0_i32 = arith.constant 0 : i32
    %c0_i32_0 = arith.constant 0 : i32
    return %arg0, %c0_i32 : i32, i32
  }
}

module attributes {stable_mosaic.version = 11 : i64} {
  func.func @_linear_kernel(%arg0: i32, %arg1: memref<16x32xf32, #tpu.memory_space<vmem>>, %arg2: memref<32x3072xbf16, #tpu.memory_space<vmem>>, %arg3: memref<1x32xf32, #tpu.memory_space<vmem>>, %arg4: memref<1x32xf32, #tpu.memory_space<vmem>>, %arg5: memref<1x3072xf32, #tpu.memory_space<vmem>>, %arg6: memref<16x3072xbf16, #tpu.memory_space<vmem>>, %arg7: memref<16x1xf32, #tpu.memory_space<vmem>>, %arg8: memref<16x1xf32, #tpu.memory_space<vmem>>) attributes {dimension_semantics = [#tpu.dimension_semantics<parallel>], iteration_bounds = array<i64: 1>, scalar_prefetch = 0 : i64, scratch_operands = 0 : i64, tpu.core_type = #tpu.core_type<tc>, window_params = [{transform_indices = @transform_0, window_bounds = array<i64: 16, 32>}, {pipeline_mode = #tpu.pipeline_mode<synchronous>, transform_indices = @transform_1, window_bounds = array<i64: 32, 3072>}, {pipeline_mode = #tpu.pipeline_mode<synchronous>, transform_indices = @transform_2, window_bounds = array<i64: 1, 32>}, {pipeline_mode = #tpu.pipeline_mode<synchronous>, transform_indices = @transform_3, window_bounds = array<i64: 1, 32>}, {pipeline_mode = #tpu.pipeline_mode<synchronous>, transform_indices = @transform_4, window_bounds = array<i64: 1, 3072>}, {transform_indices = @transform_5, window_bounds = array<i64: 16, 3072>}, {transform_indices = @transform_6, window_bounds = array<i64: 16, 1>}, {transform_indices = @transform_7, window_bounds = array<i64: 16, 1>}]} {
    %c0 = arith.constant 0 : index
    %c0_0 = arith.constant 0 : index
    %0 = vector.load %arg1[%c0, %c0_0] : memref<16x32xf32, #tpu.memory_space<vmem>>, vector<16x32xf32>
    %cst = arith.constant dense<0.000000e+00> : vector<16xf32>
    %1 = vector.multi_reduction <add>, %0, %cst [1] : vector<16x32xf32> to vector<16xf32>
    %2 = vector.shape_cast %1 : vector<16xf32> to vector<16x1xf32>
    %cst_1 = arith.constant 3.200000e+01 : f32
    %3 = vector.broadcast %cst_1 : f32 to vector<16x1xf32>
    %4 = arith.divf %2, %3 : vector<16x1xf32>
    %5 = vector.broadcast %4 : vector<16x1xf32> to vector<16x32xf32>
    %6 = arith.subf %0, %5 : vector<16x32xf32>
    %7 = arith.mulf %6, %6 : vector<16x32xf32>
    %cst_2 = arith.constant dense<0.000000e+00> : vector<16xf32>
    %8 = vector.multi_reduction <add>, %7, %cst_2 [1] : vector<16x32xf32> to vector<16xf32>
    %9 = vector.shape_cast %8 : vector<16xf32> to vector<16x1xf32>
    %cst_3 = arith.constant 3.200000e+01 : f32
    %10 = vector.broadcast %cst_3 : f32 to vector<16x1xf32>
    %11 = arith.divf %9, %10 : vector<16x1xf32>
    %12 = vector.broadcast %4 : vector<16x1xf32> to vector<16x32xf32>
    %13 = arith.subf %0, %12 : vector<16x32xf32>
    %cst_4 = arith.constant 9.99999974E-6 : f32
    %14 = vector.broadcast %cst_4 : f32 to vector<16x1xf32>
    %15 = arith.addf %11, %14 : vector<16x1xf32>
    %16 = math.rsqrt %15 : vector<16x1xf32>
    %17 = vector.broadcast %16 : vector<16x1xf32> to vector<16x32xf32>
    %18 = arith.mulf %13, %17 : vector<16x32xf32>
    %c0_5 = arith.constant 0 : index
    %c0_6 = arith.constant 0 : index
    %19 = vector.load %arg3[%c0_5, %c0_6] : memref<1x32xf32, #tpu.memory_space<vmem>>, vector<1x32xf32>
    %20 = vector.broadcast %19 : vector<1x32xf32> to vector<16x32xf32>
    %21 = arith.mulf %18, %20 : vector<16x32xf32>
    %c0_7 = arith.constant 0 : index
    %c0_8 = arith.constant 0 : index
    %22 = vector.load %arg4[%c0_7, %c0_8] : memref<1x32xf32, #tpu.memory_space<vmem>>, vector<1x32xf32>
    %23 = vector.broadcast %22 : vector<1x32xf32> to vector<16x32xf32>
    %24 = arith.addf %21, %23 : vector<16x32xf32>
    %25 = arith.truncf %24 : vector<16x32xf32> to vector<16x32xbf16>
    %c0_9 = arith.constant 0 : index
    %c0_10 = arith.constant 0 : index
    %26 = vector.load %arg2[%c0_9, %c0_10] : memref<32x3072xbf16, #tpu.memory_space<vmem>>, vector<32x3072xbf16>
    %cst_11 = arith.constant dense<0.000000e+00> : vector<16x3072xf32>
    %27 = tpu.matmul %25, %26, %cst_11 {dimension_numbers = #tpu.dot_dimension_numbers<[1], [0], [0], [1], [0, 0, 1, 1], [], []>} : vector<16x32xbf16>, vector<32x3072xbf16>, vector<16x3072xf32> -> vector<16x3072xf32>
    %c0_12 = arith.constant 0 : index
    %c0_13 = arith.constant 0 : index
    %28 = vector.load %arg5[%c0_12, %c0_13] : memref<1x3072xf32, #tpu.memory_space<vmem>>, vector<1x3072xf32>
    %29 = vector.broadcast %28 : vector<1x3072xf32> to vector<16x3072xf32>
    %30 = arith.addf %27, %29 : vector<16x3072xf32>
    %cst_14 = arith.constant 5.000000e-01 : f32
    %31 = vector.broadcast %cst_14 : f32 to vector<16x3072xf32>
    %32 = arith.mulf %31, %30 : vector<16x3072xf32>
    %cst_15 = arith.constant 0.707106769 : f32
    %33 = vector.broadcast %cst_15 : f32 to vector<16x3072xf32>
    %34 = arith.mulf %30, %33 : vector<16x3072xf32>
    %35 = math.erf %34 : vector<16x3072xf32>
    %cst_16 = arith.constant 1.000000e+00 : f32
    %36 = vector.broadcast %cst_16 : f32 to vector<16x3072xf32>
    %37 = arith.addf %36, %35 : vector<16x3072xf32>
    %38 = arith.mulf %32, %37 : vector<16x3072xf32>
    %39 = arith.truncf %38 : vector<16x3072xf32> to vector<16x3072xbf16>
    %c0_17 = arith.constant 0 : index
    %c0_18 = arith.constant 0 : index
    %40 = vector.load %arg6[%c0_17, %c0_18] : memref<16x3072xbf16, #tpu.memory_space<vmem>>, vector<16x3072xbf16>
    tpu.vector_store %arg6[%c0_17, %c0_18], %39 {strides = array<i32>} : memref<16x3072xbf16, #tpu.memory_space<vmem>>, vector<16x3072xbf16>,
    %41 = vector.extract_strided_slice %38 {offsets = [0, 1536], sizes = [16, 1536], strides = [1, 1]} : vector<16x3072xf32> to vector<16x1536xf32>
    %cst_19 = arith.constant dense<0.000000e+00> : vector<16xf32>
    %42 = vector.multi_reduction <add>, %41, %cst_19 [1] : vector<16x1536xf32> to vector<16xf32>
    %43 = vector.shape_cast %42 : vector<16xf32> to vector<16x1xf32>
    %cst_20 = arith.constant 1.536000e+03 : f32
    %44 = vector.broadcast %cst_20 : f32 to vector<16x1xf32>
    %45 = arith.divf %43, %44 : vector<16x1xf32>
    %46 = arith.mulf %41, %41 : vector<16x1536xf32>
    %cst_21 = arith.constant dense<0.000000e+00> : vector<16xf32>
    %47 = vector.multi_reduction <add>, %46, %cst_21 [1] : vector<16x1536xf32> to vector<16xf32>
    %48 = vector.shape_cast %47 : vector<16xf32> to vector<16x1xf32>
    %cst_22 = arith.constant 1.536000e+03 : f32
    %49 = vector.broadcast %cst_22 : f32 to vector<16x1xf32>
    %50 = arith.divf %48, %49 : vector<16x1xf32>
    %51 = arith.mulf %45, %45 : vector<16x1xf32>
    %52 = arith.subf %50, %51 : vector<16x1xf32>
    %c0_23 = arith.constant 0 : index
    %c0_24 = arith.constant 0 : index
    %53 = vector.load %arg7[%c0_23, %c0_24] : memref<16x1xf32, #tpu.memory_space<vmem>>, vector<16x1xf32>
    tpu.vector_store %arg7[%c0_23, %c0_24], %45 {strides = array<i32>} : memref<16x1xf32, #tpu.memory_space<vmem>>, vector<16x1xf32>,
    %cst_25 = arith.constant 0.000000e+00 : f32
    %54 = vector.broadcast %cst_25 : f32 to vector<16x1xf32>
    %55 = arith.maximumf %52, %54 : vector<16x1xf32>
    %cst_26 = arith.constant 9.99999974E-6 : f32
    %56 = vector.broadcast %cst_26 : f32 to vector<16x1xf32>
    %57 = arith.addf %55, %56 : vector<16x1xf32>
    %58 = math.rsqrt %57 : vector<16x1xf32>
    %c0_27 = arith.constant 0 : index
    %c0_28 = arith.constant 0 : index
    %59 = vector.load %arg8[%c0_27, %c0_28] : memref<16x1xf32, #tpu.memory_space<vmem>>, vector<16x1xf32>
    tpu.vector_store %arg8[%c0_27, %c0_28], %58 {strides = array<i32>} : memref<16x1xf32, #tpu.memory_space<vmem>>, vector<16x1xf32>,
    return
  }
  func.func @transform_0(%arg0: i32) -> (i32, i32) {
    %c0_i32 = arith.constant 0 : i32
    %c0_i32_0 = arith.constant 0 : i32
    return %arg0, %c0_i32 : i32, i32
  }
  func.func @transform_1(%arg0: i32) -> (i32, i32) {
    %c0_i32 = arith.constant 0 : i32
    %c0_i32_0 = arith.constant 0 : i32
    %c0_i32_1 = arith.constant 0 : i32
    return %c0_i32, %c0_i32_0 : i32, i32
  }
  func.func @transform_2(%arg0: i32) -> (i32, i32) {
    %c0_i32 = arith.constant 0 : i32
    %c0_i32_0 = arith.constant 0 : i32
    %c0_i32_1 = arith.constant 0 : i32
    return %c0_i32, %c0_i32_0 : i32, i32
  }
  func.func @transform_3(%arg0: i32) -> (i32, i32) {
    %c0_i32 = arith.constant 0 : i32
    %c0_i32_0 = arith.constant 0 : i32
    %c0_i32_1 = arith.constant 0 : i32
    return %c0_i32, %c0_i32_0 : i32, i32
  }
  func.func @transform_4(%arg0: i32) -> (i32, i32) {
    %c0_i32 = arith.constant 0 : i32
    %c0_i32_0 = arith.constant 0 : i32
    %c0_i32_1 = arith.constant 0 : i32
    return %c0_i32, %c0_i32_0 : i32, i32
  }
  func.func @transform_5(%arg0: i32) -> (i32, i32) {
    %c0_i32 = arith.constant 0 : i32
    %c0_i32_0 = arith.constant 0 : i32
    return %arg0, %c0_i32 : i32, i32
  }
  func.func @transform_6(%arg0: i32) -> (i32, i32) {
    %c0_i32 = arith.constant 0 : i32
    %c0_i32_0 = arith.constant 0 : i32
    return %arg0, %c0_i32 : i32, i32
  }
  func.func @transform_7(%arg0: i32) -> (i32, i32) {
    %c0_i32 = arith.constant 0 : i32
    %c0_i32_0 = arith.constant 0 : i32
    return %arg0, %c0_i32 : i32, i32
  }
}

module attributes {stable_mosaic.version = 11 : i64} {
  func.func @_csgu_kernel(%arg0: i32, %arg1: i32, %arg2: memref<1x8x512xbf16, #tpu.memory_space<vmem>>, %arg3: memref<1x8x512xbf16, #tpu.memory_space<vmem>>, %arg4: memref<1x8x1xf32, #tpu.memory_space<vmem>>, %arg5: memref<1x8x1xf32, #tpu.memory_space<vmem>>, %arg6: memref<1x512xf32, #tpu.memory_space<vmem>>, %arg7: memref<1x512xf32, #tpu.memory_space<vmem>>, %arg8: memref<7x512xf32, #tpu.memory_space<vmem>>, %arg9: memref<1x512xf32, #tpu.memory_space<vmem>>, %arg10: memref<1x8x512xbf16, #tpu.memory_space<vmem>>, %arg11: memref<14x512xf32, #tpu.memory_space<vmem>>) attributes {dimension_semantics = [#tpu.dimension_semantics<parallel>, #tpu.dimension_semantics<parallel>], iteration_bounds = array<i64: 2, 3>, scalar_prefetch = 0 : i64, scratch_operands = 1 : i64, tpu.core_type = #tpu.core_type<tc>, window_params = [{transform_indices = @transform_0, window_bounds = array<i64: 1, 8, 512>}, {transform_indices = @transform_1, window_bounds = array<i64: 1, 8, 512>}, {transform_indices = @transform_2, window_bounds = array<i64: 1, 8, 1>}, {transform_indices = @transform_3, window_bounds = array<i64: 1, 8, 1>}, {transform_indices = @transform_4, window_bounds = array<i64: 1, 512>}, {transform_indices = @transform_5, window_bounds = array<i64: 1, 512>}, {transform_indices = @transform_6, window_bounds = array<i64: 7, 512>}, {transform_indices = @transform_7, window_bounds = array<i64: 1, 512>}, {transform_indices = @transform_8, window_bounds = array<i64: 1, 8, 512>}]} {
    %c0 = arith.constant 0 : index
    %c0_0 = arith.constant 0 : index
    %c0_1 = arith.constant 0 : index
    %0 = vector.load %arg3[%c0, %c0_0, %c0_1] : memref<1x8x512xbf16, #tpu.memory_space<vmem>>, vector<1x8x512xbf16>
    %1 = vector.shape_cast %0 : vector<1x8x512xbf16> to vector<8x512xbf16>
    %2 = arith.extf %1 : vector<8x512xbf16> to vector<8x512xf32>
    %c0_2 = arith.constant 0 : index
    %c0_3 = arith.constant 0 : index
    %c0_4 = arith.constant 0 : index
    %3 = vector.load %arg4[%c0_2, %c0_3, %c0_4] : memref<1x8x1xf32, #tpu.memory_space<vmem>>, vector<1x8x1xf32>
    %4 = vector.shape_cast %3 : vector<1x8x1xf32> to vector<8x1xf32>
    %5 = vector.broadcast %4 : vector<8x1xf32> to vector<8x512xf32>
    %6 = arith.subf %2, %5 : vector<8x512xf32>
    %c0_5 = arith.constant 0 : index
    %c0_6 = arith.constant 0 : index
    %c0_7 = arith.constant 0 : index
    %7 = vector.load %arg5[%c0_5, %c0_6, %c0_7] : memref<1x8x1xf32, #tpu.memory_space<vmem>>, vector<1x8x1xf32>
    %8 = vector.shape_cast %7 : vector<1x8x1xf32> to vector<8x1xf32>
    %9 = vector.broadcast %8 : vector<8x1xf32> to vector<8x512xf32>
    %10 = arith.mulf %6, %9 : vector<8x512xf32>
    %c0_8 = arith.constant 0 : index
    %c0_9 = arith.constant 0 : index
    %11 = vector.load %arg6[%c0_8, %c0_9] : memref<1x512xf32, #tpu.memory_space<vmem>>, vector<1x512xf32>
    %12 = vector.broadcast %11 : vector<1x512xf32> to vector<8x512xf32>
    %13 = arith.mulf %10, %12 : vector<8x512xf32>
    %c0_10 = arith.constant 0 : index
    %c0_11 = arith.constant 0 : index
    %14 = vector.load %arg7[%c0_10, %c0_11] : memref<1x512xf32, #tpu.memory_space<vmem>>, vector<1x512xf32>
    %15 = vector.broadcast %14 : vector<1x512xf32> to vector<8x512xf32>
    %16 = arith.addf %13, %15 : vector<8x512xf32>
    %cst = arith.constant 0.000000e+00 : f32
    %17 = vector.broadcast %cst : f32 to vector<3x512xf32>
    %c0_12 = arith.constant 0 : index
    %c0_13 = arith.constant 0 : index
    %18 = vector.load %arg11[%c0_12, %c0_13] : memref<14x512xf32, #tpu.memory_space<vmem>>, vector<3x512xf32>
    tpu.vector_store %arg11[%c0_12, %c0_13], %17 {strides = array<i32>} : memref<14x512xf32, #tpu.memory_space<vmem>>, vector<3x512xf32>,
    %c11 = arith.constant 11 : index
    %c0_14 = arith.constant 0 : index
    %19 = vector.load %arg11[%c11, %c0_14] : memref<14x512xf32, #tpu.memory_space<vmem>>, vector<3x512xf32>
    tpu.vector_store %arg11[%c11, %c0_14], %17 {strides = array<i32>} : memref<14x512xf32, #tpu.memory_space<vmem>>, vector<3x512xf32>,
    %c3 = arith.constant 3 : index
    %c0_15 = arith.constant 0 : index
    %20 = vector.load %arg11[%c3, %c0_15] : memref<14x512xf32, #tpu.memory_space<vmem>>, vector<8x512xf32>
    tpu.vector_store %arg11[%c3, %c0_15], %16 {strides = array<i32>} : memref<14x512xf32, #tpu.memory_space<vmem>>, vector<8x512xf32>,
    %cst_16 = arith.constant 0.000000e+00 : f32
    %21 = vector.broadcast %cst_16 : f32 to vector<8x512xf32>
    %c0_17 = arith.constant 0 : index
    %c0_18 = arith.constant 0 : index
    %22 = vector.load %arg11[%c0_17, %c0_18] : memref<14x512xf32, #tpu.memory_space<vmem>>, vector<8x512xf32>
    %c0_19 = arith.constant 0 : index
    %c0_20 = arith.constant 0 : index
    %23 = vector.load %arg8[%c0_19, %c0_20] : memref<7x512xf32, #tpu.memory_space<vmem>>, vector<1x512xf32>
    %24 = vector.broadcast %23 : vector<1x512xf32> to vector<8x512xf32>
    %25 = arith.mulf %22, %24 : vector<8x512xf32>
    %26 = arith.addf %21, %25 : vector<8x512xf32>
    %c1 = arith.constant 1 : index
    %c0_21 = arith.constant 0 : index
    %27 = vector.load %arg11[%c1, %c0_21] : memref<14x512xf32, #tpu.memory_space<vmem>>, vector<8x512xf32>
    %c1_22 = arith.constant 1 : index
    %c0_23 = arith.constant 0 : index
    %28 = vector.load %arg8[%c1_22, %c0_23] : memref<7x512xf32, #tpu.memory_space<vmem>>, vector<1x512xf32>
    %29 = vector.broadcast %28 : vector<1x512xf32> to vector<8x512xf32>
    %30 = arith.mulf %27, %29 : vector<8x512xf32>
    %31 = arith.addf %26, %30 : vector<8x512xf32>
    %c2 = arith.constant 2 : index
    %c0_24 = arith.constant 0 : index
    %32 = vector.load %arg11[%c2, %c0_24] : memref<14x512xf32, #tpu.memory_space<vmem>>, vector<8x512xf32>
    %c2_25 = arith.constant 2 : index
    %c0_26 = arith.constant 0 : index
    %33 = vector.load %arg8[%c2_25, %c0_26] : memref<7x512xf32, #tpu.memory_space<vmem>>, vector<1x512xf32>
    %34 = vector.broadcast %33 : vector<1x512xf32> to vector<8x512xf32>
    %35 = arith.mulf %32, %34 : vector<8x512xf32>
    %36 = arith.addf %31, %35 : vector<8x512xf32>
    %c3_27 = arith.constant 3 : index
    %c0_28 = arith.constant 0 : index
    %37 = vector.load %arg11[%c3_27, %c0_28] : memref<14x512xf32, #tpu.memory_space<vmem>>, vector<8x512xf32>
    %c3_29 = arith.constant 3 : index
    %c0_30 = arith.constant 0 : index
    %38 = vector.load %arg8[%c3_29, %c0_30] : memref<7x512xf32, #tpu.memory_space<vmem>>, vector<1x512xf32>
    %39 = vector.broadcast %38 : vector<1x512xf32> to vector<8x512xf32>
    %40 = arith.mulf %37, %39 : vector<8x512xf32>
    %41 = arith.addf %36, %40 : vector<8x512xf32>
    %c4 = arith.constant 4 : index
    %c0_31 = arith.constant 0 : index
    %42 = vector.load %arg11[%c4, %c0_31] : memref<14x512xf32, #tpu.memory_space<vmem>>, vector<8x512xf32>
    %c4_32 = arith.constant 4 : index
    %c0_33 = arith.constant 0 : index
    %43 = vector.load %arg8[%c4_32, %c0_33] : memref<7x512xf32, #tpu.memory_space<vmem>>, vector<1x512xf32>
    %44 = vector.broadcast %43 : vector<1x512xf32> to vector<8x512xf32>
    %45 = arith.mulf %42, %44 : vector<8x512xf32>
    %46 = arith.addf %41, %45 : vector<8x512xf32>
    %c5 = arith.constant 5 : index
    %c0_34 = arith.constant 0 : index
    %47 = vector.load %arg11[%c5, %c0_34] : memref<14x512xf32, #tpu.memory_space<vmem>>, vector<8x512xf32>
    %c5_35 = arith.constant 5 : index
    %c0_36 = arith.constant 0 : index
    %48 = vector.load %arg8[%c5_35, %c0_36] : memref<7x512xf32, #tpu.memory_space<vmem>>, vector<1x512xf32>
    %49 = vector.broadcast %48 : vector<1x512xf32> to vector<8x512xf32>
    %50 = arith.mulf %47, %49 : vector<8x512xf32>
    %51 = arith.addf %46, %50 : vector<8x512xf32>
    %c6 = arith.constant 6 : index
    %c0_37 = arith.constant 0 : index
    %52 = vector.load %arg11[%c6, %c0_37] : memref<14x512xf32, #tpu.memory_space<vmem>>, vector<8x512xf32>
    %c6_38 = arith.constant 6 : index
    %c0_39 = arith.constant 0 : index
    %53 = vector.load %arg8[%c6_38, %c0_39] : memref<7x512xf32, #tpu.memory_space<vmem>>, vector<1x512xf32>
    %54 = vector.broadcast %53 : vector<1x512xf32> to vector<8x512xf32>
    %55 = arith.mulf %52, %54 : vector<8x512xf32>
    %56 = arith.addf %51, %55 : vector<8x512xf32>
    %c0_40 = arith.constant 0 : index
    %c0_41 = arith.constant 0 : index
    %57 = vector.load %arg9[%c0_40, %c0_41] : memref<1x512xf32, #tpu.memory_space<vmem>>, vector<1x512xf32>
    %58 = vector.broadcast %57 : vector<1x512xf32> to vector<8x512xf32>
    %59 = arith.addf %56, %58 : vector<8x512xf32>
    %c0_42 = arith.constant 0 : index
    %c0_43 = arith.constant 0 : index
    %c0_44 = arith.constant 0 : index
    %60 = vector.load %arg2[%c0_42, %c0_43, %c0_44] : memref<1x8x512xbf16, #tpu.memory_space<vmem>>, vector<1x8x512xbf16>
    %61 = vector.shape_cast %60 : vector<1x8x512xbf16> to vector<8x512xbf16>
    %62 = arith.extf %61 : vector<8x512xbf16> to vector<8x512xf32>
    %63 = arith.mulf %62, %59 : vector<8x512xf32>
    %64 = arith.truncf %63 : vector<8x512xf32> to vector<8x512xbf16>
    %c0_45 = arith.constant 0 : index
    %c0_46 = arith.constant 0 : index
    %c0_47 = arith.constant 0 : index
    %65 = vector.load %arg10[%c0_45, %c0_46, %c0_47] : memref<1x8x512xbf16, #tpu.memory_space<vmem>>, vector<1x8x512xbf16>
    %66 = vector.shape_cast %65 : vector<1x8x512xbf16> to vector<8x512xbf16>
    %67 = vector.shape_cast %64 : vector<8x512xbf16> to vector<1x8x512xbf16>
    tpu.vector_store %arg10[%c0_45, %c0_46, %c0_47], %67 {strides = array<i32>} : memref<1x8x512xbf16, #tpu.memory_space<vmem>>, vector<1x8x512xbf16>,
    return
  }
  func.func @transform_0(%arg0: i32, %arg1: i32) -> (i32, i32, i32) {
    %c0_i32 = arith.constant 0 : i32
    %c0_i32_0 = arith.constant 0 : i32
    return %arg0, %c0_i32, %arg1 : i32, i32, i32
  }
  func.func @transform_1(%arg0: i32, %arg1: i32) -> (i32, i32, i32) {
    %c3_i32 = arith.constant 3 : i32
    %0 = arith.addi %c3_i32, %arg1 : i32
    %c0_i32 = arith.constant 0 : i32
    %c0_i32_0 = arith.constant 0 : i32
    return %arg0, %c0_i32, %0 : i32, i32, i32
  }
  func.func @transform_2(%arg0: i32, %arg1: i32) -> (i32, i32, i32) {
    %c0_i32 = arith.constant 0 : i32
    %c0_i32_0 = arith.constant 0 : i32
    %c0_i32_1 = arith.constant 0 : i32
    return %arg0, %c0_i32, %c0_i32_0 : i32, i32, i32
  }
  func.func @transform_3(%arg0: i32, %arg1: i32) -> (i32, i32, i32) {
    %c0_i32 = arith.constant 0 : i32
    %c0_i32_0 = arith.constant 0 : i32
    %c0_i32_1 = arith.constant 0 : i32
    return %arg0, %c0_i32, %c0_i32_0 : i32, i32, i32
  }
  func.func @transform_4(%arg0: i32, %arg1: i32) -> (i32, i32) {
    %c0_i32 = arith.constant 0 : i32
    %c0_i32_0 = arith.constant 0 : i32
    return %c0_i32, %arg1 : i32, i32
  }
  func.func @transform_5(%arg0: i32, %arg1: i32) -> (i32, i32) {
    %c0_i32 = arith.constant 0 : i32
    %c0_i32_0 = arith.constant 0 : i32
    return %c0_i32, %arg1 : i32, i32
  }
  func.func @transform_6(%arg0: i32, %arg1: i32) -> (i32, i32) {
    %c0_i32 = arith.constant 0 : i32
    %c0_i32_0 = arith.constant 0 : i32
    return %c0_i32, %arg1 : i32, i32
  }
  func.func @transform_7(%arg0: i32, %arg1: i32) -> (i32, i32) {
    %c0_i32 = arith.constant 0 : i32
    %c0_i32_0 = arith.constant 0 : i32
    return %c0_i32, %arg1 : i32, i32
  }
  func.func @transform_8(%arg0: i32, %arg1: i32) -> (i32, i32, i32) {
    %c0_i32 = arith.constant 0 : i32
    %c0_i32_0 = arith.constant 0 : i32
    return %arg0, %c0_i32, %arg1 : i32, i32, i32
  }
}

module attributes {stable_mosaic.version = 11 : i64} {
  func.func @_linear_kernel(%arg0: i32, %arg1: memref<16x1536xbf16, #tpu.memory_space<vmem>>, %arg2: memref<1536x32xbf16, #tpu.memory_space<vmem>>, %arg3: memref<1x32xf32, #tpu.memory_space<vmem>>, %arg4: memref<16x32xbf16, #tpu.memory_space<vmem>>) attributes {dimension_semantics = [#tpu.dimension_semantics<parallel>], iteration_bounds = array<i64: 1>, scalar_prefetch = 0 : i64, scratch_operands = 0 : i64, tpu.core_type = #tpu.core_type<tc>, window_params = [{transform_indices = @transform_0, window_bounds = array<i64: 16, 1536>}, {pipeline_mode = #tpu.pipeline_mode<synchronous>, transform_indices = @transform_1, window_bounds = array<i64: 1536, 32>}, {pipeline_mode = #tpu.pipeline_mode<synchronous>, transform_indices = @transform_2, window_bounds = array<i64: 1, 32>}, {transform_indices = @transform_3, window_bounds = array<i64: 16, 32>}]} {
    %c0 = arith.constant 0 : index
    %c0_0 = arith.constant 0 : index
    %0 = vector.load %arg1[%c0, %c0_0] : memref<16x1536xbf16, #tpu.memory_space<vmem>>, vector<16x1536xbf16>
    %c0_1 = arith.constant 0 : index
    %c0_2 = arith.constant 0 : index
    %1 = vector.load %arg2[%c0_1, %c0_2] : memref<1536x32xbf16, #tpu.memory_space<vmem>>, vector<1536x32xbf16>
    %cst = arith.constant dense<0.000000e+00> : vector<16x32xf32>
    %2 = tpu.matmul %0, %1, %cst {dimension_numbers = #tpu.dot_dimension_numbers<[1], [0], [0], [1], [0, 0, 1, 1], [], []>} : vector<16x1536xbf16>, vector<1536x32xbf16>, vector<16x32xf32> -> vector<16x32xf32>
    %c0_3 = arith.constant 0 : index
    %c0_4 = arith.constant 0 : index
    %3 = vector.load %arg3[%c0_3, %c0_4] : memref<1x32xf32, #tpu.memory_space<vmem>>, vector<1x32xf32>
    %4 = vector.broadcast %3 : vector<1x32xf32> to vector<16x32xf32>
    %5 = arith.addf %2, %4 : vector<16x32xf32>
    %6 = arith.truncf %5 : vector<16x32xf32> to vector<16x32xbf16>
    %c0_5 = arith.constant 0 : index
    %c0_6 = arith.constant 0 : index
    %7 = vector.load %arg4[%c0_5, %c0_6] : memref<16x32xbf16, #tpu.memory_space<vmem>>, vector<16x32xbf16>
    tpu.vector_store %arg4[%c0_5, %c0_6], %6 {strides = array<i32>} : memref<16x32xbf16, #tpu.memory_space<vmem>>, vector<16x32xbf16>,
    return
  }
  func.func @transform_0(%arg0: i32) -> (i32, i32) {
    %c0_i32 = arith.constant 0 : i32
    %c0_i32_0 = arith.constant 0 : i32
    return %arg0, %c0_i32 : i32, i32
  }
  func.func @transform_1(%arg0: i32) -> (i32, i32) {
    %c0_i32 = arith.constant 0 : i32
    %c0_i32_0 = arith.constant 0 : i32
    %c0_i32_1 = arith.constant 0 : i32
    return %c0_i32, %c0_i32_0 : i32, i32
  }
  func.func @transform_2(%arg0: i32) -> (i32, i32) {
    %c0_i32 = arith.constant 0 : i32
    %c0_i32_0 = arith.constant 0 : i32
    %c0_i32_1 = arith.constant 0 : i32
    return %c0_i32, %c0_i32_0 : i32, i32
  }
  func.func @transform_3(%arg0: i32) -> (i32, i32) {
    %c0_i32 = arith.constant 0 : i32
    %c0_i32_0 = arith.constant 0 : i32
    return %arg0, %c0_i32 : i32, i32
  }
}

module attributes {stable_mosaic.version = 11 : i64} {
  func.func @_merge_kernel(%arg0: i32, %arg1: memref<16x32xf32, #tpu.memory_space<vmem>>, %arg2: memref<16x32xbf16, #tpu.memory_space<vmem>>, %arg3: memref<16x32xbf16, #tpu.memory_space<vmem>>, %arg4: memref<32x32xbf16, #tpu.memory_space<vmem>>, %arg5: memref<32x32xbf16, #tpu.memory_space<vmem>>, %arg6: memref<1x32xf32, #tpu.memory_space<vmem>>, %arg7: memref<16x32xf32, #tpu.memory_space<vmem>>) attributes {dimension_semantics = [#tpu.dimension_semantics<parallel>], iteration_bounds = array<i64: 1>, scalar_prefetch = 0 : i64, scratch_operands = 0 : i64, tpu.core_type = #tpu.core_type<tc>, window_params = [{transform_indices = @transform_0, window_bounds = array<i64: 16, 32>}, {transform_indices = @transform_1, window_bounds = array<i64: 16, 32>}, {transform_indices = @transform_2, window_bounds = array<i64: 16, 32>}, {pipeline_mode = #tpu.pipeline_mode<synchronous>, transform_indices = @transform_3, window_bounds = array<i64: 32, 32>}, {pipeline_mode = #tpu.pipeline_mode<synchronous>, transform_indices = @transform_4, window_bounds = array<i64: 32, 32>}, {pipeline_mode = #tpu.pipeline_mode<synchronous>, transform_indices = @transform_5, window_bounds = array<i64: 1, 32>}, {transform_indices = @transform_6, window_bounds = array<i64: 16, 32>}]} {
    %c0 = arith.constant 0 : index
    %c0_0 = arith.constant 0 : index
    %0 = vector.load %arg2[%c0, %c0_0] : memref<16x32xbf16, #tpu.memory_space<vmem>>, vector<16x32xbf16>
    %c0_1 = arith.constant 0 : index
    %c0_2 = arith.constant 0 : index
    %1 = vector.load %arg4[%c0_1, %c0_2] : memref<32x32xbf16, #tpu.memory_space<vmem>>, vector<32x32xbf16>
    %cst = arith.constant dense<0.000000e+00> : vector<16x32xf32>
    %2 = tpu.matmul %0, %1, %cst {dimension_numbers = #tpu.dot_dimension_numbers<[1], [0], [0], [1], [0, 0, 1, 1], [], []>} : vector<16x32xbf16>, vector<32x32xbf16>, vector<16x32xf32> -> vector<16x32xf32>
    %c0_3 = arith.constant 0 : index
    %c0_4 = arith.constant 0 : index
    %3 = vector.load %arg3[%c0_3, %c0_4] : memref<16x32xbf16, #tpu.memory_space<vmem>>, vector<16x32xbf16>
    %c0_5 = arith.constant 0 : index
    %c0_6 = arith.constant 0 : index
    %4 = vector.load %arg5[%c0_5, %c0_6] : memref<32x32xbf16, #tpu.memory_space<vmem>>, vector<32x32xbf16>
    %cst_7 = arith.constant dense<0.000000e+00> : vector<16x32xf32>
    %5 = tpu.matmul %3, %4, %cst_7 {dimension_numbers = #tpu.dot_dimension_numbers<[1], [0], [0], [1], [0, 0, 1, 1], [], []>} : vector<16x32xbf16>, vector<32x32xbf16>, vector<16x32xf32> -> vector<16x32xf32>
    %6 = arith.addf %2, %5 : vector<16x32xf32>
    %c0_8 = arith.constant 0 : index
    %c0_9 = arith.constant 0 : index
    %7 = vector.load %arg6[%c0_8, %c0_9] : memref<1x32xf32, #tpu.memory_space<vmem>>, vector<1x32xf32>
    %8 = vector.broadcast %7 : vector<1x32xf32> to vector<16x32xf32>
    %9 = arith.addf %6, %8 : vector<16x32xf32>
    %c0_10 = arith.constant 0 : index
    %c0_11 = arith.constant 0 : index
    %10 = vector.load %arg1[%c0_10, %c0_11] : memref<16x32xf32, #tpu.memory_space<vmem>>, vector<16x32xf32>
    %11 = arith.addf %10, %9 : vector<16x32xf32>
    %c0_12 = arith.constant 0 : index
    %c0_13 = arith.constant 0 : index
    %12 = vector.load %arg7[%c0_12, %c0_13] : memref<16x32xf32, #tpu.memory_space<vmem>>, vector<16x32xf32>
    tpu.vector_store %arg7[%c0_12, %c0_13], %11 {strides = array<i32>} : memref<16x32xf32, #tpu.memory_space<vmem>>, vector<16x32xf32>,
    return
  }
  func.func @transform_0(%arg0: i32) -> (i32, i32) {
    %c0_i32 = arith.constant 0 : i32
    %c0_i32_0 = arith.constant 0 : i32
    return %arg0, %c0_i32 : i32, i32
  }
  func.func @transform_1(%arg0: i32) -> (i32, i32) {
    %c0_i32 = arith.constant 0 : i32
    %c0_i32_0 = arith.constant 0 : i32
    return %arg0, %c0_i32 : i32, i32
  }
  func.func @transform_2(%arg0: i32) -> (i32, i32) {
    %c0_i32 = arith.constant 0 : i32
    %c0_i32_0 = arith.constant 0 : i32
    return %arg0, %c0_i32 : i32, i32
  }
  func.func @transform_3(%arg0: i32) -> (i32, i32) {
    %c0_i32 = arith.constant 0 : i32
    %c0_i32_0 = arith.constant 0 : i32
    %c0_i32_1 = arith.constant 0 : i32
    return %c0_i32, %c0_i32_0 : i32, i32
  }
  func.func @transform_4(%arg0: i32) -> (i32, i32) {
    %c0_i32 = arith.constant 0 : i32
    %c0_i32_0 = arith.constant 0 : i32
    %c0_i32_1 = arith.constant 0 : i32
    return %c0_i32, %c0_i32_0 : i32, i32
  }
  func.func @transform_5(%arg0: i32) -> (i32, i32) {
    %c0_i32 = arith.constant 0 : i32
    %c0_i32_0 = arith.constant 0 : i32
    %c0_i32_1 = arith.constant 0 : i32
    return %c0_i32, %c0_i32_0 : i32, i32
  }
  func.func @transform_6(%arg0: i32) -> (i32, i32) {
    %c0_i32 = arith.constant 0 : i32
    %c0_i32_0 = arith.constant 0 : i32
    return %arg0, %c0_i32 : i32, i32
  }
}

</mosaic_0001>

<bundles_post_ra>
// kernel: tpu_custom_call.1
= control target key start
LH: loop header
LB: loop body
LE: loop exit
PB: predicated region body
PF: predicated region fallthrough
CT: control target
= control target key end

     0   :  { %6 = vsyncpa [#allocation3], 0  ;;  %s106_s0 = inlined_call_operand.hbm [shape: f32[8,128], index: 0, kind: input, shape index: {}]   ;;  %s107_s1 = inlined_call_operand.hbm [shape: f32[8,128], index: 1, kind: output, shape index: {}]  }
   0x1   :  { %7 = vsyncpa [#allocation4], 0  ;;  %s87_s6 = smov [#allocation2]  }
   0x2   :  { %s14_s7 = sshll.u32 %s87_s6, 4  ;;  %s15_s7 = int_to_ptr.vmem [resolvable:$true] %s14_s7 }
   0x3   :  { %s51_s8 = scalar_lea.vmem %s15_s7, 128  ;;  %p56_p1 = scmp.lt.s32.totalorder %s15_s7, %s15_s7 }
   0x4   :  { %p52_p0 = scmp.ne.s32.totalorder %s15_s7, %s51_s8  ;;  %p57_p2 = scmp.lt.s32.totalorder %s51_s8, %s51_s8 }
   0x6   :  { %p58_p3 = por %p57_p2, %p56_p1 }
   0x8   :  { %p59_p4 = pnand %p58_p3, %p52_p0 }
   0xa   :  { %62 = shalt.err (!%p59_p4)
}
   0xb   :  { %17 = dma.hbm_to_vmem [thread:$0]  %s106_s0, 128, %s15_s7, [#allocation3]  }
   0xc   :  { %83 = dma.done.wait [#allocation3], 128  }
   0xd   :  { %84 = vsyncadd [#allocation3], 4294967168  ;;  %v21_v0 = vld [vmem:[#allocation2] sm:$0xff]  ;;  %s88_s11 = smov 1   ;;  %s89_s12 = smov [#allocation5]  }
   0xe   :  { %22 = vrot.lane.b32.xlu0 %v21_v0, %s88_s11  ;;  %s31_s13 = sshll.u32 %s89_s12, 4  ;;  %s32_s13 = int_to_ptr.vmem [resolvable:$true] %s31_s13 }
   0xf   :  { %s63_s14 = scalar_lea.vmem %s32_s13, 128  ;;  %p68_p6 = scmp.lt.s32.totalorder %s32_s13, %s32_s13 }
  0x10   :  { %p64_p5 = scmp.ne.s32.totalorder %s32_s13, %s63_s14  ;;  %p69_p7 = scmp.lt.s32.totalorder %s63_s14, %s63_s14 }
  0x12   :  { %p70_p8 = por %p69_p7, %p68_p6 }
  0x14   :  { %p71_p9 = pnand %p70_p8, %p64_p5 }
  0x80   :  { %v23_v1 = vpop.permute.xlu0 %22 }
  0x81   :  { %24 = vst [vmem:[#allocation5] sm:$0xff] %v23_v1 }
  0x82   :  { %74 = shalt.err (!%p71_p9)
}
  0x83   :  { %34 = dma.vmem_to_hbm [thread:$0]  %s32_s13, 128, %s107_s1, [#allocation4]  }
  0x84   :  { %85 = dma.done.wait [#allocation4], 128  }
  0x85   :  { %86 = vsyncadd [#allocation4], 4294967168 }
  0x86   :  { %38 = vsyncpa [#allocation3], 1 }
  0x87   :  { %39 = vsyncpa [#allocation4], 1 }

// kernel: branchformer_forward.8
= control target key start
LH: loop header
LB: loop body
LE: loop exit
PB: predicated region body
PF: predicated region fallthrough
CT: control target
= control target key end

     0   :  { %vm20_vm0 = vcmask 261120   ;;  %v657_v23 = vmov 0   ;;  %s813_s0 = inlined_call_operand.vmem [shape: f32[16,32], index: 0, kind: input, shape index: {}]   ;;  %s814_s1 = inlined_call_operand.vmem [shape: bf16[32,1536], index: 1, kind: input, shape index: {}]   ;;  %s815_s2 = inlined_call_operand.vmem [shape: f32[1,32], index: 2, kind: input, shape index: {}]   ;;  %s816_s3 = inlined_call_operand.vmem [shape: f32[1,32], index: 3, kind: input, shape index: {}]   ;;  %s817_s4 = inlined_call_operand.vmem [shape: bf16[16,1536], index: 4, kind: output, shape index: {}]  }
   0x1   :  { %v18_v0 = vld [vmem:[%s813_s0] sm:$0xff]  ;;  %v19_v1 = vld [vmem:[%s813_s0 + $0x8] sm:$0xff]  ;;  %246 = vmatprep.mubr.bf16.mxu0 %v657_v23  ;;  %289 = vmatprep.mubr.bf16.mxu1 %v657_v23 }
   0x2   :  { %v21_v2 = vsel %vm20_vm0, %v18_v0, 0.0  ;;  %v24_v3 = vsel %vm20_vm0, %v19_v1, 0.0  ;;  %v617_v14 = vld [vmem:[%s814_s1 + $0x64] ss:$48 sps:$4 sm:$0xff]   ;;  %v619_v15 = vld [vmem:[%s814_s1 + $0x6c] ss:$48 sps:$4 sm:$0xff]  }
   0x3   :  { %22 = vadd.xlane.f32.xlu0 %v21_v2  ;;  %226 = vmatprep.subr.bf16.mxu0 %v617_v14  ;;  %v621_v16 = vld [vmem:[%s814_s1 + $0x60] ss:$48 sps:$4 sm:$0xff]   ;;  %v622_v17 = vld [vmem:[%s814_s1 + $0x68] ss:$48 sps:$4 sm:$0xff]   ;;  %v623_v18 = vld [vmem:[%s814_s1 + $0x4] ss:$48 sps:$4 sm:$0xff]  }
   0x4   :  { %269 = vmatprep.subr.bf16.mxu1 %v619_v15  ;;  %227 = vmatpush1.bf16.msra.mxu0 %v621_v16  ;;  %v625_v19 = vld [vmem:[%s814_s1 + $0xc] ss:$48 sps:$4 sm:$0xff]   ;;  %v627_v20 = vld [vmem:[%s814_s1] ss:$48 sps:$4 sm:$0xff]   ;;  %v628_v21 = vld [vmem:[%s814_s1 + $0x8] ss:$48 sps:$4 sm:$0xff]  }
   0x5   :  { %270 = vmatpush1.bf16.msra.mxu1 %v622_v17  ;;  %228 = vmatprep.subr.bf16.mxu0 %v623_v18  ;;  %v631_v22 = vld [vmem:[%s814_s1 + $0x74] ss:$48 sps:$4 sm:$0xff]   ;;  %v634_v24 = vld [vmem:[%s814_s1 + $0x7c] ss:$48 sps:$4 sm:$0xff]   ;;  %v560_v33 = vld [vmem:[%s815_s2] ss:$0 sm:$0xff] }
   0x6   :  { %271 = vmatprep.subr.bf16.mxu1 %v625_v19  ;;  %v561_v37 = vld [vmem:[%s816_s3] ss:$0 sm:$0xff]  ;;  %v632_v42 = vld [vmem:[%s814_s1 + $0x78] ss:$48 sps:$4 sm:$0xff]   ;;  %v637_v44 = vld [vmem:[%s814_s1 + $0x14] ss:$48 sps:$4 sm:$0xff]  }
   0x7   :  { %25 = vadd.xlane.f32.xlu0 %v24_v3  ;;  %v629_v41 = vld [vmem:[%s814_s1 + $0x70] ss:$48 sps:$4 sm:$0xff]   ;;  %v640_v45 = vld [vmem:[%s814_s1 + $0x1c] ss:$48 sps:$4 sm:$0xff]   ;;  %v638_v47 = vld [vmem:[%s814_s1 + $0x18] ss:$48 sps:$4 sm:$0xff]  }
   0x8   :  { %229 = vmatpush1.bf16.msra.mxu0 %v627_v20  ;;  %v635_v46 = vld [vmem:[%s814_s1 + $0x10] ss:$48 sps:$4 sm:$0xff]   ;;  %v643_v48 = vld [vmem:[%s814_s1 + $0x84] ss:$48 sps:$4 sm:$0xff]   ;;  %v646_v49 = vld [vmem:[%s814_s1 + $0x8c] ss:$48 sps:$4 sm:$0xff]  }
   0x9   :  { %272 = vmatpush1.bf16.msra.mxu1 %v628_v21  ;;  %312 = vmatprep.subr.bf16.mxu0 %v631_v22  ;;  %v641_v50 = vld [vmem:[%s814_s1 + $0x80] ss:$48 sps:$4 sm:$0xff]   ;;  %v644_v51 = vld [vmem:[%s814_s1 + $0x88] ss:$48 sps:$4 sm:$0xff]   ;;  %v649_v52 = vld [vmem:[%s814_s1 + $0x24] ss:$48 sps:$4 sm:$0xff]  }
   0xa   :  { %355 = vmatprep.subr.bf16.mxu1 %v634_v24  ;;  %v652_v53 = vld [vmem:[%s814_s1 + $0x2c] ss:$48 sps:$4 sm:$0xff]   ;;  %v647_v54 = vld [vmem:[%s814_s1 + $0x20] ss:$48 sps:$4 sm:$0xff]   ;;  %v650_v55 = vld [vmem:[%s814_s1 + $0x28] ss:$48 sps:$4 sm:$0xff]  }
  0x8c   :  { %v23_v4 = vpop.xlane.xlu0 %22 }
  0x8d   :  { %v28_v5 = vmul.f32 0.03125, %v23_v4 }
  0x8f   :  { %v30_v6 = vsub.f32 %v18_v0, %v28_v5 }
  0x90   :  { %v26_v7 = vpop.xlane.xlu0 %25 }
  0x91   :  { %v29_v8 = vmul.f32 0.03125, %v26_v7  ;;  %v32_v9 = vmul.f32 %v30_v6, %v30_v6 }
  0x93   :  { %v31_v10 = vsub.f32 %v19_v1, %v29_v8  ;;  %v34_v11 = vsel %vm20_vm0, %v32_v9, 0.0 }
  0x94   :  { %35 = vadd.xlane.f32.xlu1 %v34_v11 }
  0x95   :  { %v33_v12 = vmul.f32 %v31_v10, %v31_v10 }
  0x97   :  { %v37_v13 = vsel %vm20_vm0, %v33_v12, 0.0 }
  0x98   :  { %38 = vadd.xlane.f32.xlu1 %v37_v13 }
 0x11d   :  { %v36_v25 = vpop.xlane.xlu1 %35 }
 0x11e   :  { %v40_v26 = vmul.f32 0.03125, %v36_v25 }
 0x120   :  { %v42_v27 = vadd.f32 1e-05, %v40_v26 }
 0x121   :  { %v39_v28 = vpop.xlane.xlu1 %38 }
 0x122   :  { %653 = vrsqrt.f32 %v42_v27  ;;  %v41_v29 = vmul.f32 0.03125, %v39_v28 }
 0x124   :  { %v43_v30 = vadd.f32 1e-05, %v41_v29 }
 0x126   :  { %655 = vrsqrt.f32 %v43_v30 }
 0x12f   :  { %v654_v31 = vpop.eup %653 }
 0x130   :  { %v46_v32 = vmul.f32 %v654_v31, %v30_v6 }
 0x132   :  { %v55_v35 = vmul.f32 %v560_v33, %v46_v32 }
 0x133   :  { %v656_v34 = vpop.eup %655 }
 0x134   :  { %v47_v36 = vmul.f32 %v656_v34, %v31_v10  ;;  %v64_v40 = vadd.f32 %v561_v37, %v55_v35 }
 0x136   :  { %v56_v38 = vmul.f32 %v560_v33, %v47_v36 }
 0x138   :  { %v65_v39 = vadd.f32 %v561_v37, %v56_v38 }
 0x13a   :  { %v66_v43 = vpack.c.bf16 %v65_v39, %v64_v40 }
 0x13c   :  { %586 = vmatmul.mubr.msk.bf16.vlgmr.msra.gmra.mxu0 %vm20_vm0, %v66_v43  ;;  %587 = vmatmul.mubr.msk.bf16.vlgmr.msra.gmra.mxu1 %vm20_vm0, %v66_v43 }
 0x13d   :  { %313 = vmatpush1.bf16.msra.mxu0 %v629_v41  ;;  %356 = vmatpush1.bf16.msra.mxu1 %v632_v42 }
 0x13e   :  { %314 = vmatprep.subr.bf16.mxu0 %v637_v44  ;;  %357 = vmatprep.subr.bf16.mxu1 %v640_v45 }
 0x13f   :  { %332 = vmatprep.mubr.bf16.mxu0 %v657_v23  ;;  %375 = vmatprep.mubr.bf16.mxu1 %v657_v23 }
 0x141   :  { %315 = vmatpush1.bf16.msra.mxu0 %v635_v46  ;;  %358 = vmatpush1.bf16.msra.mxu1 %v638_v47 }
 0x142   :  { %398 = vmatprep.subr.bf16.mxu0 %v643_v48  ;;  %441 = vmatprep.subr.bf16.mxu1 %v646_v49 }
 0x144   :  { %588 = vmatmul.mubr.msk.bf16.vlgmr.msra.gmra.mxu0 %vm20_vm0, %v66_v43  ;;  %589 = vmatmul.mubr.msk.bf16.vlgmr.msra.gmra.mxu1 %vm20_vm0, %v66_v43 }
 0x145   :  { %399 = vmatpush1.bf16.msra.mxu0 %v641_v50  ;;  %442 = vmatpush1.bf16.msra.mxu1 %v644_v51 }
 0x146   :  { %400 = vmatprep.subr.bf16.mxu0 %v649_v52  ;;  %443 = vmatprep.subr.bf16.mxu1 %v652_v53 }
 0x147   :  { %418 = vmatprep.mubr.bf16.mxu0 %v657_v23  ;;  %461 = vmatprep.mubr.bf16.mxu1 %v657_v23 }
 0x149   :  { %401 = vmatpush1.bf16.msra.mxu0 %v647_v54  ;;  %444 = vmatpush1.bf16.msra.mxu1 %v650_v55 }
 0x14c   :  { %590 = vmatmul.mubr.msk.bf16.vlgmr.msra.gmra.mxu0 %vm20_vm0, %v66_v43  ;;  %591 = vmatmul.mubr.msk.bf16.vlgmr.msra.gmra.mxu1 %vm20_vm0, %v66_v43 }
 0x1fc   :  { %v248_v56 = vpop.f32.mrf.mxu0  ;;  %v291_v57 = vpop.f32.mrf.mxu1 }
 0x1fe   :  { %v250_v58 = vpop.f32.mrf.mxu0  ;;  %v293_v59 = vpop.f32.mrf.mxu1 }
 0x1ff   :  { %v604_v60 = vpack.c.bf16 %v250_v58, %v248_v56  ;;  %v605_v61 = vpack.c.bf16 %v293_v59, %v291_v57 }
 0x200   :  { %v252_v62 = vpop.f32.mrf.mxu0  ;;  %v295_v63 = vpop.f32.mrf.mxu1 }
 0x201   :  { %544 = vst [vmem:[%s817_s4] sm:$0xff] %v604_v60  ;;  %545 = vst [vmem:[%s817_s4 + $0x8] sm:$0xff] %v605_v61 }
 0x202   :  { %v254_v0 = vpop.f32.mrf.mxu0  ;;  %v297_v1 = vpop.f32.mrf.mxu1 }
 0x203   :  { %v610_v2 = vpack.c.bf16 %v254_v0, %v252_v62  ;;  %v611_v3 = vpack.c.bf16 %v297_v1, %v295_v63 }
 0x204   :  { %v334_v4 = vpop.f32.mrf.mxu0  ;;  %v377_v5 = vpop.f32.mrf.mxu1 }
 0x205   :  { %550 = vst [vmem:[%s817_s4 + $0x30] sm:$0xff] %v610_v2  ;;  %551 = vst [vmem:[%s817_s4 + $0x38] sm:$0xff] %v611_v3 }
 0x206   :  { %v336_v6 = vpop.f32.mrf.mxu0  ;;  %v379_v7 = vpop.f32.mrf.mxu1 }
 0x207   :  { %v606_v8 = vpack.c.bf16 %v336_v6, %v334_v4  ;;  %v607_v9 = vpack.c.bf16 %v379_v7, %v377_v5 }
 0x208   :  { %v338_v10 = vpop.f32.mrf.mxu0  ;;  %v381_v11 = vpop.f32.mrf.mxu1 }
 0x209   :  { %546 = vst [vmem:[%s817_s4 + $0x10] sm:$0xff] %v606_v8  ;;  %547 = vst [vmem:[%s817_s4 + $0x18] sm:$0xff] %v607_v9 }
 0x20a   :  { %v340_v12 = vpop.f32.mrf.mxu0  ;;  %v383_v13 = vpop.f32.mrf.mxu1 }
 0x20b   :  { %v612_v14 = vpack.c.bf16 %v340_v12, %v338_v10  ;;  %v613_v15 = vpack.c.bf16 %v383_v13, %v381_v11 }
 0x20c   :  { %v420_v16 = vpop.f32.mrf.mxu0  ;;  %v463_v17 = vpop.f32.mrf.mxu1 }
 0x20d   :  { %552 = vst [vmem:[%s817_s4 + $0x40] sm:$0xff] %v612_v14  ;;  %553 = vst [vmem:[%s817_s4 + $0x48] sm:$0xff] %v613_v15 }
 0x20e   :  { %v422_v18 = vpop.f32.mrf.mxu0  ;;  %v465_v19 = vpop.f32.mrf.mxu1 }
 0x20f   :  { %v608_v20 = vpack.c.bf16 %v422_v18, %v420_v16  ;;  %v609_v21 = vpack.c.bf16 %v465_v19, %v463_v17 }
 0x210   :  { %v424_v22 = vpop.f32.mrf.mxu0  ;;  %v467_v23 = vpop.f32.mrf.mxu1 }
 0x211   :  { %548 = vst [vmem:[%s817_s4 + $0x20] sm:$0xff] %v608_v20  ;;  %549 = vst [vmem:[%s817_s4 + $0x28] sm:$0xff] %v609_v21 }
 0x212   :  { %v426_v24 = vpop.f32.mrf.mxu0  ;;  %v469_v25 = vpop.f32.mrf.mxu1 }
 0x213   :  { %v614_v26 = vpack.c.bf16 %v426_v24, %v424_v22  ;;  %v615_v27 = vpack.c.bf16 %v469_v25, %v467_v23 }
 0x215   :  { %554 = vst [vmem:[%s817_s4 + $0x50] sm:$0xff] %v614_v26  ;;  %555 = vst [vmem:[%s817_s4 + $0x58] sm:$0xff] %v615_v27 }

// kernel: branchformer_forward.9
= control target key start
LH: loop header
LB: loop body
LE: loop exit
PB: predicated region body
PF: predicated region fallthrough
CT: control target
= control target key end

     0   :  { %v664_v1 = vmov 0   ;;  %vm84_vm0 = vcmask 261120   ;;  %s880_s1 = inlined_call_operand.vmem [shape: bf16[32,512], index: 1, kind: input, shape index: {}]   ;;  %s881_s0 = inlined_call_operand.vmem [shape: f32[128,32], index: 0, kind: input, shape index: {}]   ;;  %s882_s2 = inlined_call_operand.vmem [shape: bf16[128,512], index: 2, kind: output, shape index: {}]  }
   0x1   :  { %v652_v0 = vld [vmem:[%s880_s1 + $0x24] ss:$16 sps:$4 sm:$0xff]   ;;  %141 = vmatprep.mubr.bf16.mxu0 %v664_v1  ;;  %254 = vmatprep.mubr.bf16.mxu1 %v664_v1  ;;  %v654_v2 = vld [vmem:[%s880_s1 + $0x2c] ss:$16 sps:$4 sm:$0xff]   ;;  %v656_v3 = vld [vmem:[%s880_s1 + $0x20] ss:$16 sps:$4 sm:$0xff]  }
   0x2   :  { %121 = vmatprep.subr.bf16.mxu0 %v652_v0  ;;  %v657_v4 = vld [vmem:[%s880_s1 + $0x28] ss:$16 sps:$4 sm:$0xff]   ;;  %234 = vmatprep.subr.bf16.mxu1 %v654_v2  ;;  %v658_v5 = vld [vmem:[%s880_s1 + $0x4] ss:$16 sps:$4 sm:$0xff]   ;;  %v660_v6 = vld [vmem:[%s880_s1 + $0xc] ss:$16 sps:$4 sm:$0xff]  }
   0x3   :  { %122 = vmatpush1.bf16.msra.mxu0 %v656_v3  ;;  %235 = vmatpush1.bf16.msra.mxu1 %v657_v4  ;;  %v662_v7 = vld [vmem:[%s880_s1] ss:$16 sps:$4 sm:$0xff]   ;;  %v663_v8 = vld [vmem:[%s880_s1 + $0x8] ss:$16 sps:$4 sm:$0xff]  }
   0x4   :  { %123 = vmatprep.subr.bf16.mxu0 %v658_v5  ;;  %v12_v9 = vld [vmem:[%s881_s0] sm:$0xff]  ;;  %v13_v10 = vld [vmem:[%s881_s0 + $0x8] sm:$0xff]  ;;  %236 = vmatprep.subr.bf16.mxu1 %v660_v6  ;;  %v14_v12 = vld [vmem:[%s881_s0 + $0x10] sm:$0xff] }
   0x5   :  { %v28_v11 = vpack.c.bf16 %v13_v10, %v12_v9  ;;  %v15_v13 = vld [vmem:[%s881_s0 + $0x18] sm:$0xff]  ;;  %v16_v15 = vld [vmem:[%s881_s0 + $0x20] sm:$0xff]  ;;  %v17_v16 = vld [vmem:[%s881_s0 + $0x28] sm:$0xff] }
   0x6   :  { %v29_v14 = vpack.c.bf16 %v15_v13, %v14_v12  ;;  %v30_v17 = vpack.c.bf16 %v17_v16, %v16_v15  ;;  %v18_v18 = vld [vmem:[%s881_s0 + $0x30] sm:$0xff]  ;;  %v19_v19 = vld [vmem:[%s881_s0 + $0x38] sm:$0xff]  ;;  %v20_v21 = vld [vmem:[%s881_s0 + $0x40] sm:$0xff] }
   0x7   :  { %124 = vmatpush1.bf16.msra.mxu0 %v662_v7  ;;  %237 = vmatpush1.bf16.msra.mxu1 %v663_v8  ;;  %v31_v20 = vpack.c.bf16 %v19_v19, %v18_v18  ;;  %v21_v22 = vld [vmem:[%s881_s0 + $0x48] sm:$0xff]  ;;  %v22_v24 = vld [vmem:[%s881_s0 + $0x50] sm:$0xff]  ;;  %v23_v25 = vld [vmem:[%s881_s0 + $0x58] sm:$0xff] }
   0x8   :  { %v32_v23 = vpack.c.bf16 %v21_v22, %v20_v21  ;;  %v33_v26 = vpack.c.bf16 %v23_v25, %v22_v24  ;;  %v24_v27 = vld [vmem:[%s881_s0 + $0x60] sm:$0xff]  ;;  %v25_v28 = vld [vmem:[%s881_s0 + $0x68] sm:$0xff]  ;;  %v26_v30 = vld [vmem:[%s881_s0 + $0x70] sm:$0xff] }
   0x9   :  { %v34_v29 = vpack.c.bf16 %v25_v28, %v24_v27  ;;  %v27_v31 = vld [vmem:[%s881_s0 + $0x78] sm:$0xff] }
   0xa   :  { %571 = vmatmul.mubr.msk.bf16.vlgmr.msra.gmra.mxu0 %vm84_vm0, %v28_v11  ;;  %579 = vmatmul.mubr.msk.bf16.vlgmr.msra.gmra.mxu1 %vm84_vm0, %v28_v11  ;;  %v35_v32 = vpack.c.bf16 %v27_v31, %v26_v30 }
   0xb   :  { %151 = vmatprep.mubr.bf16.mxu0 %v664_v1  ;;  %264 = vmatprep.mubr.bf16.mxu1 %v664_v1 }
  0x12   :  { %572 = vmatmul.mubr.msk.bf16.gmra.mxu0 %vm84_vm0, %v29_v14  ;;  %580 = vmatmul.mubr.msk.bf16.gmra.mxu1 %vm84_vm0, %v29_v14 }
  0x13   :  { %161 = vmatprep.mubr.bf16.mxu0 %v664_v1  ;;  %274 = vmatprep.mubr.bf16.mxu1 %v664_v1 }
  0x1a   :  { %573 = vmatmul.mubr.msk.bf16.gmra.mxu0 %vm84_vm0, %v30_v17  ;;  %581 = vmatmul.mubr.msk.bf16.gmra.mxu1 %vm84_vm0, %v30_v17 }
  0x1b   :  { %171 = vmatprep.mubr.bf16.mxu0 %v664_v1  ;;  %284 = vmatprep.mubr.bf16.mxu1 %v664_v1 }
  0x22   :  { %574 = vmatmul.mubr.msk.bf16.gmra.mxu0 %vm84_vm0, %v31_v20  ;;  %582 = vmatmul.mubr.msk.bf16.gmra.mxu1 %vm84_vm0, %v31_v20 }
  0x23   :  { %181 = vmatprep.mubr.bf16.mxu0 %v664_v1  ;;  %294 = vmatprep.mubr.bf16.mxu1 %v664_v1 }
  0x2a   :  { %575 = vmatmul.mubr.msk.bf16.gmra.mxu0 %vm84_vm0, %v32_v23  ;;  %583 = vmatmul.mubr.msk.bf16.gmra.mxu1 %vm84_vm0, %v32_v23 }
  0x2b   :  { %191 = vmatprep.mubr.bf16.mxu0 %v664_v1  ;;  %304 = vmatprep.mubr.bf16.mxu1 %v664_v1 }
  0x32   :  { %576 = vmatmul.mubr.msk.bf16.gmra.mxu0 %vm84_vm0, %v33_v26  ;;  %584 = vmatmul.mubr.msk.bf16.gmra.mxu1 %vm84_vm0, %v33_v26 }
  0x33   :  { %201 = vmatprep.mubr.bf16.mxu0 %v664_v1  ;;  %314 = vmatprep.mubr.bf16.mxu1 %v664_v1 }
  0x3a   :  { %577 = vmatmul.mubr.msk.bf16.gmra.mxu0 %vm84_vm0, %v34_v29  ;;  %585 = vmatmul.mubr.msk.bf16.gmra.mxu1 %vm84_vm0, %v34_v29 }
  0x3b   :  { %211 = vmatprep.mubr.bf16.mxu0 %v664_v1  ;;  %324 = vmatprep.mubr.bf16.mxu1 %v664_v1 }
  0x42   :  { %578 = vmatmul.mubr.msk.bf16.gmra.mxu0 %vm84_vm0, %v35_v32  ;;  %586 = vmatmul.mubr.msk.bf16.gmra.mxu1 %vm84_vm0, %v35_v32 }
  0xca   :  { %v143_v33 = vpop.f32.mrf.mxu0  ;;  %v256_v34 = vpop.f32.mrf.mxu1 }
  0xcc   :  { %v145_v35 = vpop.f32.mrf.mxu0  ;;  %v258_v36 = vpop.f32.mrf.mxu1 }
  0xcd   :  { %v619_v37 = vpack.c.bf16 %v145_v35, %v143_v33  ;;  %v620_v38 = vpack.c.bf16 %v258_v36, %v256_v34 }
  0xce   :  { %v147_v39 = vpop.f32.mrf.mxu0  ;;  %v260_v40 = vpop.f32.mrf.mxu1 }
  0xcf   :  { %527 = vst [vmem:[%s882_s2] sm:$0xff] %v619_v37  ;;  %528 = vst [vmem:[%s882_s2 + $0x8] sm:$0xff] %v620_v38 }
  0xd0   :  { %v149_v41 = vpop.f32.mrf.mxu0  ;;  %v262_v42 = vpop.f32.mrf.mxu1 }
  0xd1   :  { %v621_v43 = vpack.c.bf16 %v149_v41, %v147_v39  ;;  %v622_v44 = vpack.c.bf16 %v262_v42, %v260_v40 }
  0xd2   :  { %v153_v45 = vpop.f32.mrf.mxu0  ;;  %v266_v46 = vpop.f32.mrf.mxu1 }
  0xd3   :  { %529 = vst [vmem:[%s882_s2 + $0x10] sm:$0xff] %v621_v43  ;;  %530 = vst [vmem:[%s882_s2 + $0x18] sm:$0xff] %v622_v44 }
  0xd4   :  { %v155_v47 = vpop.f32.mrf.mxu0  ;;  %v268_v48 = vpop.f32.mrf.mxu1 }
  0xd5   :  { %v623_v49 = vpack.c.bf16 %v155_v47, %v153_v45  ;;  %v624_v50 = vpack.c.bf16 %v268_v48, %v266_v46 }
  0xd6   :  { %v157_v51 = vpop.f32.mrf.mxu0  ;;  %v270_v52 = vpop.f32.mrf.mxu1 }
  0xd7   :  { %531 = vst [vmem:[%s882_s2 + $0x20] sm:$0xff] %v623_v49  ;;  %532 = vst [vmem:[%s882_s2 + $0x28] sm:$0xff] %v624_v50 }
  0xd8   :  { %v159_v53 = vpop.f32.mrf.mxu0  ;;  %v272_v54 = vpop.f32.mrf.mxu1 }
  0xd9   :  { %v625_v55 = vpack.c.bf16 %v159_v53, %v157_v51  ;;  %v626_v56 = vpack.c.bf16 %v272_v54, %v270_v52 }
  0xda   :  { %v163_v57 = vpop.f32.mrf.mxu0  ;;  %v276_v58 = vpop.f32.mrf.mxu1 }
  0xdb   :  { %533 = vst [vmem:[%s882_s2 + $0x30] sm:$0xff] %v625_v55  ;;  %534 = vst [vmem:[%s882_s2 + $0x38] sm:$0xff] %v626_v56 }
  0xdc   :  { %v165_v59 = vpop.f32.mrf.mxu0  ;;  %v278_v60 = vpop.f32.mrf.mxu1 }
  0xdd   :  { %v627_v61 = vpack.c.bf16 %v165_v59, %v163_v57  ;;  %v628_v62 = vpack.c.bf16 %v278_v60, %v276_v58 }
  0xde   :  { %v167_v63 = vpop.f32.mrf.mxu0  ;;  %v280_v0 = vpop.f32.mrf.mxu1 }
  0xdf   :  { %535 = vst [vmem:[%s882_s2 + $0x40] sm:$0xff] %v627_v61  ;;  %536 = vst [vmem:[%s882_s2 + $0x48] sm:$0xff] %v628_v62 }
  0xe0   :  { %v169_v1 = vpop.f32.mrf.mxu0  ;;  %v282_v2 = vpop.f32.mrf.mxu1 }
  0xe1   :  { %v629_v3 = vpack.c.bf16 %v169_v1, %v167_v63  ;;  %v630_v4 = vpack.c.bf16 %v282_v2, %v280_v0 }
  0xe2   :  { %v173_v5 = vpop.f32.mrf.mxu0  ;;  %v286_v6 = vpop.f32.mrf.mxu1 }
  0xe3   :  { %537 = vst [vmem:[%s882_s2 + $0x50] sm:$0xff] %v629_v3  ;;  %538 = vst [vmem:[%s882_s2 + $0x58] sm:$0xff] %v630_v4 }
  0xe4   :  { %v175_v7 = vpop.f32.mrf.mxu0  ;;  %v288_v8 = vpop.f32.mrf.mxu1 }
  0xe5   :  { %v631_v9 = vpack.c.bf16 %v175_v7, %v173_v5  ;;  %v632_v10 = vpack.c.bf16 %v288_v8, %v286_v6 }
  0xe6   :  { %v177_v11 = vpop.f32.mrf.mxu0  ;;  %v290_v12 = vpop.f32.mrf.mxu1 }
  0xe7   :  { %539 = vst [vmem:[%s882_s2 + $0x60] sm:$0xff] %v631_v9  ;;  %540 = vst [vmem:[%s882_s2 + $0x68] sm:$0xff] %v632_v10 }
  0xe8   :  { %v179_v13 = vpop.f32.mrf.mxu0  ;;  %v292_v14 = vpop.f32.mrf.mxu1 }
  0xe9   :  { %v633_v15 = vpack.c.bf16 %v179_v13, %v177_v11  ;;  %v634_v16 = vpack.c.bf16 %v292_v14, %v290_v12 }
  0xea   :  { %v183_v17 = vpop.f32.mrf.mxu0  ;;  %v296_v18 = vpop.f32.mrf.mxu1 }
  0xeb   :  { %541 = vst [vmem:[%s882_s2 + $0x70] sm:$0xff] %v633_v15  ;;  %542 = vst [vmem:[%s882_s2 + $0x78] sm:$0xff] %v634_v16 }
  0xec   :  { %v185_v19 = vpop.f32.mrf.mxu0  ;;  %v298_v20 = vpop.f32.mrf.mxu1 }
  0xed   :  { %v635_v21 = vpack.c.bf16 %v185_v19, %v183_v17  ;;  %v636_v22 = vpack.c.bf16 %v298_v20, %v296_v18 }
  0xee   :  { %v187_v23 = vpop.f32.mrf.mxu0  ;;  %v300_v24 = vpop.f32.mrf.mxu1 }
  0xef   :  { %543 = vst [vmem:[%s882_s2 + $0x80] sm:$0xff] %v635_v21  ;;  %544 = vst [vmem:[%s882_s2 + $0x88] sm:$0xff] %v636_v22 }
  0xf0   :  { %v189_v25 = vpop.f32.mrf.mxu0  ;;  %v302_v26 = vpop.f32.mrf.mxu1 }
  0xf1   :  { %v637_v27 = vpack.c.bf16 %v189_v25, %v187_v23  ;;  %v638_v28 = vpack.c.bf16 %v302_v26, %v300_v24 }
  0xf2   :  { %v193_v29 = vpop.f32.mrf.mxu0  ;;  %v306_v30 = vpop.f32.mrf.mxu1 }
  0xf3   :  { %545 = vst [vmem:[%s882_s2 + $0x90] sm:$0xff] %v637_v27  ;;  %546 = vst [vmem:[%s882_s2 + $0x98] sm:$0xff] %v638_v28 }
  0xf4   :  { %v195_v31 = vpop.f32.mrf.mxu0  ;;  %v308_v32 = vpop.f32.mrf.mxu1 }
  0xf5   :  { %v639_v33 = vpack.c.bf16 %v195_v31, %v193_v29  ;;  %v640_v34 = vpack.c.bf16 %v308_v32, %v306_v30 }
  0xf6   :  { %v197_v35 = vpop.f32.mrf.mxu0  ;;  %v310_v36 = vpop.f32.mrf.mxu1 }
  0xf7   :  { %547 = vst [vmem:[%s882_s2 + $0xa0] sm:$0xff] %v639_v33  ;;  %548 = vst [vmem:[%s882_s2 + $0xa8] sm:$0xff] %v640_v34 }
  0xf8   :  { %v199_v37 = vpop.f32.mrf.mxu0  ;;  %v312_v38 = vpop.f32.mrf.mxu1 }
  0xf9   :  { %v641_v39 = vpack.c.bf16 %v199_v37, %v197_v35  ;;  %v642_v40 = vpack.c.bf16 %v312_v38, %v310_v36 }
  0xfa   :  { %v203_v41 = vpop.f32.mrf.mxu0  ;;  %v316_v42 = vpop.f32.mrf.mxu1 }
  0xfb   :  { %549 = vst [vmem:[%s882_s2 + $0xb0] sm:$0xff] %v641_v39  ;;  %550 = vst [vmem:[%s882_s2 + $0xb8] sm:$0xff] %v642_v40 }
  0xfc   :  { %v205_v43 = vpop.f32.mrf.mxu0  ;;  %v318_v44 = vpop.f32.mrf.mxu1 }
  0xfd   :  { %v643_v45 = vpack.c.bf16 %v205_v43, %v203_v41  ;;  %v644_v46 = vpack.c.bf16 %v318_v44, %v316_v42 }
  0xfe   :  { %v207_v47 = vpop.f32.mrf.mxu0  ;;  %v320_v48 = vpop.f32.mrf.mxu1 }
  0xff   :  { %551 = vst [vmem:[%s882_s2 + $0xc0] sm:$0xff] %v643_v45  ;;  %552 = vst [vmem:[%s882_s2 + $0xc8] sm:$0xff] %v644_v46 }
 0x100   :  { %v209_v49 = vpop.f32.mrf.mxu0  ;;  %v322_v50 = vpop.f32.mrf.mxu1 }
 0x101   :  { %v645_v51 = vpack.c.bf16 %v209_v49, %v207_v47  ;;  %v646_v52 = vpack.c.bf16 %v322_v50, %v320_v48 }
 0x102   :  { %v213_v53 = vpop.f32.mrf.mxu0  ;;  %v326_v54 = vpop.f32.mrf.mxu1 }
 0x103   :  { %553 = vst [vmem:[%s882_s2 + $0xd0] sm:$0xff] %v645_v51  ;;  %554 = vst [vmem:[%s882_s2 + $0xd8] sm:$0xff] %v646_v52 }
 0x104   :  { %v215_v55 = vpop.f32.mrf.mxu0  ;;  %v328_v56 = vpop.f32.mrf.mxu1 }
 0x105   :  { %v647_v57 = vpack.c.bf16 %v215_v55, %v213_v53  ;;  %v648_v58 = vpack.c.bf16 %v328_v56, %v326_v54 }
 0x106   :  { %v217_v59 = vpop.f32.mrf.mxu0  ;;  %v330_v60 = vpop.f32.mrf.mxu1 }
 0x107   :  { %555 = vst [vmem:[%s882_s2 + $0xe0] sm:$0xff] %v647_v57  ;;  %556 = vst [vmem:[%s882_s2 + $0xe8] sm:$0xff] %v648_v58 }
 0x108   :  { %v219_v61 = vpop.f32.mrf.mxu0  ;;  %v332_v62 = vpop.f32.mrf.mxu1 }
 0x109   :  { %v649_v63 = vpack.c.bf16 %v219_v61, %v217_v59  ;;  %v650_v0 = vpack.c.bf16 %v332_v62, %v330_v60 }
 0x10b   :  { %557 = vst [vmem:[%s882_s2 + $0xf0] sm:$0xff] %v649_v63  ;;  %558 = vst [vmem:[%s882_s2 + $0xf8] sm:$0xff] %v650_v0 }

// kernel: branchformer_forward.10
= control target key start
LH: loop header
LB: loop body
LE: loop exit
PB: predicated region body
PF: predicated region fallthrough
CT: control target
= control target key end

     0   :  { %s1367_s24 = smov 0   ;;  %s1369_s25 = smov 0   ;;  %s1555_s0 = inlined_call_operand.vmem [shape: bf16[2,8,1536], index: 0, kind: input, shape index: {}, may-alias: {0,1,2}]   ;;  %s1556_s1 = inlined_call_operand.vmem [shape: bf16[2,8,1536], index: 1, kind: input, shape index: {}, may-alias: {0,1,2}]   ;;  %s1557_s2 = inlined_call_operand.vmem [shape: bf16[2,8,1536], index: 2, kind: input, shape index: {}, may-alias: {0,1,2}]   ;;  %s1558_s3 = inlined_call_operand.vmem [shape: bf16[128,512], index: 3, kind: input, shape index: {}]   ;;  %s1559_s4 = inlined_call_operand.vmem [shape: f32[1,512], index: 4, kind: input, shape index: {}]   ;;  %s1560_s5 = inlined_call_operand.vmem [shape: f32[1,512], index: 5, kind: input, shape index: {}]   ;;  %s1561_s6 = inlined_call_operand.vmem [shape: f32[2,1,8], index: 6, kind: input, shape index: {}]   ;;  %s1562_s7 = inlined_call_operand.vmem [shape: bf16[2,8,512], index: 7, kind: output, shape index: {}]  }
   0x1   :  { %s1371_s26 = smov 0   ;;  %s1373_s27 = smov 0  }
   0x2   :  { %s1375_s28 = smov 0   ;;  %s1377_s29 = smov 0  }
   0x3   :  { %s1379_s30 = smov 0  }
   0x4 LB: > { %s32_s8 = sadd.s32 1, %s1307_s28  ;;  %s36_s9 = sadd.s32 1, %s1311_s29  ;;  %s1315_s30 = sphi %s1379_s30, %s17_s30   ;;  %s1311_s29 = sphi %s1377_s29, %s1568_s29   ;;  %s1307_s28 = sphi %s1375_s28, %s1567_s28   ;;  %s1303_s27 = sphi %s1373_s27, %s1566_s27   ;;  %s1299_s26 = sphi %s1371_s26, %s1565_s26   ;;  %s1295_s25 = sphi %s1369_s25, %s1564_s25   ;;  %s1291_s24 = sphi %s1367_s24, %s1563_s24  }
   0x5   : > { %p34_p0 = scmp.ge.s32.totalorder %s32_s8, 4  ;;  %s139_s10 = sadd.s32 1, %s1295_s25 }
   0x6   : > { %p146_p1 = scmp.ne.s32.totalorder %s1295_s25, %s1291_s24  ;;  %p147_p2 = scmp.eq.s32.totalorder %s1315_s30, 0 }
   0x7   : > { %s1570_s8 = smov (%p34_p0, %s32_s8), 0  ;;  %s1572_s9 = smov (!%p34_p0, %s36_s9), %s1311_s29 }
   0x8   : > { %s136_s11 = ssub.s32 %s1307_s28, %s1570_s8  ;;  %p148_p3 = por %p147_p2, %p146_p1 }
   0x9   : > { %p38_p4 = scmp.ge.s32.totalorder %s1572_s9, 2  ;;  %p137_p5 = scmp.eq.s32.totalorder %s136_s11, 0 }
   0xa   : > { %p1112_p6 = scmp.ge.s32.totalorder %s1315_s30, 8 }
   0xb   : > { %s1574_s9 = smov (%p38_p4, %s1572_s9), 0 }
   0xc   : > { %s1416_s12 = scalar_select %p137_p5, %s1295_s25, %s139_s10  }
   0xd   : > { %280 = sbr.rel (%p1112_p6) target bundleno = 33 (0x21), region = 16 }
  0x12   : > { %330 = sbr.rel (!%p148_p3) target bundleno = 33 (0x21), region = 32  ;;  %s332_s13 = sand.u32 (%p148_p3), 1, %s1295_s25  }
  0x13   : > { %s1114_s14 = sshll.u32 (%p148_p3), %s1307_s28, 2  ;;  %s1113_s15 = sshll.u32 (%p148_p3), %s332_s13, 6 }
  0x14   : > { %s1424_s18 = scalar_lea.vmem (%p148_p3), %s1558_s3, %s1114_s14  ;;  %s334_s19 = scalar_lea.vmem (%p148_p3), [#allocation2], %s1113_s15 }
  0x15   : > { %v353_v0 = vld [vmem:[%s1424_s18] sm:$0xf] (%p148_p3)  ;;  %v355_v1 = vld [vmem:[%s1424_s18 + $0x10] sm:$0xf] (%p148_p3) }
  0x16   : > { %354 = vst [vmem:[%s334_s19] sm:$0xf] (%p148_p3), %v353_v0  ;;  %356 = vst [vmem:[%s334_s19 + $0x4] sm:$0xf] (%p148_p3), %v355_v1  ;;  %v357_v2 = vld [vmem:[%s1424_s18 + $0x20] sm:$0xf] (%p148_p3) }
  0x17   : > { %v359_v3 = vld [vmem:[%s1424_s18 + $0x30] sm:$0xf]  ;;  %v361_v4 = vld [vmem:[%s1424_s18 + $0x40] sm:$0xf]  ;;  %358 = vst [vmem:[%s334_s19 + $0x8] sm:$0xf] %v357_v2 }
  0x18   : > { %360 = vst [vmem:[%s334_s19 + $0xc] sm:$0xf] %v359_v3  ;;  %362 = vst [vmem:[%s334_s19 + $0x10] sm:$0xf] %v361_v4  ;;  %v363_v5 = vld [vmem:[%s1424_s18 + $0x50] sm:$0xf] }
  0x19   : > { %v365_v6 = vld [vmem:[%s1424_s18 + $0x60] sm:$0xf]  ;;  %v367_v7 = vld [vmem:[%s1424_s18 + $0x70] sm:$0xf]  ;;  %364 = vst [vmem:[%s334_s19 + $0x14] sm:$0xf] %v363_v5 }
  0x1a   : > { %366 = vst [vmem:[%s334_s19 + $0x18] sm:$0xf] %v365_v6  ;;  %368 = vst [vmem:[%s334_s19 + $0x1c] sm:$0xf] %v367_v7  ;;  %v369_v8 = vld [vmem:[%s1424_s18 + $0x80] sm:$0xf] }
  0x1b   : > { %v371_v9 = vld [vmem:[%s1424_s18 + $0x90] sm:$0xf]  ;;  %v373_v10 = vld [vmem:[%s1424_s18 + $0xa0] sm:$0xf]  ;;  %370 = vst [vmem:[%s334_s19 + $0x20] sm:$0xf] %v369_v8 }
  0x1c   : > { %372 = vst [vmem:[%s334_s19 + $0x24] sm:$0xf] %v371_v9  ;;  %374 = vst [vmem:[%s334_s19 + $0x28] sm:$0xf] %v373_v10  ;;  %v375_v11 = vld [vmem:[%s1424_s18 + $0xb0] sm:$0xf] }
  0x1d   : > { %v377_v12 = vld [vmem:[%s1424_s18 + $0xc0] sm:$0xf]  ;;  %v379_v13 = vld [vmem:[%s1424_s18 + $0xd0] sm:$0xf]  ;;  %376 = vst [vmem:[%s334_s19 + $0x2c] sm:$0xf] %v375_v11 }
  0x1e   : > { %378 = vst [vmem:[%s334_s19 + $0x30] sm:$0xf] %v377_v12  ;;  %380 = vst [vmem:[%s334_s19 + $0x34] sm:$0xf] %v379_v13  ;;  %v381_v14 = vld [vmem:[%s1424_s18 + $0xe0] sm:$0xf] }
  0x1f   : > { %v383_v15 = vld [vmem:[%s1424_s18 + $0xf0] sm:$0xf]  ;;  %382 = vst [vmem:[%s334_s19 + $0x38] sm:$0xf] %v381_v14 }
  0x20   : > { %384 = vst [vmem:[%s334_s19 + $0x3c] sm:$0xf] %v383_v15 }
  0x21 PF: > { %p1115_p7 = scmp.ge.s32.totalorder %s1315_s30, 1  ;;  %p457_p8 = scmp.lt.s32.totalorder %s1315_s30, 9 }
  0x23   : > { %p458_p9 = pnand %p1115_p7, %p457_p8 }
  0x24   : > { %s464_s20 = sand.u32 (!%p458_p9), 1, %s1291_s24   ;;  %s1461_s23 = smul.u32 (!%p458_p9), 3, %s1299_s26 }
  0x25   : > { %461 = sbr.rel (%p458_p9) target bundleno = 1631 (0x65f), region = 85  ;;  %s1116_s21 = sshll.u32 (!%p458_p9), %s464_s20, 6 }
  0x26   : > { %s1451_s22 = scalar_lea.vmem (!%p458_p9), [#allocation2], %s1116_s21  ;;  %p545_p10 = scmp.lt.s32.totalorder (!%p458_p9), %s1303_s27, 1 }
  0x27   : > { %p549_p11 = scmp.lt.s32.totalorder (!%p458_p9), %s1461_s23, 11  ;;  %p582_p12 = scmp.lt.s32.totalorder (!%p458_p9), %s1299_s26, 3 }
  0x28   : > { %s1319_s20 = smov (!%p458_p9), 1   ;;  %s1320_s21 = smov (!%p458_p9), 2  }
  0x2a   : > { %v1317_v16 = vmov 0.0   ;;  %vm1318_vm0 = vmmov 0   ;;  %v1249_v17 = vld [vmem:[%s1451_s22 + $0x38] sm:$0xff]   ;;  %v1250_v18 = vld [vmem:[%s1451_s22 + $0x30] sm:$0xff]   ;;  %v1251_v19 = vld [vmem:[%s1451_s22 + $0x28] sm:$0xff]   ;;  %s1576_s27 = smov (!%p545_p10, %s1303_s27), 1  ;;  %v733_v35 = vlaneseq }
  0x2b   : > { %1150 = vmatprep.subr.bf16.mxu0 %v1317_v16  ;;  %1166 = vmatprep.mubr.msk.bf16.mxu0 %vm1318_vm0, %v1317_v16  ;;  %v1252_v20 = vld [vmem:[%s1451_s22 + $0x20] sm:$0xff]   ;;  %v1253_v21 = vld [vmem:[%s1451_s22 + $0x18] sm:$0xff]   ;;  %s550_s24 = scalar_select %p549_p11, %s1461_s23, 11  ;;  %v1254_v22 = vld [vmem:[%s1451_s22 + $0x10] sm:$0xff]   ;;  %vm846_vm12 = vcmask 64512   ;;  %vm871_vm15 = vcmask 1043456  }
  0x2c   : > { %1170 = vmatprep.subr.bf16.mxu1 %v1317_v16  ;;  %1172 = vmatprep.mubr.msk.bf16.mxu1 %vm1318_vm0, %v1317_v16  ;;  %s1472_s10 = smul.u32 12, %s1576_s27  ;;  %s1578_s26 = smov (!%p582_p12, %s1299_s26), 3  ;;  %v1255_v23 = vld [vmem:[%s1451_s22 + $0x8] sm:$0xff]   ;;  %v1256_v28 = vld [vmem:[%s1451_s22] sm:$0xff]   ;;  %v1492_v36 = vshrl.u32 %v733_v35, 7 }
  0x2d   : > { %1151 = vmatpush3.bf16.xpose.msra.mxu0 %v1249_v17  ;;  %s587_s19 = scalar_lea.vmem %s1560_s5, %s1578_s26  ;;  %s1321_s22 = smov 4  }
  0x2e   : > { %1152 = vmatprep.subr.bf16.mxu0 %v1317_v16  ;;  %s554_s11 = sadd.s32 %s1472_s10, %s550_s24  ;;  %v1123_v26 = vld [vmem:[%s587_s19] ss:$0 sm:$0xff]  ;;  %v1132_v37 = vadd.s32 4294967289, %v1492_v36  ;;  %s1322_s24 = smov 8  }
  0x2f   : > { %s1117_s13 = sshll.u32 %s554_s11, 2  ;;  %s559_s11 = sadd.s32 1, %s1461_s23 }
  0x30   : > { %s556_s16 = scalar_lea.vmem %s1555_s0, %s1117_s13  ;;  %v739_v38 = vsub.s32 0, %v1132_v37  ;;  %vm738_vm1 = vcmp.lt.s32.totalorder %v1132_v37, 0  ;;  %s584_s15 = scalar_lea.vmem %s1559_s4, %s1578_s26 }
  0x31   : > { %v605_v24 = vld [vmem:[%s556_s16] sm:$0xf]  ;;  %p562_p13 = scmp.lt.s32.totalorder %s559_s11, 11  ;;  %s590_s14 = scalar_lea.vmem %s1561_s6, %s1576_s27 }
  0x32   : > { %v606_v25 = vunpack.c.l.bf16 %v605_v24  ;;  %v1133_v39 = vmin.u32 %v1132_v37, %v739_v38  ;;  %v1122_v57 = vld [vmem:[%s584_s15] ss:$0 sm:$0xff]  ;;  %v1326_v24 = vmov 0   ;;  %s571_s15 = sadd.s32 2, %s1461_s23  ;;  %s1120_s23 = sshll.u32 %s1576_s27, 2 }
  0x33   : > { %s1580_s11 = smov (!%p562_p13, %s559_s11), 11  ;;  %p574_p0 = scmp.lt.s32.totalorder %s571_s15, 11 }
  0x34   : > { %v624_v27 = vadd.f32 %v1123_v26, %v606_v25  ;;  %v742_v40 = vand.u32 127, %v1133_v39  ;;  %v615_v59 = vadd.f32 %v1122_v57, %v606_v25  ;;  %s565_s16 = sadd.s32 %s1472_s10, %s1580_s11 }
  0x35   : > { %1153 = vmatpush3.bf16.xpose.msra.mxu0 %v1250_v18  ;;  %s1118_s17 = sshll.u32 %s565_s16, 2  ;;  %s1582_s15 = smov (!%p574_p0, %s571_s15), 11 }
  0x36   : > { %1154 = vmatprep.subr.bf16.mxu0 %v1317_v16  ;;  %v625_v29 = vmul.f32 0.17677669, %v624_v27  ;;  %v743_v41 = vsub.s32 0, %v742_v40  ;;  %v616_v61 = vmul.f32 0.17677669, %v615_v59  ;;  %s577_s16 = sadd.s32 %s1472_s10, %s1582_s15 }
  0x38   : > { %v626_v30 = vpack.c.bf16 %v625_v29, %v625_v29  ;;  %v744_v42 = vsel %vm738_vm1, %v743_v41, %v742_v40  ;;  %v617_v0 = vpack.c.bf16 %v616_v61, %v616_v61 }
  0x39   : > { %vm745_vm2 = vcmp.ne.s32.totalorder %v744_v42, 0  ;;  %vm746_vm3 = vcmp.lt.s32.totalorder %v744_v42, 0  ;;  %v748_v43 = vadd.s32 128, %v744_v42 }
  0x3a   : > { %vm747_vm4 = vmand %vm746_vm3, %vm745_vm2 }
  0x3b   : > { %v1495_v44 = vsel %vm747_vm4, %v748_v43, %v744_v42 }
  0x3c   : > { %v752_v45 = vand.u32 1, %v1495_v44  ;;  %v759_v48 = vshra.s32 %v1495_v44, 1  ;;  %v767_v52 = vshra.s32 %v1495_v44, 2  ;;  %v775_v56 = vshra.s32 %v1495_v44, 3 }
  0x3d   : > { %1155 = vmatpush3.bf16.xpose.msra.mxu0 %v1251_v19  ;;  %v783_v1 = vshra.s32 %v1495_v44, 4  ;;  %v791_v9 = vshra.s32 %v1495_v44, 5  ;;  %v799_v13 = vshra.s32 %v1495_v44, 6 }
  0x3e   : > { %1156 = vmatprep.subr.bf16.mxu0 %v1317_v16  ;;  %vm753_vm5 = vcmp.eq.s32.totalorder %v752_v45, 1  ;;  %v760_v49 = vand.u32 1, %v759_v48  ;;  %v768_v53 = vand.u32 1, %v767_v52  ;;  %v776_v58 = vand.u32 1, %v775_v56 }
  0x3f   : > { %v784_v2 = vand.u32 1, %v783_v1  ;;  %v792_v10 = vand.u32 1, %v791_v9  ;;  %v800_v14 = vand.u32 1, %v799_v13 }
  0x40   : > { %vm761_vm6 = vcmp.eq.s32.totalorder %v760_v49, 1  ;;  %vm769_vm7 = vcmp.eq.s32.totalorder %v768_v53, 1  ;;  %vm777_vm8 = vcmp.eq.s32.totalorder %v776_v58, 1 }
  0x41   : > { %vm785_vm9 = vcmp.eq.s32.totalorder %v784_v2, 1  ;;  %vm793_vm10 = vcmp.eq.s32.totalorder %v792_v10, 1  ;;  %vm801_vm11 = vcmp.eq.s32.totalorder %v800_v14, 1 }
  0x45   : > { %1157 = vmatpush3.bf16.xpose.msra.mxu0 %v1252_v20 }
  0x46   : > { %1158 = vmatprep.subr.bf16.mxu0 %v1317_v16 }
  0x4d   : > { %1159 = vmatpush3.bf16.xpose.msra.mxu0 %v1253_v21 }
  0x4e   : > { %1160 = vmatprep.subr.bf16.mxu0 %v1317_v16 }
  0x55   : > { %1161 = vmatpush3.bf16.xpose.msra.mxu0 %v1254_v22  ;;  %v845_v22 = vld [vmem:[%s590_s14] sm:$0x1] }
  0x56   : > { %1162 = vmatprep.subr.bf16.mxu0 %v1317_v16  ;;  %vm850_vm13 = vcmp.gt.f32.partialorder %v845_v22, 0.5 }
  0x57   : > { %v854_v25 = vsel %vm850_vm13, 1, %v1326_v24 }
  0x5d   : > { %1163 = vmatpush3.bf16.xpose.msra.mxu0 %v1255_v23  ;;  %v857_v23 = vsub.s32 0, %v1492_v36 }
  0x5e   : > { %1164 = vmatprep.subr.bf16.mxu0 %v1317_v16 }
  0x5f   : > { %v858_v26 = vrot.slane %v854_v25, %v857_v23 }
  0x61   : > { %vm859_vm14 = vcmp.eq.s32.totalorder %v858_v26, 1 }
  0x65   : > { %1165 = vmatpush3.bf16.xpose.msra.mxu0 %v1256_v28 }
  0x6c   : > { %1167 = vmatmul.mubr.bf16.vlgmr.msra.gmra.mxu0 %v626_v30 }
 0x12c   : > { %v727_v31 = vpop.f32.mrf.mxu0 }
 0x12d   : > { %750 = vrot.lane.b32.xlu0 %v727_v31, %s1319_s20  ;;  %s567_s20 = scalar_lea.vmem %s1556_s1, %s1118_s17  ;;  %s1119_s17 = sshll.u32 %s577_s16, 2 }
 0x12e   : > { %v1168_v32 = vpop.f32.mrf.mxu0  ;;  %v627_v60 = vld [vmem:[%s567_s20] sm:$0xf]  ;;  %s579_s20 = scalar_lea.vmem %s1557_s2, %s1119_s17 }
 0x12f   : > { %1171 = vmatpush3.bf16.xpose.msra.mxu1 %v627_v60  ;;  %v628_v30 = vld [vmem:[%s579_s20] sm:$0xf] }
 0x130   : > { %v730_v33 = vpop.f32.mrf.mxu0  ;;  %1176 = vmatprep.subr.bf16.mxu1 %v1317_v16 }
 0x132   : > { %v1169_v34 = vpop.f32.mrf.mxu0 }
 0x136   : > { %1173 = vmatmul.mubr.bf16.vlgmr.msra.gmra.mxu1 %v617_v0 }
 0x137   : > { %1178 = vmatprep.mubr.msk.bf16.mxu1 %vm1318_vm0, %v1317_v16 }
 0x19f   : > { %v751_v46 = vpop.permute.xlu0 %750 }
 0x1a0   : > { %v756_v47 = vsel %vm753_vm5, %v751_v46, %v727_v31  ;;  %v873_v31 = vsel %vm871_vm15, %v628_v30, 0 }
 0x1a1   : > { %757 = vrot.lane.b32.xlu0 %v756_v47, %s1320_s21  ;;  %s1323_s21 = smov 16   ;;  %1177 = vmatpush3.bf16.msra.mxu1 %v873_v31 }
 0x1f6   : > { %v839_v5 = vpop.f32.mrf.mxu1 }
 0x1f8   : > { %v1174_v6 = vpop.f32.mrf.mxu1 }
 0x1fa   : > { %v842_v7 = vpop.f32.mrf.mxu1 }
 0x1fc   : > { %v1175_v8 = vpop.f32.mrf.mxu1 }
 0x213   : > { %v758_v50 = vpop.permute.xlu0 %757 }
 0x214   : > { %v764_v51 = vsel %vm761_vm6, %v758_v50, %v756_v47 }
 0x215   : > { %765 = vrot.lane.b32.xlu1 %v764_v51, %s1321_s22  ;;  %s1324_s22 = smov 32  }
 0x287   : > { %v766_v54 = vpop.permute.xlu1 %765 }
 0x288   : > { %v772_v55 = vsel %vm769_vm7, %v766_v54, %v764_v51 }
 0x289   : > { %773 = vrot.lane.b32.xlu1 %v772_v55, %s1322_s24  ;;  %s1325_s24 = smov 64  }
 0x2fb   : > { %v774_v62 = vpop.permute.xlu1 %773 }
 0x2fc   : > { %v780_v63 = vsel %vm777_vm8, %v774_v62, %v772_v55 }
 0x2fd   : > { %781 = vrot.lane.b32.xlu0 %v780_v63, %s1323_s21  ;;  %s600_s21 = sadd.s32 %s1120_s23, %s1578_s26 }
 0x2fe   : > { %s1121_s10 = sshll.u32 %s600_s21, 2 }
 0x2ff   : > { %s602_s11 = scalar_lea.vmem %s1562_s7, %s1121_s10 }
 0x36f   : > { %v782_v3 = vpop.permute.xlu0 %781 }
 0x370   : > { %v788_v4 = vsel %vm785_vm9, %v782_v3, %v780_v63 }
 0x371   : > { %789 = vrot.lane.b32.xlu1 %v788_v4, %s1324_s22 }
 0x3e3   : > { %v790_v11 = vpop.permute.xlu1 %789 }
 0x3e4   : > { %v796_v12 = vsel %vm793_vm10, %v790_v11, %v788_v4 }
 0x3e5   : > { %797 = vrot.lane.b32.xlu0 %v796_v12, %s1325_s24 }
 0x457   : > { %v798_v15 = vpop.permute.xlu0 %797 }
 0x458   : > { %v804_v16 = vsel %vm801_vm11, %v798_v15, %v796_v12 }
 0x459   : > { %v840_v17 = vadd.f32 %v839_v5, %v804_v16 }
 0x45b   : > { %v847_v18 = vsel %vm846_vm12, %v840_v17, -inf }
 0x45c   : > { %848 = vmax.xlane.f32.xlu1 %v847_v18 }
 0x4e5   : > { %v849_v19 = vpop.xlane.xlu1 %848 }
 0x4e6   : > { %v851_v20 = vsub.f32 %v840_v17, %v849_v19 }
 0x4e8   : > { %v852_v21 = vmul.f32 1.442695, %v851_v20 }
 0x4ea   : > { %1257 = vpow2.f32 %v852_v21 }
 0x4f7   : > { %v1258_v27 = vpop.eup %1257 }
 0x4f8   : > { %v860_v28 = vsel %vm859_vm14, 0.0, %v1258_v27 }
 0x4f9   : > { %v861_v29 = vsel %vm846_vm12, %v860_v28, 0.0 }
 0x4fa   : > { %862 = vadd.xlane.f32.xlu0 %v861_v29 }
 0x583   : > { %v863_v32 = vpop.xlane.xlu0 %862 }
 0x584   : > { %v864_v33 = vmax.f32 %v863_v32, 1e-30 }
 0x586   : > { %1259 = vrcp.f32 %v864_v33 }
 0x593   : > { %v1260_v34 = vpop.eup %1259 }
 0x594   : > { %v866_v35 = vmul.f32 %v1260_v34, %v860_v28 }
 0x596   : > { %v867_v36 = vpack.c.bf16 %v866_v35, %v866_v35 }
 0x598   : > { %1179 = vmatmul.mubr.msk.bf16.vlgmr.msra.gmra.mxu1 %vm846_vm12, %v867_v36 }
 0x658   : > { %v909_v37 = vpop.f32.mrf.mxu1 }
 0x659   : > { %v915_v38 = vpack.c.bf16 %v909_v37, %v909_v37 }
 0x65a   : > { %v1180_v39 = vpop.f32.mrf.mxu1 }
 0x65b   : > { %916 = vst [vmem:[%s602_s11] sm:$0xf] %v915_v38 }
 0x65c   : > { %v912_v40 = vpop.f32.mrf.mxu1 }
 0x65e   : > { %v1181_v41 = vpop.f32.mrf.mxu1 }
 0x65f PF: > { %s17_s30 = sadd.s32 1, %s1315_s30   ;;  %s1563_s24 = smov %s1295_s25 }
 0x660   : > { %p14_p1 = scmp.ge.s32.totalorder %s17_s30, 10   ;;  %s1564_s25 = smov %s1416_s12 }
 0x661   : > { %s1565_s26 = smov %s1307_s28  ;;  %s1566_s27 = smov %s1311_s29 }
 0x662   : > { %s1567_s28 = smov %s1570_s8  ;;  %s1568_s29 = smov %s1574_s9 }
 0x663   :  { %16 = sbr.rel (!%p14_p1) target bundleno = 4 (0x4), region = 142 }

// kernel: branchformer_forward.11
= control target key start
LH: loop header
LB: loop body
LE: loop exit
PB: predicated region body
PF: predicated region fallthrough
CT: control target
= control target key end

     0   :  { %vm392_vm0 = vcmask 257024   ;;  %s659_s1 = inlined_call_operand.vmem [shape: bf16[512,32], index: 1, kind: input, shape index: {}]   ;;  %s660_s0 = inlined_call_operand.vmem [shape: bf16[16,512], index: 0, kind: input, shape index: {}]   ;;  %s661_s2 = inlined_call_operand.vmem [shape: f32[1,32], index: 2, kind: input, shape index: {}]   ;;  %s662_s3 = inlined_call_operand.vmem [shape: bf16[16,32], index: 3, kind: output, shape index: {}]  }
   0x1   :  { %v484_v0 = vld [vmem:[%s659_s1 + $0x78] sm:$0xff]   ;;  %v488_v4 = vld [vmem:[%s659_s1 + $0x70] sm:$0xff]   ;;  %v492_v8 = vld [vmem:[%s659_s1 + $0x68] sm:$0xff]  }
   0x2   :  { %v485_v1 = vld [vmem:[%s659_s1 + $0xf8] sm:$0xff]   ;;  %440 = vmatprep.subr.bf16.mxu0 %v484_v0  ;;  %v489_v5 = vld [vmem:[%s659_s1 + $0xf0] sm:$0xff]   ;;  %v493_v9 = vld [vmem:[%s659_s1 + $0xe8] sm:$0xff]  }
   0x3   :  { %v486_v2 = vld [vmem:[%s659_s1 + $0x38] sm:$0xff]   ;;  %462 = vmatprep.subr.bf16.mxu1 %v485_v1  ;;  %v490_v6 = vld [vmem:[%s659_s1 + $0x30] sm:$0xff]   ;;  %v494_v10 = vld [vmem:[%s659_s1 + $0x28] sm:$0xff]  }
   0x4   :  { %v487_v3 = vld [vmem:[%s659_s1 + $0xb8] sm:$0xff]   ;;  %441 = vmatpush3.bf16.msra.mxu0 %v486_v2  ;;  %v491_v7 = vld [vmem:[%s659_s1 + $0xb0] sm:$0xff]   ;;  %v495_v11 = vld [vmem:[%s659_s1 + $0xa8] sm:$0xff]  }
   0x5   :  { %463 = vmatpush3.bf16.msra.mxu1 %v487_v3  ;;  %442 = vmatprep.subr.bf16.mxu0 %v488_v4  ;;  %v496_v12 = vld [vmem:[%s659_s1 + $0x60] sm:$0xff]   ;;  %v500_v16 = vld [vmem:[%s659_s1 + $0x58] sm:$0xff]   ;;  %v504_v20 = vld [vmem:[%s659_s1 + $0x50] sm:$0xff]  }
   0x6   :  { %464 = vmatprep.subr.bf16.mxu1 %v489_v5  ;;  %v497_v13 = vld [vmem:[%s659_s1 + $0xe0] sm:$0xff]   ;;  %v501_v17 = vld [vmem:[%s659_s1 + $0xd8] sm:$0xff]   ;;  %v505_v21 = vld [vmem:[%s659_s1 + $0xd0] sm:$0xff]  }
   0x7   :  { %v498_v14 = vld [vmem:[%s659_s1 + $0x20] sm:$0xff]   ;;  %v502_v18 = vld [vmem:[%s659_s1 + $0x18] sm:$0xff]   ;;  %v506_v22 = vld [vmem:[%s659_s1 + $0x10] sm:$0xff]  }
   0x8   :  { %443 = vmatpush3.bf16.msra.mxu0 %v490_v6  ;;  %v499_v15 = vld [vmem:[%s659_s1 + $0xa0] sm:$0xff]   ;;  %v503_v19 = vld [vmem:[%s659_s1 + $0x98] sm:$0xff]   ;;  %v507_v23 = vld [vmem:[%s659_s1 + $0x90] sm:$0xff]  }
   0x9   :  { %465 = vmatpush3.bf16.msra.mxu1 %v491_v7  ;;  %444 = vmatprep.subr.bf16.mxu0 %v492_v8  ;;  %v508_v24 = vld [vmem:[%s659_s1 + $0x48] sm:$0xff]   ;;  %v512_v28 = vld [vmem:[%s659_s1 + $0x40] sm:$0xff]  }
   0xa   :  { %466 = vmatprep.subr.bf16.mxu1 %v493_v9  ;;  %v509_v25 = vld [vmem:[%s659_s1 + $0xc8] sm:$0xff]   ;;  %v513_v29 = vld [vmem:[%s659_s1 + $0xc0] sm:$0xff]  }
   0xb   :  { %v510_v26 = vld [vmem:[%s659_s1 + $0x8] sm:$0xff]   ;;  %v514_v30 = vld [vmem:[%s659_s1] sm:$0xff]  }
   0xc   :  { %445 = vmatpush3.bf16.msra.mxu0 %v494_v10  ;;  %v511_v27 = vld [vmem:[%s659_s1 + $0x88] sm:$0xff]   ;;  %v515_v31 = vld [vmem:[%s659_s1 + $0x80] sm:$0xff]  }
   0xd   :  { %467 = vmatpush3.bf16.msra.mxu1 %v495_v11  ;;  %446 = vmatprep.subr.bf16.mxu0 %v496_v12  ;;  %v516_v32 = vld [vmem:[%s660_s0] ss:$16 sps:$4 sm:$0xff]   ;;  %v518_v33 = vld [vmem:[%s660_s0 + $0x4] ss:$16 sps:$4 sm:$0xff]   ;;  %v519_v34 = vld [vmem:[%s660_s0 + $0x8] ss:$16 sps:$4 sm:$0xff]  }
   0xe   :  { %468 = vmatprep.subr.bf16.mxu1 %v497_v13  ;;  %v521_v35 = vld [vmem:[%s660_s0 + $0xc] ss:$16 sps:$4 sm:$0xff]   ;;  %334 = vmatprep.mubr.bf16.mxu0 %v518_v33  ;;  %v399_v38 = vld [vmem:[%s661_s2] ss:$0 sm:$0xff] }
   0xf   :  { %375 = vmatprep.mubr.bf16.mxu1 %v521_v35 }
  0x10   :  { %447 = vmatpush3.bf16.msra.mxu0 %v498_v14 }
  0x11   :  { %469 = vmatpush3.bf16.msra.mxu1 %v499_v15  ;;  %448 = vmatprep.subr.bf16.mxu0 %v500_v16 }
  0x12   :  { %470 = vmatprep.subr.bf16.mxu1 %v501_v17 }
  0x14   :  { %449 = vmatpush3.bf16.msra.mxu0 %v502_v18 }
  0x15   :  { %471 = vmatpush3.bf16.msra.mxu1 %v503_v19  ;;  %450 = vmatprep.subr.bf16.mxu0 %v504_v20 }
  0x16   :  { %472 = vmatprep.subr.bf16.mxu1 %v505_v21 }
  0x18   :  { %451 = vmatpush3.bf16.msra.mxu0 %v506_v22 }
  0x19   :  { %473 = vmatpush3.bf16.msra.mxu1 %v507_v23  ;;  %452 = vmatprep.subr.bf16.mxu0 %v508_v24 }
  0x1a   :  { %474 = vmatprep.subr.bf16.mxu1 %v509_v25 }
  0x1c   :  { %453 = vmatpush3.bf16.msra.mxu0 %v510_v26 }
  0x1d   :  { %475 = vmatpush3.bf16.msra.mxu1 %v511_v27  ;;  %454 = vmatprep.subr.bf16.mxu0 %v512_v28 }
  0x1e   :  { %476 = vmatprep.subr.bf16.mxu1 %v513_v29 }
  0x20   :  { %455 = vmatpush3.bf16.msra.mxu0 %v514_v30 }
  0x21   :  { %477 = vmatpush3.bf16.msra.mxu1 %v515_v31 }
  0x23   :  { %335 = vmatmul.mubr.bf16.vlgmr.msra.gmra.mxu0 %v516_v32 }
  0x24   :  { %376 = vmatmul.mubr.bf16.vlgmr.msra.gmra.mxu1 %v519_v34 }
  0xe3   :  { %v456_v36 = vpop.f32.mrf.mxu0 }
  0xe4   :  { %v478_v37 = vpop.f32.mrf.mxu1 }
  0xe5   :  { %v457_v39 = vpop.f32.mrf.mxu0 }
  0xe6   :  { %v458_v40 = vadd.f32 %v457_v39, %v456_v36  ;;  %v479_v41 = vpop.f32.mrf.mxu1 }
  0xe7   :  { %v459_v42 = vpop.f32.mrf.mxu0  ;;  %v480_v44 = vadd.f32 %v479_v41, %v478_v37 }
  0xe8   :  { %v337_v43 = vadd.f32 %v458_v40, %v399_v38  ;;  %v481_v45 = vpop.f32.mrf.mxu1 }
  0xe9   :  { %v460_v46 = vpop.f32.mrf.mxu0 }
  0xea   :  { %v378_v47 = vadd.f32 %v480_v44, %v337_v43  ;;  %v461_v48 = vadd.f32 %v460_v46, %v459_v42  ;;  %v482_v49 = vpop.f32.mrf.mxu1 }
  0xeb   :  { %v483_v52 = vadd.f32 %v482_v49, %v481_v45 }
  0xec   :  { %v438_v50 = vpack.c.bf16 %v378_v47, %v378_v47  ;;  %v340_v51 = vadd.f32 %v461_v48, %v399_v38 }
  0xee   :  { %393 = vst.msk [vmem:[%s662_s3] sm:$0xf] %vm392_vm0, %v438_v50  ;;  %v381_v53 = vadd.f32 %v483_v52, %v340_v51 }
  0xf0   :  { %v439_v54 = vpack.c.bf16 %v381_v53, %v381_v53 }
  0xf2   :  { %394 = vst.msk [vmem:[%s662_s3 + $0x4] sm:$0xf] %vm392_vm0, %v439_v54 }

// kernel: branchformer_forward.13
= control target key start
LH: loop header
LB: loop body
LE: loop exit
PB: predicated region body
PF: predicated region fallthrough
CT: control target
= control target key end

     0   :  { %s1438_s27 = smov 0   ;;  %s1440_s28 = smov 0   ;;  %s1723_s0 = inlined_call_operand.vmem [shape: bf16[2,8,3072], index: 0, kind: input, shape index: {}, may-alias: {0,1}]   ;;  %s1724_s1 = inlined_call_operand.vmem [shape: bf16[2,8,3072], index: 1, kind: input, shape index: {}, may-alias: {0,1}]   ;;  %s1725_s2 = inlined_call_operand.vmem [shape: f32[2,8,1], index: 2, kind: input, shape index: {}]   ;;  %s1726_s3 = inlined_call_operand.vmem [shape: f32[2,8,1], index: 3, kind: input, shape index: {}]   ;;  %s1727_s4 = inlined_call_operand.vmem [shape: f32[1,1536], index: 4, kind: input, shape index: {}]   ;;  %s1728_s5 = inlined_call_operand.vmem [shape: f32[1,1536], index: 5, kind: input, shape index: {}]   ;;  %s1729_s6 = inlined_call_operand.vmem [shape: f32[7,1536], index: 6, kind: input, shape index: {}]   ;;  %s1730_s7 = inlined_call_operand.vmem [shape: f32[1,1536], index: 7, kind: input, shape index: {}]   ;;  %s1731_s8 = inlined_call_operand.vmem [shape: bf16[2,8,1536], index: 8, kind: output, shape index: {}]  }
   0x1   :  { %s1442_s29 = smov 0   ;;  %s1444_s30 = smov 0  }
   0x2   :  { %s1446_s9 = smov 0  }
   0x3 LB: > { %s27_s10 = sadd.s32 1, %s1381_s29  ;;  %s30_s11 = sadd.s32 1, %s1385_s30  ;;  %s1389_s9 = sphi %s1446_s9, %s18_s9   ;;  %s1385_s30 = sphi %s1444_s30, %s1735_s30   ;;  %s1381_s29 = sphi %s1442_s29, %s1734_s29   ;;  %s1377_s28 = sphi %s1440_s28, %s1733_s28   ;;  %s1373_s27 = sphi %s1438_s27, %s1732_s27  }
   0x4   : > { %p28_p0 = scmp.ge.s32.totalorder %s27_s10, 3  ;;  %p1278_p1 = scmp.ge.s32.totalorder %s1389_s9, 1 }
   0x5   : > { %p363_p2 = scmp.lt.s32.totalorder %s1389_s9, 7 }
   0x6   : > { %s1737_s10 = smov (%p28_p0, %s27_s10), 0  ;;  %s1739_s11 = smov (!%p28_p0, %s30_s11), %s1385_s30 }
   0x7   : > { %p364_p3 = pnand %p1278_p1, %p363_p2  ;;  %p32_p4 = scmp.ge.s32.totalorder %s1739_s11, 2 }
   0x8   : > { %p441_p5 = scmp.lt.s32.totalorder (!%p364_p3), %s1377_s28, 1  ;;  %s1480_s19 = sshll.u32 (!%p364_p3), %s1373_s27, 2 }
   0x9   : > { %s1741_s11 = smov (%p32_p4, %s1739_s11), 0  ;;  %367 = sbr.rel (%p364_p3) target bundleno = 210 (0xd2), region = 52 }
   0xa   : > { %s1303_s20 = sadd.s32 (!%p364_p3), 12, %s1480_s19  ;;  %p471_p7 = scmp.lt.s32.totalorder (!%p364_p3), %s1480_s19, 11 }
   0xb   : > { %p454_p6 = scmp.lt.s32.totalorder (!%p364_p3), %s1303_s20, 23  ;;  %p443_p8 = scmp.lt.s32.totalorder (!%p364_p3), %s1480_s19, 23 }
   0xe   : > { %v1391_v0 = vmov 0   ;;  %s1743_s28 = smov (!%p441_p5, %s1377_s28), 1  ;;  %v1392_v3 = vmov 0.0   ;;  %s1745_s20 = smov (!%p454_p6, %s1303_s20), 23  ;;  %v529_v4 = vlaneseq  ;;  %vm688_vm0 = vcmask 1046528  }
   0xf   : > { %1350 = vset.pattern.permute.xlu0 %v1391_v0  ;;  %s1283_s12 = sshll.u32 %s1743_s28, 3  ;;  %579 = vst [vmem:[#allocation2 + $0x30] sm:$0x7] %v1392_v3  ;;  %580 = vst [vmem:[#allocation2] sm:$0x7] %v1392_v3  ;;  %s1306_s21 = smul.u32 24, %s1743_s28 }
  0x10   : > { %s465_s15 = scalar_lea.vmem %s1725_s2, %s1283_s12  ;;  %s469_s18 = scalar_lea.vmem %s1726_s3, %s1283_s12  ;;  %581 = vst [vmem:[#allocation2 + $0x18] sm:$0x7] %v1392_v3  ;;  %582 = vst [vmem:[#allocation2 + $0x10] sm:$0x7] %v1392_v3  ;;  %v530_v5 = vshrl.u32 %v529_v4, 7  ;;  %vm756_vm1 = vcmask 1045504  }
  0x11   : > { %v507_v1 = vld [vmem:[%s465_s15] sm:$0xff]  ;;  %583 = vst [vmem:[#allocation2 + $0x8] sm:$0x38] %v1392_v3  ;;  %584 = vst [vmem:[#allocation2 + $0x20] sm:$0x38] %v1392_v3  ;;  %s457_s22 = sadd.s32 %s1306_s21, %s1745_s20  ;;  %vm824_vm2 = vcmask 1044480  }
  0x12   : > { %510 = vperm.xlu0 %1350, %v507_v1   ;;  %v517_v2 = vld [vmem:[%s469_s18] sm:$0xff]  ;;  %585 = vst [vmem:[#allocation2 + $0x28] sm:$0x38] %v1392_v3  ;;  %586 = vst [vmem:[#allocation2 + $0x38] sm:$0x38] %v1392_v3  ;;  %s1282_s23 = sshll.u32 %s457_s22, 2 }
  0x13   : > { %s1488_s24 = scalar_select %p471_p7, %s1480_s19, 11  ;;  %v1501_v8 = vsub.s32 0, %v530_v5  ;;  %v1503_v9 = vsub.s32 1, %v530_v5  ;;  %v1505_v10 = vsub.s32 2, %v530_v5  ;;  %v1507_v11 = vsub.s32 3, %v530_v5 }
  0x14   : > { %s459_s27 = scalar_lea.vmem %s1724_s1, %s1282_s23  ;;  %vm892_vm3 = vcmask 1043456   ;;  %vm960_vm4 = vcmask 1042432   ;;  %s1747_s19 = smov (!%p443_p8, %s1480_s19), 23  ;;  %vm1028_vm5 = vcmask 1041408  }
  0x15   : > { %s473_s14 = scalar_lea.vmem %s1727_s4, %s1488_s24  ;;  %v501_v6 = vld [vmem:[%s459_s27] sm:$0xff]  ;;  %v502_v7 = vld [vmem:[%s459_s27 + $0x8] sm:$0xff]  ;;  %s478_s17 = scalar_lea.vmem %s1728_s5, %s1488_s24 }
  0x16   : > { %520 = vperm.xlu0 %1350, %v517_v2   ;;  %v503_v12 = vunpack.c.l.bf16 %v501_v6  ;;  %v504_v13 = vunpack.c.h.bf16 %v501_v6  ;;  %v505_v14 = vunpack.c.l.bf16 %v502_v7  ;;  %v506_v15 = vunpack.c.h.bf16 %v502_v7  ;;  %v527_v16 = vld [vmem:[%s473_s14] sm:$0xf]  ;;  %s1288_s18 = sshll.u32 %s1488_s24, 3  ;;  %s489_s27 = scalar_lea.vmem %s1730_s7, %s1488_s24 }
  0x17   : > { %v553_v18 = vld [vmem:[%s478_s17] sm:$0xf]  ;;  %v532_v19 = vrot.slane %v527_v16, %v1501_v8  ;;  %v536_v20 = vrot.slane %v527_v16, %v1503_v9  ;;  %v540_v21 = vrot.slane %v527_v16, %v1505_v10  ;;  %v544_v22 = vrot.slane %v527_v16, %v1507_v11  ;;  %s1521_s23 = scalar_lea.vmem %s1729_s6, %s1288_s18  ;;  %s1659_s12 = sadd.s32 %s1306_s21, %s1747_s19 }
  0x18   : > { %v558_v28 = vrot.slane %v553_v18, %v1501_v8  ;;  %v562_v29 = vrot.slane %v553_v18, %v1503_v9  ;;  %v566_v30 = vrot.slane %v553_v18, %v1505_v10  ;;  %v570_v31 = vrot.slane %v553_v18, %v1507_v11  ;;  %v1524_v44 = vld [vmem:[%s1521_s23] ss:$8 sm:$0xf]  ;;  %v1292_v49 = vld [vmem:[%s1521_s23 + $0x1] ss:$8 sm:$0xf] }
  0x19   : > { %v1293_v50 = vld [vmem:[%s1521_s23 + $0x2] ss:$8 sm:$0xf]  ;;  %v616_v51 = vrot.slane %v1524_v44, %v1501_v8  ;;  %v620_v52 = vrot.slane %v1524_v44, %v1503_v9  ;;  %v624_v53 = vrot.slane %v1524_v44, %v1505_v10  ;;  %v628_v54 = vrot.slane %v1524_v44, %v1507_v11  ;;  %v1294_v55 = vld [vmem:[%s1521_s23 + $0x3] ss:$8 sm:$0xf] }
  0x1a   : > { %v655_v56 = vrot.slane %v1292_v49, %v1501_v8  ;;  %v659_v57 = vrot.slane %v1292_v49, %v1503_v9  ;;  %v663_v58 = vrot.slane %v1292_v49, %v1505_v10  ;;  %v667_v59 = vrot.slane %v1292_v49, %v1507_v11  ;;  %v1295_v60 = vld [vmem:[%s1521_s23 + $0x4] ss:$8 sm:$0xf]  ;;  %v1296_v1 = vld [vmem:[%s1521_s23 + $0x5] ss:$8 sm:$0xf] }
  0x1b   : > { %v1547_v61 = vrot.slane %v1293_v50, %v1501_v8  ;;  %v1550_v62 = vrot.slane %v1293_v50, %v1503_v9  ;;  %v1553_v63 = vrot.slane %v1293_v50, %v1505_v10  ;;  %v1556_v0 = vrot.slane %v1293_v50, %v1507_v11  ;;  %v1297_v6 = vld [vmem:[%s1521_s23 + $0x6] ss:$8 sm:$0xf]  ;;  %s1280_s19 = sshll.u32 %s1659_s12, 2  ;;  %s1307_s15 = smul.u32 12, %s1743_s28 }
  0x1c   : > { %v1560_v2 = vrot.slane %v1294_v55, %v1501_v8  ;;  %v1563_v3 = vrot.slane %v1294_v55, %v1503_v9  ;;  %v1566_v4 = vrot.slane %v1294_v55, %v1505_v10  ;;  %v1569_v5 = vrot.slane %v1294_v55, %v1507_v11  ;;  %s448_s14 = scalar_lea.vmem %s1723_s0, %s1280_s19 }
  0x1d   : > { %v1573_v7 = vrot.slane %v1295_v60, %v1501_v8  ;;  %v1587_v16 = vrot.slane %v1296_v1, %v1501_v8  ;;  %v1593_v18 = vrot.slane %v1296_v1, %v1505_v10  ;;  %s497_s28 = sadd.s32 %s1307_s15, %s1488_s24 }
  0x1e   : > { %s1291_s16 = sshll.u32 %s497_s28, 2 }
  0x1f   : > { %s499_s18 = scalar_lea.vmem %s1731_s8, %s1291_s16 }
  0x8d   : > { %v511_v17 = vpop.permute.xlu0 %510 }
  0x8e   : > { %v513_v23 = vsub.f32 %v503_v12, %v511_v17  ;;  %v514_v24 = vsub.f32 %v504_v13, %v511_v17  ;;  %v515_v25 = vsub.f32 %v505_v14, %v511_v17  ;;  %v516_v26 = vsub.f32 %v506_v15, %v511_v17  ;;  %v1584_v15 = vld [vmem:[%s489_s27] sm:$0xf] }
  0x8f   : > { %v1576_v12 = vrot.slane %v1295_v60, %v1503_v9  ;;  %v1579_v13 = vrot.slane %v1295_v60, %v1505_v10  ;;  %v1582_v14 = vrot.slane %v1295_v60, %v1507_v11  ;;  %v1590_v17 = vrot.slane %v1296_v1, %v1503_v9 }
  0x91   : > { %v521_v27 = vpop.permute.xlu0 %520 }
  0x92   : > { %v523_v32 = vmul.f32 %v521_v27, %v513_v23  ;;  %v524_v33 = vmul.f32 %v521_v27, %v514_v24  ;;  %v525_v34 = vmul.f32 %v521_v27, %v515_v25  ;;  %v526_v35 = vmul.f32 %v521_v27, %v516_v26 }
  0x93   : > { %v1599_v23 = vrot.slane %v1297_v6, %v1501_v8  ;;  %v1602_v24 = vrot.slane %v1297_v6, %v1503_v9  ;;  %v1605_v25 = vrot.slane %v1297_v6, %v1505_v10  ;;  %v1608_v26 = vrot.slane %v1297_v6, %v1507_v11 }
  0x94   : > { %v549_v36 = vmul.f32 %v532_v19, %v523_v32  ;;  %v550_v37 = vmul.f32 %v536_v20, %v524_v33  ;;  %v551_v38 = vmul.f32 %v540_v21, %v525_v34  ;;  %v552_v39 = vmul.f32 %v544_v22, %v526_v35 }
  0x95   : > { %v1596_v19 = vrot.slane %v1296_v1, %v1507_v11  ;;  %v1058_v32 = vrot.slane %v1584_v15, %v1503_v9  ;;  %v1062_v33 = vrot.slane %v1584_v15, %v1505_v10 }
  0x96   : > { %v575_v40 = vadd.f32 %v558_v28, %v549_v36  ;;  %v576_v41 = vadd.f32 %v562_v29, %v550_v37  ;;  %v577_v42 = vadd.f32 %v566_v30, %v551_v38  ;;  %v578_v43 = vadd.f32 %v570_v31, %v552_v39 }
  0x97   : > { %v1054_v31 = vrot.slane %v1584_v15, %v1501_v8 }
  0x98   : > { %v591_v45 = vrot.slane %v575_v40, 5  ;;  %v592_v46 = vrot.slane %v576_v41, 5  ;;  %v593_v47 = vrot.slane %v577_v42, 5  ;;  %v594_v48 = vrot.slane %v578_v43, 5 }
  0x9a   : > { %599 = vst [vmem:[#allocation2 + $0x30] sm:$0xf8] %v591_v45  ;;  %600 = vst [vmem:[#allocation2] sm:$0xf8] %v592_v46 }
  0x9b   : > { %601 = vst [vmem:[#allocation2 + $0x18] sm:$0xf8] %v593_v47  ;;  %602 = vst [vmem:[#allocation2 + $0x10] sm:$0xf8] %v594_v48 }
  0x9c   : > { %603 = vst [vmem:[#allocation2 + $0x8] sm:$0x7] %v591_v45  ;;  %604 = vst [vmem:[#allocation2 + $0x20] sm:$0x7] %v592_v46 }
  0x9d   : > { %605 = vst [vmem:[#allocation2 + $0x28] sm:$0x7] %v593_v47  ;;  %606 = vst [vmem:[#allocation2 + $0x38] sm:$0x7] %v594_v48 }
  0xa1   : > { %v607_v20 = vld [vmem:[#allocation2 + $0x30] sm:$0xff]  ;;  %v608_v21 = vld [vmem:[#allocation2] sm:$0xff] }
  0xa2   : > { %v609_v22 = vld [vmem:[#allocation2 + $0x18] sm:$0xff]  ;;  %v610_v27 = vld [vmem:[#allocation2 + $0x10] sm:$0xff]  ;;  %v633_v28 = vmul.f32 %v616_v51, %v607_v20  ;;  %v642_v30 = vld [vmem:[#allocation2] sm:$0xfe]  ;;  %v634_v34 = vmul.f32 %v620_v52, %v608_v21 }
  0xa3   : > { %v641_v29 = vld [vmem:[#allocation2 + $0x30] sm:$0xfe]  ;;  %v635_v35 = vmul.f32 %v624_v53, %v609_v22  ;;  %v643_v36 = vld [vmem:[#allocation2 + $0x18] sm:$0xfe]  ;;  %v645_v38 = vld [vmem:[#allocation2 + $0x8] sm:$0x1]  ;;  %v673_v40 = vmul.f32 %v659_v57, %v642_v30  ;;  %v636_v41 = vmul.f32 %v628_v54, %v610_v27 }
  0xa4   : > { %v644_v37 = vld [vmem:[#allocation2 + $0x10] sm:$0xfe]  ;;  %v672_v39 = vmul.f32 %v655_v56, %v641_v29  ;;  %v646_v42 = vld [vmem:[#allocation2 + $0x20] sm:$0x1]  ;;  %v647_v43 = vld [vmem:[#allocation2 + $0x28] sm:$0x1]  ;;  %v674_v45 = vmul.f32 %v663_v58, %v643_v36  ;;  %v676_v47 = vmul.f32 %v655_v56, %v645_v38 }
  0xa5   : > { %v648_v44 = vld [vmem:[#allocation2 + $0x38] sm:$0x1]  ;;  %v675_v46 = vmul.f32 %v667_v59, %v644_v37  ;;  %v677_v48 = vmul.f32 %v659_v57, %v646_v42  ;;  %v678_v49 = vmul.f32 %v663_v58, %v647_v43  ;;  %v709_v55 = vld [vmem:[#allocation2 + $0x30] sm:$0xfc]  ;;  %v710_v52 = vld [vmem:[#allocation2] sm:$0xfc] }
  0xa6   : > { %v679_v50 = vmul.f32 %v667_v59, %v648_v44  ;;  %v689_v51 = vrot.slane %v672_v39, 1  ;;  %v690_v53 = vrot.slane %v676_v47, 1  ;;  %v692_v60 = vrot.slane %v673_v40, 1  ;;  %v711_v20 = vld [vmem:[#allocation2 + $0x18] sm:$0xfc] }
  0xa7   : > { %v695_v1 = vrot.slane %v674_v45, 1  ;;  %v698_v6 = vrot.slane %v675_v46, 1  ;;  %v693_v21 = vrot.slane %v677_v48, 1  ;;  %v696_v22 = vrot.slane %v678_v49, 1  ;;  %v712_v27 = vld [vmem:[#allocation2 + $0x10] sm:$0xfc] }
  0xa8   : > { %v699_v54 = vrot.slane %v679_v50, 1  ;;  %v740_v29 = vmul.f32 %v1547_v61, %v709_v55  ;;  %v691_v30 = vsel %vm688_vm0, %v689_v51, %v690_v53  ;;  %v713_v56 = vld [vmem:[#allocation2 + $0x8] sm:$0x3]  ;;  %v714_v57 = vld [vmem:[#allocation2 + $0x20] sm:$0x3]  ;;  %v741_v59 = vmul.f32 %v1550_v62, %v710_v52 }
  0xa9   : > { %v715_v58 = vld [vmem:[#allocation2 + $0x28] sm:$0x3]  ;;  %v742_v36 = vmul.f32 %v1553_v63, %v711_v20  ;;  %v743_v37 = vmul.f32 %v1556_v0, %v712_v27  ;;  %v694_v38 = vsel %vm688_vm0, %v692_v60, %v693_v21  ;;  %v697_v39 = vsel %vm688_vm0, %v695_v1, %v696_v22  ;;  %v716_v43 = vld [vmem:[#allocation2 + $0x38] sm:$0x3]  ;;  %v777_v48 = vld [vmem:[#allocation2 + $0x30] sm:$0xf8] }
  0xaa   : > { %v700_v40 = vsel %vm688_vm0, %v698_v6, %v699_v54  ;;  %v705_v42 = vadd.f32 %v691_v30, %v633_v28  ;;  %v706_v44 = vadd.f32 %v694_v38, %v634_v34  ;;  %v707_v45 = vadd.f32 %v697_v39, %v635_v35  ;;  %v778_v49 = vld [vmem:[#allocation2] sm:$0xf8]  ;;  %v779_v53 = vld [vmem:[#allocation2 + $0x18] sm:$0xf8]  ;;  %v780_v60 = vld [vmem:[#allocation2 + $0x10] sm:$0xf8] }
  0xab   : > { %v708_v46 = vadd.f32 %v700_v40, %v636_v41  ;;  %v744_v47 = vmul.f32 %v1547_v61, %v713_v56  ;;  %v745_v50 = vmul.f32 %v1550_v62, %v714_v57  ;;  %v746_v51 = vmul.f32 %v1553_v63, %v715_v58  ;;  %v781_v21 = vld [vmem:[#allocation2 + $0x8] sm:$0x7]  ;;  %v782_v62 = vld [vmem:[#allocation2 + $0x20] sm:$0x7]  ;;  %v784_v63 = vld [vmem:[#allocation2 + $0x38] sm:$0x7] }
  0xac   : > { %v747_v55 = vmul.f32 %v1556_v0, %v716_v43  ;;  %v757_v52 = vrot.slane %v740_v29, 2  ;;  %v760_v28 = vrot.slane %v741_v59, 2  ;;  %v763_v6 = vrot.slane %v742_v36, 2  ;;  %v783_v54 = vld [vmem:[#allocation2 + $0x28] sm:$0x7] }
  0xad   : > { %v758_v1 = vrot.slane %v744_v47, 2  ;;  %v766_v20 = vrot.slane %v743_v37, 2  ;;  %v761_v34 = vrot.slane %v745_v50, 2  ;;  %v764_v35 = vrot.slane %v746_v51, 2  ;;  %v845_v39 = vld [vmem:[#allocation2 + $0x30] sm:$0xf0] }
  0xae   : > { %v767_v41 = vrot.slane %v747_v55, 2  ;;  %v808_v61 = vmul.f32 %v1560_v2, %v777_v48  ;;  %v809_v0 = vmul.f32 %v1563_v3, %v778_v49  ;;  %v810_v27 = vmul.f32 %v1566_v4, %v779_v53  ;;  %v846_v40 = vld [vmem:[#allocation2] sm:$0xf0]  ;;  %v847_v50 = vld [vmem:[#allocation2 + $0x18] sm:$0xf0] }
  0xaf   : > { %v759_v22 = vsel %vm756_vm1, %v757_v52, %v758_v1  ;;  %v811_v29 = vmul.f32 %v1569_v5, %v780_v60  ;;  %v762_v30 = vsel %vm756_vm1, %v760_v28, %v761_v34  ;;  %v765_v56 = vsel %vm756_vm1, %v763_v6, %v764_v35  ;;  %v848_v51 = vld [vmem:[#allocation2 + $0x10] sm:$0xf0]  ;;  %v849_v53 = vld [vmem:[#allocation2 + $0x8] sm:$0xf]  ;;  %v850_v60 = vld [vmem:[#allocation2 + $0x20] sm:$0xf] }
  0xb0   : > { %v768_v57 = vsel %vm756_vm1, %v766_v20, %v767_v41  ;;  %v773_v58 = vadd.f32 %v759_v22, %v705_v42  ;;  %v774_v59 = vadd.f32 %v762_v30, %v706_v44  ;;  %v775_v36 = vadd.f32 %v765_v56, %v707_v45  ;;  %v852_v1 = vld [vmem:[#allocation2 + $0x38] sm:$0xf] }
  0xb1   : > { %v776_v37 = vadd.f32 %v768_v57, %v708_v46  ;;  %v812_v38 = vmul.f32 %v1560_v2, %v781_v21  ;;  %v813_v43 = vmul.f32 %v1563_v3, %v782_v62  ;;  %v814_v47 = vmul.f32 %v1566_v4, %v783_v54  ;;  %v915_v57 = vld [vmem:[#allocation2 + $0x18] sm:$0xe0] }
  0xb2   : > { %v815_v48 = vmul.f32 %v1569_v5, %v784_v63  ;;  %v825_v49 = vrot.slane %v808_v61, 3  ;;  %v828_v42 = vrot.slane %v809_v0, 3  ;;  %v831_v52 = vrot.slane %v810_v27, 3  ;;  %v851_v5 = vld [vmem:[#allocation2 + $0x28] sm:$0xf] }
  0xb3   : > { %v826_v55 = vrot.slane %v812_v38, 3  ;;  %v834_v44 = vrot.slane %v811_v29, 3  ;;  %v829_v45 = vrot.slane %v813_v43, 3  ;;  %v832_v46 = vrot.slane %v814_v47, 3  ;;  %v913_v63 = vld [vmem:[#allocation2 + $0x30] sm:$0xe0] }
  0xb4   : > { %v835_v2 = vrot.slane %v815_v48, 3  ;;  %v876_v3 = vmul.f32 %v1573_v7, %v845_v39  ;;  %v877_v28 = vmul.f32 %v1576_v12, %v846_v40  ;;  %v878_v6 = vmul.f32 %v1579_v13, %v847_v50  ;;  %v914_v0 = vld [vmem:[#allocation2] sm:$0xe0]  ;;  %v920_v48 = vld [vmem:[#allocation2 + $0x38] sm:$0x1f] }
  0xb5   : > { %v827_v4 = vsel %vm824_vm2, %v825_v49, %v826_v55  ;;  %v879_v20 = vmul.f32 %v1582_v14, %v848_v51  ;;  %v830_v34 = vsel %vm824_vm2, %v828_v42, %v829_v45  ;;  %v833_v35 = vsel %vm824_vm2, %v831_v52, %v832_v46 }
  0xb6   : > { %v836_v41 = vsel %vm824_vm2, %v834_v44, %v835_v2  ;;  %v841_v21 = vadd.f32 %v827_v4, %v773_v58  ;;  %v842_v61 = vadd.f32 %v830_v34, %v774_v59  ;;  %v843_v22 = vadd.f32 %v833_v35, %v775_v36  ;;  %v916_v58 = vld [vmem:[#allocation2 + $0x10] sm:$0xe0]  ;;  %v982_v4 = vld [vmem:[#allocation2] sm:$0xc0] }
  0xb7   : > { %v844_v62 = vadd.f32 %v836_v41, %v776_v37  ;;  %v880_v54 = vmul.f32 %v1573_v7, %v849_v53  ;;  %v881_v27 = vmul.f32 %v1576_v12, %v850_v60  ;;  %v882_v29 = vmul.f32 %v1579_v13, %v851_v5  ;;  %v917_v7 = vld [vmem:[#allocation2 + $0x8] sm:$0x1f]  ;;  %v918_v13 = vld [vmem:[#allocation2 + $0x20] sm:$0x1f] }
  0xb8   : > { %v883_v30 = vmul.f32 %v1582_v14, %v852_v1  ;;  %v893_v56 = vrot.slane %v876_v3, 4  ;;  %v896_v39 = vrot.slane %v877_v28, 4  ;;  %v899_v40 = vrot.slane %v878_v6, 4  ;;  %v919_v14 = vld [vmem:[#allocation2 + $0x28] sm:$0x1f] }
  0xb9   : > { %v894_v38 = vrot.slane %v880_v54, 4  ;;  %v902_v59 = vrot.slane %v879_v20, 4  ;;  %v897_v36 = vrot.slane %v881_v27, 4  ;;  %v900_v37 = vrot.slane %v882_v29, 4  ;;  %v981_v3 = vld [vmem:[#allocation2 + $0x30] sm:$0xc0] }
  0xba   : > { %v903_v43 = vrot.slane %v883_v30, 4  ;;  %v944_v47 = vmul.f32 %v1587_v16, %v913_v63  ;;  %v945_v49 = vmul.f32 %v1590_v17, %v914_v0  ;;  %v946_v50 = vmul.f32 %v1593_v18, %v915_v57  ;;  %v983_v6 = vld [vmem:[#allocation2 + $0x18] sm:$0xc0]  ;;  %v984_v20 = vld [vmem:[#allocation2 + $0x10] sm:$0xc0] }
  0xbb   : > { %v895_v12 = vsel %vm892_vm3, %v893_v56, %v894_v38  ;;  %v947_v51 = vmul.f32 %v1596_v19, %v916_v58  ;;  %v898_v55 = vsel %vm892_vm3, %v896_v39, %v897_v36  ;;  %v901_v42 = vsel %vm892_vm3, %v899_v40, %v900_v37  ;;  %v988_v63 = vld [vmem:[#allocation2 + $0x38] sm:$0x3f] }
  0xbc   : > { %v904_v52 = vsel %vm892_vm3, %v902_v59, %v903_v43  ;;  %v909_v44 = vadd.f32 %v895_v12, %v841_v21  ;;  %v910_v45 = vadd.f32 %v898_v55, %v842_v61  ;;  %v911_v46 = vadd.f32 %v901_v42, %v843_v22  ;;  %v1076_v12 = vld [vmem:[%s448_s14 + $0x8] sm:$0xff] }
  0xbd   : > { %v912_v2 = vadd.f32 %v904_v52, %v844_v62  ;;  %v948_v53 = vmul.f32 %v1587_v16, %v917_v7  ;;  %v949_v60 = vmul.f32 %v1590_v17, %v918_v13  ;;  %v950_v5 = vmul.f32 %v1593_v18, %v919_v14  ;;  %v985_v16 = vld [vmem:[#allocation2 + $0x8] sm:$0x3f]  ;;  %v986_v18 = vld [vmem:[#allocation2 + $0x20] sm:$0x3f] }
  0xbe   : > { %v951_v1 = vmul.f32 %v1596_v19, %v920_v48  ;;  %v961_v28 = vrot.slane %v944_v47, 5  ;;  %v964_v35 = vrot.slane %v945_v49, 5  ;;  %v967_v41 = vrot.slane %v946_v50, 5  ;;  %v987_v19 = vld [vmem:[#allocation2 + $0x28] sm:$0x3f]  ;;  %v1075_v47 = vld [vmem:[%s448_s14] sm:$0xff] }
  0xbf   : > { %v962_v34 = vrot.slane %v948_v53, 5  ;;  %v970_v21 = vrot.slane %v947_v51, 5  ;;  %v965_v61 = vrot.slane %v949_v60, 5  ;;  %v968_v22 = vrot.slane %v950_v5, 5 }
  0xc0   : > { %v971_v62 = vrot.slane %v951_v1, 5  ;;  %v1012_v54 = vmul.f32 %v1599_v23, %v981_v3  ;;  %v1013_v0 = vmul.f32 %v1602_v24, %v982_v4  ;;  %v1014_v27 = vmul.f32 %v1605_v25, %v983_v6 }
  0xc1   : > { %v963_v17 = vsel %vm960_vm4, %v961_v28, %v962_v34  ;;  %v1015_v29 = vmul.f32 %v1608_v26, %v984_v20  ;;  %v966_v30 = vsel %vm960_vm4, %v964_v35, %v965_v61  ;;  %v969_v56 = vsel %vm960_vm4, %v967_v41, %v968_v22 }
  0xc2   : > { %v972_v57 = vsel %vm960_vm4, %v970_v21, %v971_v62  ;;  %v977_v58 = vadd.f32 %v963_v17, %v909_v44  ;;  %v978_v38 = vadd.f32 %v966_v30, %v910_v45  ;;  %v979_v39 = vadd.f32 %v969_v56, %v911_v46 }
  0xc3   : > { %v980_v40 = vadd.f32 %v972_v57, %v912_v2  ;;  %v1016_v59 = vmul.f32 %v1599_v23, %v985_v16  ;;  %v1017_v36 = vmul.f32 %v1602_v24, %v986_v18  ;;  %v1018_v37 = vmul.f32 %v1605_v25, %v987_v19 }
  0xc4   : > { %v1019_v43 = vmul.f32 %v1608_v26, %v988_v63  ;;  %v1029_v7 = vrot.slane %v1012_v54, 6  ;;  %v1032_v14 = vrot.slane %v1013_v0, 6  ;;  %v1035_v48 = vrot.slane %v1014_v27, 6 }
  0xc5   : > { %v1030_v13 = vrot.slane %v1016_v59, 6  ;;  %v1038_v49 = vrot.slane %v1015_v29, 6  ;;  %v1033_v50 = vrot.slane %v1017_v36, 6  ;;  %v1036_v51 = vrot.slane %v1018_v37, 6 }
  0xc6   : > { %v1039_v55 = vrot.slane %v1019_v43, 6  ;;  %v1066_v23 = vrot.slane %v1584_v15, %v1507_v11  ;;  %v1077_v42 = vunpack.c.l.bf16 %v1075_v47  ;;  %v1078_v25 = vunpack.c.h.bf16 %v1075_v47 }
  0xc7   : > { %v1031_v24 = vsel %vm1028_vm5, %v1029_v7, %v1030_v13  ;;  %v1079_v52 = vunpack.c.l.bf16 %v1076_v12  ;;  %v1034_v26 = vsel %vm1028_vm5, %v1032_v14, %v1033_v50  ;;  %v1037_v44 = vsel %vm1028_vm5, %v1035_v48, %v1036_v51 }
  0xc8   : > { %v1040_v45 = vsel %vm1028_vm5, %v1038_v49, %v1039_v55  ;;  %v1045_v46 = vadd.f32 %v1031_v24, %v977_v58  ;;  %v1046_v2 = vadd.f32 %v1034_v26, %v978_v38  ;;  %v1047_v53 = vadd.f32 %v1037_v44, %v979_v39 }
  0xc9   : > { %v1048_v3 = vadd.f32 %v1040_v45, %v980_v40  ;;  %v1080_v4 = vunpack.c.h.bf16 %v1076_v12 }
  0xca   : > { %v1071_v11 = vadd.f32 %v1054_v31, %v1045_v46  ;;  %v1072_v60 = vadd.f32 %v1058_v32, %v1046_v2  ;;  %v1073_v5 = vadd.f32 %v1062_v33, %v1047_v53 }
  0xcb   : > { %v1074_v1 = vadd.f32 %v1066_v23, %v1048_v3 }
  0xcc   : > { %v1081_v28 = vmul.f32 %v1077_v42, %v1071_v11  ;;  %v1082_v6 = vmul.f32 %v1078_v25, %v1072_v60  ;;  %v1083_v20 = vmul.f32 %v1079_v52, %v1073_v5 }
  0xcd   : > { %v1084_v34 = vmul.f32 %v1080_v4, %v1074_v1 }
  0xce   : > { %v1304_v8 = vpack.c.bf16 %v1082_v6, %v1081_v28 }
  0xcf   : > { %v1305_v31 = vpack.c.bf16 %v1084_v34, %v1083_v20 }
  0xd0   : > { %1101 = vst [vmem:[%s499_s18] sm:$0xff] %v1304_v8 }
  0xd1   : > { %1102 = vst [vmem:[%s499_s18 + $0x8] sm:$0xff] %v1305_v31 }
  0xd2 PF: > { %s18_s9 = sadd.s32 1, %s1389_s9   ;;  %s1732_s27 = smov %s1381_s29 }
  0xd3   : > { %p15_p9 = scmp.ge.s32.totalorder %s18_s9, 8   ;;  %s1733_s28 = smov %s1385_s30 }
  0xd4   : > { %s1734_s29 = smov %s1737_s10  ;;  %s1735_s30 = smov %s1741_s11 }
  0xd5   :  { %17 = sbr.rel (!%p15_p9) target bundleno = 3 (0x3), region = 109 }

// kernel: branchformer_forward.14
= control target key start
LH: loop header
LB: loop body
LE: loop exit
PB: predicated region body
PF: predicated region fallthrough
CT: control target
= control target key end

     0   :  { %vm1116_vm0 = vcmask 257024   ;;  %s1835_s1 = inlined_call_operand.vmem [shape: bf16[1536,32], index: 1, kind: input, shape index: {}]   ;;  %s1836_s0 = inlined_call_operand.vmem [shape: bf16[16,1536], index: 0, kind: input, shape index: {}]   ;;  %s1837_s2 = inlined_call_operand.vmem [shape: f32[1,32], index: 2, kind: input, shape index: {}]   ;;  %s1838_s3 = inlined_call_operand.vmem [shape: bf16[16,32], index: 3, kind: output, shape index: {}]  }
   0x1   :  { %v1368_v0 = vld [vmem:[%s1835_s1 + $0x78] sm:$0xff]   ;;  %v1372_v4 = vld [vmem:[%s1835_s1 + $0x70] sm:$0xff]   ;;  %v1376_v8 = vld [vmem:[%s1835_s1 + $0x68] sm:$0xff]  }
   0x2   :  { %v1369_v1 = vld [vmem:[%s1835_s1 + $0xf8] sm:$0xff]   ;;  %1236 = vmatprep.subr.bf16.mxu0 %v1368_v0  ;;  %v1373_v5 = vld [vmem:[%s1835_s1 + $0xf0] sm:$0xff]   ;;  %v1377_v9 = vld [vmem:[%s1835_s1 + $0xe8] sm:$0xff]  }
   0x3   :  { %v1370_v2 = vld [vmem:[%s1835_s1 + $0x38] sm:$0xff]   ;;  %1258 = vmatprep.subr.bf16.mxu1 %v1369_v1  ;;  %v1374_v6 = vld [vmem:[%s1835_s1 + $0x30] sm:$0xff]   ;;  %v1378_v10 = vld [vmem:[%s1835_s1 + $0x28] sm:$0xff]  }
   0x4   :  { %v1371_v3 = vld [vmem:[%s1835_s1 + $0xb8] sm:$0xff]   ;;  %1237 = vmatpush3.bf16.msra.mxu0 %v1370_v2  ;;  %v1375_v7 = vld [vmem:[%s1835_s1 + $0xb0] sm:$0xff]   ;;  %v1379_v11 = vld [vmem:[%s1835_s1 + $0xa8] sm:$0xff]  }
   0x5   :  { %1259 = vmatpush3.bf16.msra.mxu1 %v1371_v3  ;;  %1238 = vmatprep.subr.bf16.mxu0 %v1372_v4  ;;  %v1380_v12 = vld [vmem:[%s1835_s1 + $0x60] sm:$0xff]   ;;  %v1384_v16 = vld [vmem:[%s1835_s1 + $0x58] sm:$0xff]   ;;  %v1388_v20 = vld [vmem:[%s1835_s1 + $0x50] sm:$0xff]  }
   0x6   :  { %1260 = vmatprep.subr.bf16.mxu1 %v1373_v5  ;;  %v1381_v13 = vld [vmem:[%s1835_s1 + $0xe0] sm:$0xff]   ;;  %v1385_v17 = vld [vmem:[%s1835_s1 + $0xd8] sm:$0xff]   ;;  %v1389_v21 = vld [vmem:[%s1835_s1 + $0xd0] sm:$0xff]  }
   0x7   :  { %v1382_v14 = vld [vmem:[%s1835_s1 + $0x20] sm:$0xff]   ;;  %v1386_v18 = vld [vmem:[%s1835_s1 + $0x18] sm:$0xff]   ;;  %v1390_v22 = vld [vmem:[%s1835_s1 + $0x10] sm:$0xff]  }
   0x8   :  { %1239 = vmatpush3.bf16.msra.mxu0 %v1374_v6  ;;  %v1383_v15 = vld [vmem:[%s1835_s1 + $0xa0] sm:$0xff]   ;;  %v1387_v19 = vld [vmem:[%s1835_s1 + $0x98] sm:$0xff]   ;;  %v1391_v23 = vld [vmem:[%s1835_s1 + $0x90] sm:$0xff]  }
   0x9   :  { %1261 = vmatpush3.bf16.msra.mxu1 %v1375_v7  ;;  %1240 = vmatprep.subr.bf16.mxu0 %v1376_v8  ;;  %v1392_v24 = vld [vmem:[%s1835_s1 + $0x48] sm:$0xff]   ;;  %v1396_v28 = vld [vmem:[%s1835_s1 + $0x40] sm:$0xff]   ;;  %v1406_v36 = vld [vmem:[%s1835_s1 + $0x178] sm:$0xff]  }
   0xa   :  { %1262 = vmatprep.subr.bf16.mxu1 %v1377_v9  ;;  %v1393_v25 = vld [vmem:[%s1835_s1 + $0xc8] sm:$0xff]   ;;  %v1397_v29 = vld [vmem:[%s1835_s1 + $0xc0] sm:$0xff]   ;;  %v1407_v37 = vld [vmem:[%s1835_s1 + $0x1f8] sm:$0xff]  }
   0xb   :  { %v1394_v26 = vld [vmem:[%s1835_s1 + $0x8] sm:$0xff]   ;;  %v1398_v30 = vld [vmem:[%s1835_s1] sm:$0xff]   ;;  %v1408_v38 = vld [vmem:[%s1835_s1 + $0x138] sm:$0xff]  }
   0xc   :  { %1241 = vmatpush3.bf16.msra.mxu0 %v1378_v10  ;;  %v1395_v27 = vld [vmem:[%s1835_s1 + $0x88] sm:$0xff]   ;;  %v1399_v31 = vld [vmem:[%s1835_s1 + $0x80] sm:$0xff]   ;;  %v1409_v39 = vld [vmem:[%s1835_s1 + $0x1b8] sm:$0xff]  }
   0xd   :  { %1263 = vmatpush3.bf16.msra.mxu1 %v1379_v11  ;;  %1242 = vmatprep.subr.bf16.mxu0 %v1380_v12  ;;  %v1400_v32 = vld [vmem:[%s1836_s0] ss:$48 sps:$4 sm:$0xff]   ;;  %v1402_v33 = vld [vmem:[%s1836_s0 + $0x4] ss:$48 sps:$4 sm:$0xff]   ;;  %v1403_v34 = vld [vmem:[%s1836_s0 + $0x8] ss:$48 sps:$4 sm:$0xff]  }
   0xe   :  { %1264 = vmatprep.subr.bf16.mxu1 %v1381_v13  ;;  %v1405_v35 = vld [vmem:[%s1836_s0 + $0xc] ss:$48 sps:$4 sm:$0xff]   ;;  %894 = vmatprep.mubr.bf16.mxu0 %v1402_v33  ;;  %v1410_v40 = vld [vmem:[%s1835_s1 + $0x170] sm:$0xff]   ;;  %v1418_v48 = vld [vmem:[%s1835_s1 + $0x160] sm:$0xff]  }
   0xf   :  { %935 = vmatprep.mubr.bf16.mxu1 %v1405_v35  ;;  %v1411_v41 = vld [vmem:[%s1835_s1 + $0x1f0] sm:$0xff]   ;;  %v1414_v44 = vld [vmem:[%s1835_s1 + $0x168] sm:$0xff]   ;;  %v1419_v49 = vld [vmem:[%s1835_s1 + $0x1e0] sm:$0xff]  }
  0x10   :  { %1243 = vmatpush3.bf16.msra.mxu0 %v1382_v14  ;;  %v1412_v42 = vld [vmem:[%s1835_s1 + $0x130] sm:$0xff]   ;;  %v1415_v45 = vld [vmem:[%s1835_s1 + $0x1e8] sm:$0xff]   ;;  %v1420_v50 = vld [vmem:[%s1835_s1 + $0x120] sm:$0xff]  }
  0x11   :  { %1265 = vmatpush3.bf16.msra.mxu1 %v1383_v15  ;;  %1244 = vmatprep.subr.bf16.mxu0 %v1384_v16  ;;  %v1413_v43 = vld [vmem:[%s1835_s1 + $0x1b0] sm:$0xff]   ;;  %v1416_v46 = vld [vmem:[%s1835_s1 + $0x128] sm:$0xff]   ;;  %v1421_v51 = vld [vmem:[%s1835_s1 + $0x1a0] sm:$0xff]  }
  0x12   :  { %1266 = vmatprep.subr.bf16.mxu1 %v1385_v17  ;;  %v1417_v47 = vld [vmem:[%s1835_s1 + $0x1a8] sm:$0xff]   ;;  %v1422_v52 = vld [vmem:[%s1835_s1 + $0x158] sm:$0xff]   ;;  %v1426_v56 = vld [vmem:[%s1835_s1 + $0x150] sm:$0xff]  }
  0x13   :  { %v1423_v53 = vld [vmem:[%s1835_s1 + $0x1d8] sm:$0xff]   ;;  %v1427_v57 = vld [vmem:[%s1835_s1 + $0x1d0] sm:$0xff]   ;;  %v1430_v60 = vld [vmem:[%s1835_s1 + $0x148] sm:$0xff]  }
  0x14   :  { %1245 = vmatpush3.bf16.msra.mxu0 %v1386_v18  ;;  %v1424_v54 = vld [vmem:[%s1835_s1 + $0x118] sm:$0xff]   ;;  %v1428_v58 = vld [vmem:[%s1835_s1 + $0x110] sm:$0xff]   ;;  %v1431_v61 = vld [vmem:[%s1835_s1 + $0x1c8] sm:$0xff]  }
  0x15   :  { %1267 = vmatpush3.bf16.msra.mxu1 %v1387_v19  ;;  %1246 = vmatprep.subr.bf16.mxu0 %v1388_v20  ;;  %v1425_v55 = vld [vmem:[%s1835_s1 + $0x198] sm:$0xff]   ;;  %v1429_v59 = vld [vmem:[%s1835_s1 + $0x190] sm:$0xff]   ;;  %v1432_v62 = vld [vmem:[%s1835_s1 + $0x108] sm:$0xff]  }
  0x16   :  { %1268 = vmatprep.subr.bf16.mxu1 %v1389_v21  ;;  %v1433_v63 = vld [vmem:[%s1835_s1 + $0x188] sm:$0xff]   ;;  %v1434_v0 = vld [vmem:[%s1835_s1 + $0x140] sm:$0xff]   ;;  %v1444_v8 = vld [vmem:[%s1835_s1 + $0x278] sm:$0xff]  }
  0x17   :  { %v1435_v1 = vld [vmem:[%s1835_s1 + $0x1c0] sm:$0xff]   ;;  %v1441_v6 = vld [vmem:[%s1836_s0 + $0x18] ss:$48 sps:$4 sm:$0xff]   ;;  %v1443_v7 = vld [vmem:[%s1836_s0 + $0x1c] ss:$48 sps:$4 sm:$0xff]  }
  0x18   :  { %1247 = vmatpush3.bf16.msra.mxu0 %v1390_v22  ;;  %v1436_v2 = vld [vmem:[%s1835_s1 + $0x100] sm:$0xff]   ;;  %v1445_v9 = vld [vmem:[%s1835_s1 + $0x2f8] sm:$0xff]   ;;  %v1448_v12 = vld [vmem:[%s1835_s1 + $0x270] sm:$0xff]  }
  0x19   :  { %1269 = vmatpush3.bf16.msra.mxu1 %v1391_v23  ;;  %1248 = vmatprep.subr.bf16.mxu0 %v1392_v24  ;;  %v1437_v3 = vld [vmem:[%s1835_s1 + $0x180] sm:$0xff]   ;;  %v1446_v10 = vld [vmem:[%s1835_s1 + $0x238] sm:$0xff]   ;;  %v1449_v13 = vld [vmem:[%s1835_s1 + $0x2f0] sm:$0xff]  }
  0x1a   :  { %1270 = vmatprep.subr.bf16.mxu1 %v1393_v25  ;;  %v1438_v4 = vld [vmem:[%s1836_s0 + $0x10] ss:$48 sps:$4 sm:$0xff]   ;;  %v1440_v5 = vld [vmem:[%s1836_s0 + $0x14] ss:$48 sps:$4 sm:$0xff]   ;;  %v1447_v11 = vld [vmem:[%s1835_s1 + $0x2b8] sm:$0xff]  }
  0x1b   :  { %v1450_v14 = vld [vmem:[%s1835_s1 + $0x230] sm:$0xff]   ;;  %v1452_v16 = vld [vmem:[%s1835_s1 + $0x268] sm:$0xff]   ;;  %v1456_v20 = vld [vmem:[%s1835_s1 + $0x260] sm:$0xff]  }
  0x1c   :  { %1249 = vmatpush3.bf16.msra.mxu0 %v1394_v26  ;;  %v1451_v15 = vld [vmem:[%s1835_s1 + $0x2b0] sm:$0xff]   ;;  %v1453_v17 = vld [vmem:[%s1835_s1 + $0x2e8] sm:$0xff]   ;;  %v1457_v21 = vld [vmem:[%s1835_s1 + $0x2e0] sm:$0xff]  }
  0x1d   :  { %1271 = vmatpush3.bf16.msra.mxu1 %v1395_v27  ;;  %1250 = vmatprep.subr.bf16.mxu0 %v1396_v28  ;;  %v1454_v18 = vld [vmem:[%s1835_s1 + $0x228] sm:$0xff]   ;;  %v1458_v22 = vld [vmem:[%s1835_s1 + $0x220] sm:$0xff]   ;;  %v1460_v24 = vld [vmem:[%s1835_s1 + $0x258] sm:$0xff]  }
  0x1e   :  { %1272 = vmatprep.subr.bf16.mxu1 %v1397_v29  ;;  %v1455_v19 = vld [vmem:[%s1835_s1 + $0x2a8] sm:$0xff]   ;;  %v1459_v23 = vld [vmem:[%s1835_s1 + $0x2a0] sm:$0xff]   ;;  %v1461_v25 = vld [vmem:[%s1835_s1 + $0x2d8] sm:$0xff]  }
  0x1f   :  { %v1462_v26 = vld [vmem:[%s1835_s1 + $0x218] sm:$0xff]   ;;  %v1464_v28 = vld [vmem:[%s1835_s1 + $0x250] sm:$0xff]   ;;  %v1469_v33 = vld [vmem:[%s1835_s1 + $0x2c8] sm:$0xff]  }
  0x20   :  { %1251 = vmatpush3.bf16.msra.mxu0 %v1398_v30  ;;  %v1463_v27 = vld [vmem:[%s1835_s1 + $0x298] sm:$0xff]   ;;  %v1465_v29 = vld [vmem:[%s1835_s1 + $0x2d0] sm:$0xff]   ;;  %v1471_v35 = vld [vmem:[%s1835_s1 + $0x288] sm:$0xff]  }
  0x21   :  { %1273 = vmatpush3.bf16.msra.mxu1 %v1399_v31  ;;  %1280 = vmatprep.subr.bf16.mxu0 %v1406_v36  ;;  %v1466_v30 = vld [vmem:[%s1835_s1 + $0x210] sm:$0xff]   ;;  %v1472_v36 = vld [vmem:[%s1835_s1 + $0x240] sm:$0xff]  }
  0x22   :  { %1302 = vmatprep.subr.bf16.mxu1 %v1407_v37  ;;  %v1467_v31 = vld [vmem:[%s1835_s1 + $0x290] sm:$0xff]   ;;  %v1473_v37 = vld [vmem:[%s1835_s1 + $0x2c0] sm:$0xff]  }
  0x23   :  { %895 = vmatmul.mubr.bf16.vlgmr.msra.gmra.mxu0 %v1400_v32  ;;  %v1468_v32 = vld [vmem:[%s1835_s1 + $0x248] sm:$0xff]  }
  0x24   :  { %936 = vmatmul.mubr.bf16.vlgmr.msra.gmra.mxu1 %v1403_v34  ;;  %1281 = vmatpush3.bf16.msra.mxu0 %v1408_v38  ;;  %v1470_v34 = vld [vmem:[%s1835_s1 + $0x208] sm:$0xff]   ;;  %v1474_v38 = vld [vmem:[%s1835_s1 + $0x200] sm:$0xff]  }
  0x25   :  { %1303 = vmatpush3.bf16.msra.mxu1 %v1409_v39  ;;  %1282 = vmatprep.subr.bf16.mxu0 %v1410_v40  ;;  %v1475_v39 = vld [vmem:[%s1835_s1 + $0x280] sm:$0xff]  }
  0x26   :  { %1304 = vmatprep.subr.bf16.mxu1 %v1411_v41  ;;  %976 = vmatprep.mubr.bf16.mxu0 %v1440_v5  ;;  %v1476_v40 = vld [vmem:[%s1836_s0 + $0x20] ss:$48 sps:$4 sm:$0xff]   ;;  %v1478_v41 = vld [vmem:[%s1836_s0 + $0x24] ss:$48 sps:$4 sm:$0xff]  }
  0x27   :  { %1017 = vmatprep.mubr.bf16.mxu1 %v1443_v7 }
  0x28   :  { %1283 = vmatpush3.bf16.msra.mxu0 %v1412_v42  ;;  %v1479_v42 = vld [vmem:[%s1836_s0 + $0x28] ss:$48 sps:$4 sm:$0xff]  }
  0x29   :  { %1305 = vmatpush3.bf16.msra.mxu1 %v1413_v43  ;;  %1284 = vmatprep.subr.bf16.mxu0 %v1414_v44  ;;  %v1481_v43 = vld [vmem:[%s1836_s0 + $0x2c] ss:$48 sps:$4 sm:$0xff]  }
  0x2a   :  { %1306 = vmatprep.subr.bf16.mxu1 %v1415_v45 }
  0x2c   :  { %1285 = vmatpush3.bf16.msra.mxu0 %v1416_v46 }
  0x2d   :  { %1307 = vmatpush3.bf16.msra.mxu1 %v1417_v47  ;;  %1286 = vmatprep.subr.bf16.mxu0 %v1418_v48 }
  0x2e   :  { %1308 = vmatprep.subr.bf16.mxu1 %v1419_v49 }
  0x30   :  { %1287 = vmatpush3.bf16.msra.mxu0 %v1420_v50 }
  0x31   :  { %1309 = vmatpush3.bf16.msra.mxu1 %v1421_v51  ;;  %1288 = vmatprep.subr.bf16.mxu0 %v1422_v52 }
  0x32   :  { %1310 = vmatprep.subr.bf16.mxu1 %v1423_v53 }
  0x34   :  { %1289 = vmatpush3.bf16.msra.mxu0 %v1424_v54 }
  0x35   :  { %1311 = vmatpush3.bf16.msra.mxu1 %v1425_v55  ;;  %1290 = vmatprep.subr.bf16.mxu0 %v1426_v56  ;;  %v1123_v56 = vld [vmem:[%s1837_s2] ss:$0 sm:$0xff] }
  0x36   :  { %1312 = vmatprep.subr.bf16.mxu1 %v1427_v57 }
  0x38   :  { %1291 = vmatpush3.bf16.msra.mxu0 %v1428_v58 }
  0x39   :  { %1313 = vmatpush3.bf16.msra.mxu1 %v1429_v59  ;;  %1292 = vmatprep.subr.bf16.mxu0 %v1430_v60 }
  0x3a   :  { %1314 = vmatprep.subr.bf16.mxu1 %v1431_v61 }
  0x3c   :  { %1293 = vmatpush3.bf16.msra.mxu0 %v1432_v62 }
  0x3d   :  { %1315 = vmatpush3.bf16.msra.mxu1 %v1433_v63  ;;  %1294 = vmatprep.subr.bf16.mxu0 %v1434_v0 }
  0x3e   :  { %1316 = vmatprep.subr.bf16.mxu1 %v1435_v1 }
  0x40   :  { %1295 = vmatpush3.bf16.msra.mxu0 %v1436_v2 }
  0x41   :  { %1317 = vmatpush3.bf16.msra.mxu1 %v1437_v3  ;;  %1324 = vmatprep.subr.bf16.mxu0 %v1444_v8 }
  0x42   :  { %1346 = vmatprep.subr.bf16.mxu1 %v1445_v9 }
  0x43   :  { %977 = vmatmul.mubr.bf16.vlgmr.msra.gmra.mxu0 %v1438_v4 }
  0x44   :  { %1018 = vmatmul.mubr.bf16.vlgmr.msra.gmra.mxu1 %v1441_v6  ;;  %1325 = vmatpush3.bf16.msra.mxu0 %v1446_v10 }
  0x45   :  { %1347 = vmatpush3.bf16.msra.mxu1 %v1447_v11  ;;  %1326 = vmatprep.subr.bf16.mxu0 %v1448_v12 }
  0x46   :  { %1348 = vmatprep.subr.bf16.mxu1 %v1449_v13  ;;  %1058 = vmatprep.mubr.bf16.mxu0 %v1478_v41 }
  0x47   :  { %1099 = vmatprep.mubr.bf16.mxu1 %v1481_v43 }
  0x48   :  { %1327 = vmatpush3.bf16.msra.mxu0 %v1450_v14 }
  0x49   :  { %1349 = vmatpush3.bf16.msra.mxu1 %v1451_v15  ;;  %1328 = vmatprep.subr.bf16.mxu0 %v1452_v16 }
  0x4a   :  { %1350 = vmatprep.subr.bf16.mxu1 %v1453_v17 }
  0x4c   :  { %1329 = vmatpush3.bf16.msra.mxu0 %v1454_v18 }
  0x4d   :  { %1351 = vmatpush3.bf16.msra.mxu1 %v1455_v19  ;;  %1330 = vmatprep.subr.bf16.mxu0 %v1456_v20 }
  0x4e   :  { %1352 = vmatprep.subr.bf16.mxu1 %v1457_v21 }
  0x50   :  { %1331 = vmatpush3.bf16.msra.mxu0 %v1458_v22 }
  0x51   :  { %1353 = vmatpush3.bf16.msra.mxu1 %v1459_v23  ;;  %1332 = vmatprep.subr.bf16.mxu0 %v1460_v24 }
  0x52   :  { %1354 = vmatprep.subr.bf16.mxu1 %v1461_v25 }
  0x54   :  { %1333 = vmatpush3.bf16.msra.mxu0 %v1462_v26 }
  0x55   :  { %1355 = vmatpush3.bf16.msra.mxu1 %v1463_v27  ;;  %1334 = vmatprep.subr.bf16.mxu0 %v1464_v28 }
  0x56   :  { %1356 = vmatprep.subr.bf16.mxu1 %v1465_v29 }
  0x58   :  { %1335 = vmatpush3.bf16.msra.mxu0 %v1466_v30 }
  0x59   :  { %1357 = vmatpush3.bf16.msra.mxu1 %v1467_v31  ;;  %1336 = vmatprep.subr.bf16.mxu0 %v1468_v32 }
  0x5a   :  { %1358 = vmatprep.subr.bf16.mxu1 %v1469_v33 }
  0x5c   :  { %1337 = vmatpush3.bf16.msra.mxu0 %v1470_v34 }
  0x5d   :  { %1359 = vmatpush3.bf16.msra.mxu1 %v1471_v35  ;;  %1338 = vmatprep.subr.bf16.mxu0 %v1472_v36 }
  0x5e   :  { %1360 = vmatprep.subr.bf16.mxu1 %v1473_v37 }
  0x60   :  { %1339 = vmatpush3.bf16.msra.mxu0 %v1474_v38 }
  0x61   :  { %1361 = vmatpush3.bf16.msra.mxu1 %v1475_v39 }
  0x63   :  { %1059 = vmatmul.mubr.bf16.vlgmr.msra.gmra.mxu0 %v1476_v40 }
  0x64   :  { %1100 = vmatmul.mubr.bf16.vlgmr.msra.gmra.mxu1 %v1479_v42 }
  0xe3   :  { %v1252_v44 = vpop.f32.mrf.mxu0 }
  0xe4   :  { %v1274_v45 = vpop.f32.mrf.mxu1 }
  0xe5   :  { %v1253_v46 = vpop.f32.mrf.mxu0 }
  0xe6   :  { %v1275_v47 = vpop.f32.mrf.mxu1  ;;  %v1254_v55 = vadd.f32 %v1253_v46, %v1252_v44 }
  0xe7   :  { %v1255_v48 = vpop.f32.mrf.mxu0  ;;  %v1276_v60 = vadd.f32 %v1275_v47, %v1274_v45 }
  0xe8   :  { %v1277_v49 = vpop.f32.mrf.mxu1  ;;  %v897_v59 = vadd.f32 %v1254_v55, %v1123_v56 }
  0xe9   :  { %v1256_v50 = vpop.f32.mrf.mxu0 }
  0xea   :  { %v1278_v52 = vpop.f32.mrf.mxu1  ;;  %v1257_v61 = vadd.f32 %v1256_v50, %v1255_v48  ;;  %v938_v1 = vadd.f32 %v1276_v60, %v897_v59 }
  0xeb   :  { %v1279_v3 = vadd.f32 %v1278_v52, %v1277_v49 }
  0xec   :  { %v900_v2 = vadd.f32 %v1257_v61, %v1123_v56 }
  0xee   :  { %v941_v9 = vadd.f32 %v1279_v3, %v900_v2 }
 0x103   :  { %v1296_v51 = vpop.f32.mrf.mxu0 }
 0x104   :  { %v1318_v53 = vpop.f32.mrf.mxu1 }
 0x105   :  { %v1297_v54 = vpop.f32.mrf.mxu0 }
 0x106   :  { %v1319_v57 = vpop.f32.mrf.mxu1  ;;  %v1298_v62 = vadd.f32 %v1297_v54, %v1296_v51 }
 0x107   :  { %v1299_v58 = vpop.f32.mrf.mxu0  ;;  %v1320_v5 = vadd.f32 %v1319_v57, %v1318_v53 }
 0x108   :  { %v1321_v63 = vpop.f32.mrf.mxu1  ;;  %v979_v4 = vadd.f32 %v1298_v62, %v938_v1 }
 0x109   :  { %v1300_v0 = vpop.f32.mrf.mxu0 }
 0x10a   :  { %v1301_v6 = vadd.f32 %v1300_v0, %v1299_v58  ;;  %v1322_v7 = vpop.f32.mrf.mxu1  ;;  %v1020_v12 = vadd.f32 %v1320_v5, %v979_v4 }
 0x10b   :  { %v1323_v17 = vadd.f32 %v1322_v7, %v1321_v63 }
 0x10c   :  { %v982_v13 = vadd.f32 %v1301_v6, %v941_v9 }
 0x10e   :  { %v1023_v22 = vadd.f32 %v1323_v17, %v982_v13 }
 0x123   :  { %v1340_v8 = vpop.f32.mrf.mxu0 }
 0x124   :  { %v1362_v10 = vpop.f32.mrf.mxu1 }
 0x125   :  { %v1341_v11 = vpop.f32.mrf.mxu0 }
 0x126   :  { %v1342_v14 = vadd.f32 %v1341_v11, %v1340_v8  ;;  %v1363_v15 = vpop.f32.mrf.mxu1 }
 0x127   :  { %v1343_v16 = vpop.f32.mrf.mxu0  ;;  %v1364_v19 = vadd.f32 %v1363_v15, %v1362_v10 }
 0x128   :  { %v1061_v18 = vadd.f32 %v1342_v14, %v1020_v12  ;;  %v1365_v20 = vpop.f32.mrf.mxu1 }
 0x129   :  { %v1344_v21 = vpop.f32.mrf.mxu0 }
 0x12a   :  { %v1102_v23 = vadd.f32 %v1364_v19, %v1061_v18  ;;  %v1345_v24 = vadd.f32 %v1344_v21, %v1343_v16  ;;  %v1366_v25 = vpop.f32.mrf.mxu1 }
 0x12b   :  { %v1367_v28 = vadd.f32 %v1366_v25, %v1365_v20 }
 0x12c   :  { %v1234_v26 = vpack.c.bf16 %v1102_v23, %v1102_v23  ;;  %v1064_v27 = vadd.f32 %v1345_v24, %v1023_v22 }
 0x12e   :  { %1117 = vst.msk [vmem:[%s1838_s3] sm:$0xf] %vm1116_vm0, %v1234_v26  ;;  %v1105_v29 = vadd.f32 %v1367_v28, %v1064_v27 }
 0x130   :  { %v1235_v30 = vpack.c.bf16 %v1105_v29, %v1105_v29 }
 0x132   :  { %1118 = vst.msk [vmem:[%s1838_s3 + $0x4] sm:$0xf] %vm1116_vm0, %v1235_v30 }

// kernel: branchformer_forward.12
= control target key start
LH: loop header
LB: loop body
LE: loop exit
PB: predicated region body
PF: predicated region fallthrough
CT: control target
= control target key end

     0   :  { %vm26_vm0 = vcmask 261120   ;;  %v1737_v36 = vmov 0   ;;  %vm1499_vm1 = vcmask 7168   ;;  %s2402_s0 = inlined_call_operand.vmem [shape: f32[16,32], index: 0, kind: input, shape index: {}]   ;;  %s2403_s1 = inlined_call_operand.vmem [shape: bf16[32,3072], index: 1, kind: input, shape index: {}]   ;;  %s2404_s2 = inlined_call_operand.vmem [shape: f32[1,32], index: 2, kind: input, shape index: {}]   ;;  %s2405_s3 = inlined_call_operand.vmem [shape: f32[1,32], index: 3, kind: input, shape index: {}]   ;;  %s2406_s4 = inlined_call_operand.vmem [shape: f32[1,3072], index: 4, kind: input, shape index: {}]   ;;  %s2407_s5 = inlined_call_operand.vmem [shape: bf16[16,3072], index: 5, kind: output, shape index: {0}]   ;;  %s2408_s6 = inlined_call_operand.vmem [shape: f32[16,1], index: 6, kind: output, shape index: {1}]   ;;  %s2409_s7 = inlined_call_operand.vmem [shape: f32[16,1], index: 7, kind: output, shape index: {2}]  }
   0x1   :  { %v24_v0 = vld [vmem:[%s2402_s0] sm:$0xff]  ;;  %v25_v1 = vld [vmem:[%s2402_s0 + $0x8] sm:$0xff]  ;;  %v99_v30 = vld [vmem:[%s2403_s1 + $0xd0] sm:$0xff]  ;;  %522 = vmatprep.mubr.bf16.mxu0 %v1737_v36  ;;  %565 = vmatprep.mubr.bf16.mxu1 %v1737_v36 }
   0x2   :  { %v27_v2 = vsel %vm26_vm0, %v24_v0, 0.0  ;;  %v30_v3 = vsel %vm26_vm0, %v25_v1, 0.0  ;;  %v97_v14 = vld [vmem:[%s2403_s1 + $0xc0] sm:$0xff]  ;;  %v98_v16 = vld [vmem:[%s2403_s1 + $0xc8] sm:$0xff]  ;;  %v111_v31 = vld [vmem:[%s2403_s1 + $0x130] sm:$0xff] }
   0x3   :  { %28 = vadd.xlane.f32.xlu0 %v27_v2  ;;  %v109_v15 = vld [vmem:[%s2403_s1 + $0x120] sm:$0xff]  ;;  %v110_v18 = vld [vmem:[%s2403_s1 + $0x128] sm:$0xff]  ;;  %v100_v32 = vld [vmem:[%s2403_s1 + $0xd8] sm:$0xff]  ;;  %v1552_v33 = vcombine.low %v99_v30, %v111_v31  ;;  %v1553_v34 = vcombine.high %v99_v30, %v111_v31 }
   0x4   :  { %v1549_v17 = vcombine.high %v97_v14, %v109_v15  ;;  %v1548_v19 = vcombine.low %v97_v14, %v109_v15  ;;  %v1551_v20 = vcombine.high %v98_v16, %v110_v18  ;;  %v1550_v21 = vcombine.low %v98_v16, %v110_v18  ;;  %v73_v22 = vld [vmem:[%s2403_s1] sm:$0xff]  ;;  %v74_v24 = vld [vmem:[%s2403_s1 + $0x8] sm:$0xff]  ;;  %v112_v35 = vld [vmem:[%s2403_s1 + $0x138] sm:$0xff] }
   0x5   :  { %v85_v23 = vld [vmem:[%s2403_s1 + $0x60] sm:$0xff]  ;;  %v86_v26 = vld [vmem:[%s2403_s1 + $0x68] sm:$0xff]  ;;  %v1554_v37 = vcombine.low %v100_v32, %v112_v35  ;;  %v1555_v38 = vcombine.high %v100_v32, %v112_v35  ;;  %v75_v53 = vld [vmem:[%s2403_s1 + $0x10] sm:$0xff] }
   0x6   :  { %502 = vmatprep.subr.bf16.mxu0 %v1549_v17  ;;  %545 = vmatprep.subr.bf16.mxu1 %v1551_v20  ;;  %v1525_v25 = vcombine.high %v73_v22, %v85_v23  ;;  %v1524_v27 = vcombine.low %v73_v22, %v85_v23  ;;  %v1527_v28 = vcombine.high %v74_v24, %v86_v26  ;;  %v1522_v47 = vld [vmem:[%s2404_s2] ss:$0 sm:$0xff]  ;;  %v87_v54 = vld [vmem:[%s2403_s1 + $0x70] sm:$0xff]  ;;  %v76_v55 = vld [vmem:[%s2403_s1 + $0x18] sm:$0xff] }
   0x7   :  { %31 = vadd.xlane.f32.xlu0 %v30_v3  ;;  %503 = vmatpush1.bf16.msra.mxu0 %v1548_v19  ;;  %v1526_v29 = vcombine.low %v74_v24, %v86_v26  ;;  %v1523_v51 = vld [vmem:[%s2405_s3] ss:$0 sm:$0xff]  ;;  %v88_v56 = vld [vmem:[%s2403_s1 + $0x78] sm:$0xff]  ;;  %v1529_v60 = vcombine.high %v75_v53, %v87_v54  ;;  %v1528_v2 = vcombine.low %v75_v53, %v87_v54  ;;  %v103_v14 = vld [vmem:[%s2403_s1 + $0xf0] sm:$0xff] }
   0x8   :  { %546 = vmatpush1.bf16.msra.mxu1 %v1550_v21  ;;  %504 = vmatprep.subr.bf16.mxu0 %v1525_v25  ;;  %v1531_v61 = vcombine.high %v76_v55, %v88_v56  ;;  %v101_v62 = vld [vmem:[%s2403_s1 + $0xe0] sm:$0xff]  ;;  %v1530_v3 = vcombine.low %v76_v55, %v88_v56  ;;  %v115_v15 = vld [vmem:[%s2403_s1 + $0x150] sm:$0xff]  ;;  %v104_v16 = vld [vmem:[%s2403_s1 + $0xf8] sm:$0xff] }
   0x9   :  { %547 = vmatprep.subr.bf16.mxu1 %v1527_v28  ;;  %v113_v63 = vld [vmem:[%s2403_s1 + $0x140] sm:$0xff]  ;;  %v116_v17 = vld [vmem:[%s2403_s1 + $0x158] sm:$0xff]  ;;  %v1561_v20 = vcombine.high %v103_v14, %v115_v15  ;;  %v79_v22 = vld [vmem:[%s2403_s1 + $0x30] sm:$0xff]  ;;  %v1560_v26 = vcombine.low %v103_v14, %v115_v15 }
   0xa   :  { %v1563_v21 = vcombine.high %v104_v16, %v116_v17  ;;  %v91_v23 = vld [vmem:[%s2403_s1 + $0x90] sm:$0xff]  ;;  %v80_v24 = vld [vmem:[%s2403_s1 + $0x38] sm:$0xff]  ;;  %v105_v30 = vld [vmem:[%s2403_s1 + $0x100] sm:$0xff] }
   0xb   :  { %505 = vmatpush1.bf16.msra.mxu0 %v1524_v27  ;;  %v92_v25 = vld [vmem:[%s2403_s1 + $0x98] sm:$0xff]  ;;  %v1562_v27 = vcombine.low %v104_v16, %v116_v17  ;;  %v1537_v28 = vcombine.high %v79_v22, %v91_v23  ;;  %v117_v31 = vld [vmem:[%s2403_s1 + $0x160] sm:$0xff]  ;;  %v106_v32 = vld [vmem:[%s2403_s1 + $0x108] sm:$0xff] }
   0xc   :  { %548 = vmatpush1.bf16.msra.mxu1 %v1526_v29  ;;  %588 = vmatprep.subr.bf16.mxu0 %v1553_v34  ;;  %v1539_v29 = vcombine.high %v80_v24, %v92_v25  ;;  %v1536_v34 = vcombine.low %v79_v22, %v91_v23  ;;  %v1538_v35 = vcombine.low %v80_v24, %v92_v25  ;;  %v83_v55 = vld [vmem:[%s2403_s1 + $0x50] sm:$0xff]  ;;  %v122_v23 = vld [vmem:[%s2406_s4 + $0x8] sm:$0xff] }
   0xd   :  { %631 = vmatprep.subr.bf16.mxu1 %v1555_v38  ;;  %v95_v56 = vld [vmem:[%s2403_s1 + $0xb0] sm:$0xff] }
  0x8c   :  { %v29_v4 = vpop.xlane.xlu0 %28 }
  0x8d   :  { %v34_v5 = vmul.f32 0.03125, %v29_v4  ;;  %v1557_v4 = vcombine.high %v101_v62, %v113_v63 }
  0x8f   :  { %v36_v6 = vsub.f32 %v24_v0, %v34_v5  ;;  %v102_v0 = vld [vmem:[%s2403_s1 + $0xe8] sm:$0xff] }
  0x90   :  { %v32_v7 = vpop.xlane.xlu0 %31 }
  0x91   :  { %v35_v8 = vmul.f32 0.03125, %v32_v7  ;;  %v38_v9 = vmul.f32 %v36_v6, %v36_v6  ;;  %v89_v7 = vld [vmem:[%s2403_s1 + $0x80] sm:$0xff] }
  0x93   :  { %v37_v10 = vsub.f32 %v25_v1, %v35_v8  ;;  %v40_v11 = vsel %vm26_vm0, %v38_v9, 0.0  ;;  %v114_v1 = vld [vmem:[%s2403_s1 + $0x148] sm:$0xff] }
  0x94   :  { %41 = vadd.xlane.f32.xlu1 %v40_v11  ;;  %v1559_v5 = vcombine.high %v102_v0, %v114_v1  ;;  %v78_v8 = vld [vmem:[%s2403_s1 + $0x28] sm:$0xff]  ;;  %v1558_v11 = vcombine.low %v102_v0, %v114_v1  ;;  %v1544_v0 = vcombine.low %v83_v55, %v95_v56 }
  0x95   :  { %v39_v12 = vmul.f32 %v37_v10, %v37_v10  ;;  %v90_v9 = vld [vmem:[%s2403_s1 + $0x88] sm:$0xff] }
  0x96   :  { %v1534_v19 = vcombine.low %v78_v8, %v90_v9 }
  0x97   :  { %v43_v13 = vsel %vm26_vm0, %v39_v12, 0.0 }
  0x98   :  { %44 = vadd.xlane.f32.xlu1 %v43_v13  ;;  %v1535_v13 = vcombine.high %v78_v8, %v90_v9 }
 0x11d   :  { %v42_v39 = vpop.xlane.xlu1 %41 }
 0x11e   :  { %v46_v40 = vmul.f32 0.03125, %v42_v39  ;;  %v81_v39 = vld [vmem:[%s2403_s1 + $0x40] sm:$0xff] }
 0x120   :  { %v48_v41 = vadd.f32 1e-05, %v46_v40  ;;  %v93_v40 = vld [vmem:[%s2403_s1 + $0xa0] sm:$0xff] }
 0x121   :  { %v45_v42 = vpop.xlane.xlu1 %44 }
 0x122   :  { %1633 = vrsqrt.f32 %v48_v41  ;;  %v47_v43 = vmul.f32 0.03125, %v45_v42  ;;  %v82_v41 = vld [vmem:[%s2403_s1 + $0x48] sm:$0xff] }
 0x123   :  { %v94_v42 = vld [vmem:[%s2403_s1 + $0xa8] sm:$0xff] }
 0x124   :  { %v49_v44 = vadd.f32 1e-05, %v47_v43  ;;  %v1564_v43 = vcombine.low %v105_v30, %v117_v31 }
 0x126   :  { %1635 = vrsqrt.f32 %v49_v44 }
 0x12f   :  { %v1634_v45 = vpop.eup %1633 }
 0x130   :  { %v52_v46 = vmul.f32 %v1634_v45, %v36_v6  ;;  %v77_v6 = vld [vmem:[%s2403_s1 + $0x20] sm:$0xff]  ;;  %v1541_v45 = vcombine.high %v81_v39, %v93_v40 }
 0x131   :  { %v1533_v12 = vcombine.high %v77_v6, %v89_v7  ;;  %v1532_v18 = vcombine.low %v77_v6, %v89_v7  ;;  %v121_v6 = vld [vmem:[%s2406_s4] sm:$0xff] }
 0x132   :  { %v61_v49 = vmul.f32 %v1522_v47, %v52_v46  ;;  %v1543_v46 = vcombine.high %v82_v41, %v94_v42 }
 0x133   :  { %v1636_v48 = vpop.eup %1635 }
 0x134   :  { %v53_v50 = vmul.f32 %v1636_v48, %v37_v10  ;;  %v70_v57 = vadd.f32 %v1523_v51, %v61_v49  ;;  %v1556_v10 = vcombine.low %v101_v62, %v113_v63  ;;  %v119_v48 = vld [vmem:[%s2403_s1 + $0x170] sm:$0xff]  ;;  %v108_v49 = vld [vmem:[%s2403_s1 + $0x118] sm:$0xff]  ;;  %v1545_v62 = vcombine.high %v83_v55, %v95_v56 }
 0x136   :  { %v62_v52 = vmul.f32 %v1522_v47, %v53_v50  ;;  %v107_v47 = vld [vmem:[%s2403_s1 + $0x110] sm:$0xff]  ;;  %v120_v50 = vld [vmem:[%s2403_s1 + $0x178] sm:$0xff] }
 0x137   :  { %v1569_v53 = vcombine.high %v107_v47, %v119_v48  ;;  %v1571_v54 = vcombine.high %v108_v49, %v120_v50 }
 0x138   :  { %v71_v58 = vadd.f32 %v1523_v51, %v62_v52  ;;  %v1540_v51 = vcombine.low %v81_v39, %v93_v40  ;;  %v1542_v52 = vcombine.low %v82_v41, %v94_v42 }
 0x13a   :  { %v1844_v59 = vpack.c.bf16 %v71_v58, %v70_v57  ;;  %v84_v57 = vld [vmem:[%s2403_s1 + $0x58] sm:$0xff] }
 0x13b   :  { %v96_v58 = vld [vmem:[%s2403_s1 + $0xb8] sm:$0xff] }
 0x13c   :  { %1572 = vmatmul.mubr.msk.bf16.vlgmr.msra.gmra.mxu0 %vm26_vm0, %v1844_v59  ;;  %1573 = vmatmul.mubr.msk.bf16.vlgmr.msra.gmra.mxu1 %vm26_vm0, %v1844_v59  ;;  %v1547_v63 = vcombine.high %v84_v57, %v96_v58  ;;  %v1546_v1 = vcombine.low %v84_v57, %v96_v58 }
 0x13d   :  { %589 = vmatpush1.bf16.msra.mxu0 %v1552_v33  ;;  %632 = vmatpush1.bf16.msra.mxu1 %v1554_v37  ;;  %v118_v33 = vld [vmem:[%s2403_s1 + $0x168] sm:$0xff]  ;;  %v1565_v37 = vcombine.high %v105_v30, %v117_v31 }
 0x13e   :  { %590 = vmatprep.subr.bf16.mxu0 %v1529_v60  ;;  %633 = vmatprep.subr.bf16.mxu1 %v1531_v61  ;;  %v1567_v38 = vcombine.high %v106_v32, %v118_v33  ;;  %v1566_v44 = vcombine.low %v106_v32, %v118_v33  ;;  %v1568_v60 = vcombine.low %v107_v47, %v119_v48 }
 0x13f   :  { %608 = vmatprep.mubr.bf16.mxu0 %v1737_v36  ;;  %651 = vmatprep.mubr.bf16.mxu1 %v1737_v36  ;;  %v1570_v61 = vcombine.low %v108_v49, %v120_v50 }
 0x141   :  { %591 = vmatpush1.bf16.msra.mxu0 %v1528_v2  ;;  %634 = vmatpush1.bf16.msra.mxu1 %v1530_v3  ;;  %v127_v2 = vlaneseq }
 0x142   :  { %674 = vmatprep.subr.bf16.mxu0 %v1557_v4  ;;  %717 = vmatprep.subr.bf16.mxu1 %v1559_v5 }
 0x143   :  { %v128_v3 = vshrl.u32 %v127_v2, 7 }
 0x144   :  { %1574 = vmatmul.mubr.msk.bf16.vlgmr.msra.gmra.mxu0 %vm26_vm0, %v1844_v59  ;;  %1575 = vmatmul.mubr.msk.bf16.vlgmr.msra.gmra.mxu1 %vm26_vm0, %v1844_v59 }
 0x145   :  { %675 = vmatpush1.bf16.msra.mxu0 %v1556_v10  ;;  %718 = vmatpush1.bf16.msra.mxu1 %v1558_v11  ;;  %v1976_v4 = vsub.s32 0, %v128_v3  ;;  %v1978_v5 = vsub.s32 2, %v128_v3  ;;  %v1983_v7 = vsub.s32 1, %v128_v3  ;;  %v1993_v14 = vsub.s32 6, %v128_v3 }
 0x146   :  { %676 = vmatprep.subr.bf16.mxu0 %v1533_v12  ;;  %719 = vmatprep.subr.bf16.mxu1 %v1535_v13  ;;  %v1991_v13 = vsub.s32 4, %v128_v3  ;;  %v1999_v17 = vsub.s32 5, %v128_v3 }
 0x147   :  { %694 = vmatprep.mubr.bf16.mxu0 %v1737_v36  ;;  %737 = vmatprep.mubr.bf16.mxu1 %v1737_v36  ;;  %v130_v8 = vrot.slane %v121_v6, %v1976_v4  ;;  %v138_v9 = vrot.slane %v121_v6, %v1978_v5  ;;  %v134_v11 = vrot.slane %v121_v6, %v1983_v7 }
 0x148   :  { %v150_v32 = vrot.slane %v121_v6, %v1999_v17  ;;  %v2027_v41 = vrot.slane %v122_v23, %v1978_v5  ;;  %v2030_v42 = vrot.slane %v122_v23, %v1983_v7  ;;  %v2046_v55 = vrot.slane %v122_v23, %v1993_v14 }
 0x149   :  { %677 = vmatpush1.bf16.msra.mxu0 %v1532_v18  ;;  %720 = vmatpush1.bf16.msra.mxu1 %v1534_v19  ;;  %v2051_v58 = vrot.slane %v122_v23, %v1999_v17 }
 0x14a   :  { %760 = vmatprep.subr.bf16.mxu0 %v1561_v20  ;;  %803 = vmatprep.subr.bf16.mxu1 %v1563_v21  ;;  %v2001_v20 = vsub.s32 7, %v128_v3 }
 0x14c   :  { %1576 = vmatmul.mubr.msk.bf16.vlgmr.msra.gmra.mxu0 %vm26_vm0, %v1844_v59  ;;  %1577 = vmatmul.mubr.msk.bf16.vlgmr.msra.gmra.mxu1 %vm26_vm0, %v1844_v59 }
 0x14d   :  { %761 = vmatpush1.bf16.msra.mxu0 %v1560_v26  ;;  %804 = vmatpush1.bf16.msra.mxu1 %v1562_v27 }
 0x14e   :  { %762 = vmatprep.subr.bf16.mxu0 %v1537_v28  ;;  %805 = vmatprep.subr.bf16.mxu1 %v1539_v29  ;;  %v146_v28 = vrot.slane %v121_v6, %v1991_v13  ;;  %v154_v29 = vrot.slane %v121_v6, %v1993_v14 }
 0x14f   :  { %780 = vmatprep.mubr.bf16.mxu0 %v1737_v36  ;;  %823 = vmatprep.mubr.bf16.mxu1 %v1737_v36 }
 0x151   :  { %763 = vmatpush1.bf16.msra.mxu0 %v1536_v34  ;;  %806 = vmatpush1.bf16.msra.mxu1 %v1538_v35 }
 0x152   :  { %846 = vmatprep.subr.bf16.mxu0 %v1565_v37  ;;  %889 = vmatprep.subr.bf16.mxu1 %v1567_v38  ;;  %v158_v37 = vrot.slane %v121_v6, %v2001_v20  ;;  %v2022_v38 = vrot.slane %v122_v23, %v1976_v4 }
 0x154   :  { %1578 = vmatmul.mubr.msk.bf16.vlgmr.msra.gmra.mxu0 %vm26_vm0, %v1844_v59  ;;  %1579 = vmatmul.mubr.msk.bf16.vlgmr.msra.gmra.mxu1 %vm26_vm0, %v1844_v59 }
 0x155   :  { %847 = vmatpush1.bf16.msra.mxu0 %v1564_v43  ;;  %890 = vmatpush1.bf16.msra.mxu1 %v1566_v44 }
 0x156   :  { %848 = vmatprep.subr.bf16.mxu0 %v1541_v45  ;;  %891 = vmatprep.subr.bf16.mxu1 %v1543_v46 }
 0x157   :  { %866 = vmatprep.mubr.bf16.mxu0 %v1737_v36  ;;  %909 = vmatprep.mubr.bf16.mxu1 %v1737_v36 }
 0x159   :  { %849 = vmatpush1.bf16.msra.mxu0 %v1540_v51  ;;  %892 = vmatpush1.bf16.msra.mxu1 %v1542_v52 }
 0x15a   :  { %932 = vmatprep.subr.bf16.mxu0 %v1569_v53  ;;  %975 = vmatprep.subr.bf16.mxu1 %v1571_v54  ;;  %v2043_v54 = vrot.slane %v122_v23, %v1991_v13 }
 0x15c   :  { %1580 = vmatmul.mubr.msk.bf16.vlgmr.msra.gmra.mxu0 %vm26_vm0, %v1844_v59  ;;  %1581 = vmatmul.mubr.msk.bf16.vlgmr.msra.gmra.mxu1 %vm26_vm0, %v1844_v59 }
 0x15d   :  { %933 = vmatpush1.bf16.msra.mxu0 %v1568_v60  ;;  %976 = vmatpush1.bf16.msra.mxu1 %v1570_v61  ;;  %v2056_v60 = vld [vmem:[%s2406_s4 + $0x10] sm:$0xff] }
 0x15e   :  { %934 = vmatprep.subr.bf16.mxu0 %v1545_v62  ;;  %977 = vmatprep.subr.bf16.mxu1 %v1547_v63 }
 0x15f   :  { %952 = vmatprep.mubr.bf16.mxu0 %v1737_v36  ;;  %995 = vmatprep.mubr.bf16.mxu1 %v1737_v36  ;;  %v1985_v36 = vsub.s32 3, %v128_v3 }
 0x161   :  { %935 = vmatpush1.bf16.msra.mxu0 %v1544_v0  ;;  %978 = vmatpush1.bf16.msra.mxu1 %v1546_v1  ;;  %v142_v12 = vrot.slane %v121_v6, %v1985_v36  ;;  %v2040_v50 = vrot.slane %v122_v23, %v1985_v36  ;;  %v2062_v1 = vrot.slane %v122_v23, %v2001_v20 }
 0x164   :  { %1582 = vmatmul.mubr.msk.bf16.vlgmr.msra.gmra.mxu0 %vm26_vm0, %v1844_v59  ;;  %1583 = vmatmul.mubr.msk.bf16.vlgmr.msra.gmra.mxu1 %vm26_vm0, %v1844_v59 }
 0x1fc   :  { %v524_v10 = vpop.f32.mrf.mxu0  ;;  %v567_v59 = vpop.f32.mrf.mxu1 }
 0x1fd   :  { %v1995_v15 = vadd.f32 %v524_v10, %v130_v8  ;;  %v1997_v16 = vadd.f32 %v567_v59, %v138_v9  ;;  %v2073_v59 = vrot.slane %v2056_v60, %v1976_v4 }
 0x1fe   :  { %v526_v18 = vpop.f32.mrf.mxu0  ;;  %v569_v19 = vpop.f32.mrf.mxu1 }
 0x1ff   :  { %v1054_v21 = vmul.f32 0.70710677, %v1995_v15  ;;  %v1056_v22 = vmul.f32 0.70710677, %v1997_v16  ;;  %v2008_v24 = vadd.f32 %v526_v18, %v134_v11  ;;  %v2010_v25 = vadd.f32 %v569_v19, %v142_v12 }
 0x200   :  { %v528_v26 = vpop.f32.mrf.mxu0  ;;  %v571_v27 = vpop.f32.mrf.mxu1  ;;  %v2083_v19 = vrot.slane %v2056_v60, %v1983_v7 }
 0x201   :  { %1637 = verf.f32 %v1054_v21  ;;  %v2014_v30 = vadd.f32 %v528_v26, %v130_v8  ;;  %v2016_v31 = vadd.f32 %v571_v27, %v138_v9  ;;  %v1055_v33 = vmul.f32 0.70710677, %v2008_v24 }
 0x202   :  { %1639 = verf.f32 %v1056_v22  ;;  %v530_v34 = vpop.f32.mrf.mxu0  ;;  %v573_v35 = vpop.f32.mrf.mxu1  ;;  %v1057_v39 = vmul.f32 0.70710677, %v2010_v25  ;;  %v1008_v21 = vmul.f32 0.5, %v1997_v16  ;;  %v1007_v7 = vmul.f32 0.5, %v2008_v24 }
 0x203   :  { %v1078_v40 = vmul.f32 0.70710677, %v2014_v30  ;;  %1641 = verf.f32 %v1055_v33  ;;  %v1080_v43 = vmul.f32 0.70710677, %v2016_v31  ;;  %v531_v44 = vadd.f32 %v530_v34, %v134_v11 }
 0x204   :  { %v2033_v45 = vadd.f32 %v573_v35, %v142_v12  ;;  %v610_v46 = vpop.f32.mrf.mxu0  ;;  %v653_v47 = vpop.f32.mrf.mxu1  ;;  %1643 = verf.f32 %v1057_v39  ;;  %v2077_v11 = vrot.slane %v2056_v60, %v1978_v5  ;;  %v1006_v12 = vmul.f32 0.5, %v1995_v15 }
 0x205   :  { %v2035_v48 = vadd.f32 %v610_v46, %v146_v28  ;;  %v2037_v49 = vadd.f32 %v653_v47, %v154_v29  ;;  %1645 = verf.f32 %v1078_v40  ;;  %v1079_v51 = vmul.f32 0.70710677, %v531_v44 }
 0x206   :  { %v612_v52 = vpop.f32.mrf.mxu0  ;;  %v655_v53 = vpop.f32.mrf.mxu1  ;;  %1647 = verf.f32 %v1080_v43  ;;  %v1081_v56 = vmul.f32 0.70710677, %v2033_v45  ;;  %v1009_v16 = vmul.f32 0.5, %v2010_v25  ;;  %v1032_v43 = vmul.f32 0.5, %v2016_v31 }
 0x207   :  { %v1058_v57 = vmul.f32 0.70710677, %v2035_v48  ;;  %1649 = verf.f32 %v1079_v51  ;;  %v1060_v61 = vmul.f32 0.70710677, %v2037_v49  ;;  %v2059_v62 = vadd.f32 %v612_v52, %v150_v32 }
 0x208   :  { %v614_v63 = vpop.f32.mrf.mxu0  ;;  %v657_v0 = vpop.f32.mrf.mxu1  ;;  %1651 = verf.f32 %v1081_v56  ;;  %v2064_v2 = vadd.f32 %v655_v53, %v158_v37  ;;  %v1031_v46 = vmul.f32 0.5, %v531_v44  ;;  %v1033_v52 = vmul.f32 0.5, %v2033_v45 }
 0x209   :  { %v2066_v3 = vadd.f32 %v614_v63, %v146_v28  ;;  %v2068_v6 = vadd.f32 %v657_v0, %v154_v29  ;;  %1653 = verf.f32 %v1058_v57  ;;  %v1059_v8 = vmul.f32 0.70710677, %v2059_v62 }
 0x20a   :  { %v616_v9 = vpop.f32.mrf.mxu0  ;;  %v659_v10 = vpop.f32.mrf.mxu1  ;;  %1655 = verf.f32 %v1060_v61  ;;  %v1061_v18 = vmul.f32 0.70710677, %v2064_v2  ;;  %v1010_v53 = vmul.f32 0.5, %v2035_v48  ;;  %v1012_v61 = vmul.f32 0.5, %v2037_v49 }
 0x20b   :  { %1657 = verf.f32 %v1059_v8  ;;  %v1082_v22 = vmul.f32 0.70710677, %v2066_v3  ;;  %v1084_v4 = vmul.f32 0.70710677, %v2068_v6  ;;  %v2088_v5 = vadd.f32 %v616_v9, %v150_v32 }
 0x20c   :  { %v696_v23 = vpop.f32.mrf.mxu0  ;;  %v739_v26 = vpop.f32.mrf.mxu1  ;;  %1659 = verf.f32 %v1061_v18  ;;  %v2090_v15 = vadd.f32 %v659_v10, %v158_v37  ;;  %v1030_v32 = vmul.f32 0.5, %v2014_v30 }
 0x20d   :  { %v2093_v27 = vadd.f32 %v696_v23, %v2022_v38  ;;  %1661 = verf.f32 %v1082_v22  ;;  %v2098_v29 = vadd.f32 %v739_v26, %v2027_v41  ;;  %v1083_v37 = vmul.f32 0.70710677, %v2088_v5 }
 0x20e   :  { %v1638_v28 = vpop.eup %1637  ;;  %v698_v33 = vpop.f32.mrf.mxu0  ;;  %1663 = verf.f32 %v1084_v4  ;;  %v1085_v24 = vmul.f32 0.70710677, %v2090_v15 }
 0x20f   :  { %v741_v34 = vpop.f32.mrf.mxu1  ;;  %v1640_v35 = vpop.eup %1639  ;;  %v1150_v39 = vadd.f32 1.0, %v1638_v28  ;;  %1665 = verf.f32 %v1083_v37  ;;  %v1062_v56 = vmul.f32 0.70710677, %v2093_v27  ;;  %v1064_v31 = vmul.f32 0.70710677, %v2098_v29 }
 0x210   :  { %v1152_v40 = vadd.f32 1.0, %v1640_v35  ;;  %v700_v25 = vpop.f32.mrf.mxu0  ;;  %v1642_v51 = vpop.eup %1641  ;;  %1667 = verf.f32 %v1085_v24  ;;  %v2114_v45 = vadd.f32 %v698_v33, %v2030_v42  ;;  %v2117_v49 = vadd.f32 %v741_v34, %v2040_v50 }
 0x211   :  { %v743_v47 = vpop.f32.mrf.mxu1  ;;  %v1644_v30 = vpop.eup %1643  ;;  %v1151_v57 = vadd.f32 1.0, %v1642_v51  ;;  %v1198_v8 = vmul.f32 %v1150_v39, %v1006_v12  ;;  %1669 = verf.f32 %v1062_v56  ;;  %v2121_v12 = vadd.f32 %v700_v25, %v2022_v38 }
 0x212   :  { %v2109_v44 = vpop.f32.mrf.mxu0  ;;  %v1646_v0 = vpop.eup %1645  ;;  %v1153_v9 = vadd.f32 1.0, %v1644_v30  ;;  %v1200_v10 = vmul.f32 %v1152_v40, %v1008_v21  ;;  %v1063_v35 = vmul.f32 0.70710677, %v2114_v45  ;;  %v1011_v24 = vmul.f32 0.5, %v2059_v62 }
 0x213   :  { %v2111_v63 = vpop.f32.mrf.mxu1  ;;  %v1648_v48 = vpop.eup %1647  ;;  %v1199_v18 = vmul.f32 %v1151_v57, %v1007_v7  ;;  %v1174_v22 = vadd.f32 1.0, %v1646_v0  ;;  %1671 = verf.f32 %v1064_v31  ;;  %v1065_v62 = vmul.f32 0.70710677, %v2117_v49 }
 0x214   :  { %v782_v4 = vpop.f32.mrf.mxu0  ;;  %v1650_v23 = vpop.eup %1649  ;;  %v1201_v26 = vmul.f32 %v1153_v9, %v1009_v16  ;;  %v1176_v28 = vadd.f32 1.0, %v1648_v48  ;;  %1673 = verf.f32 %v1063_v35  ;;  %v1086_v0 = vmul.f32 0.70710677, %v2121_v12 }
 0x215   :  { %v1652_v39 = vpop.eup %1651  ;;  %v1608_v37 = vpack.c.bf16 %v1199_v18, %v1198_v8  ;;  %v1175_v33 = vadd.f32 1.0, %v1650_v23  ;;  %v2124_v21 = vpop.f32.mrf.mxu1  ;;  %v1222_v40 = vmul.f32 %v1174_v22, %v1030_v32  ;;  %v2137_v8 = vadd.f32 %v743_v47, %v2027_v41 }
 0x216   :  { %v1654_v7 = vpop.eup %1653  ;;  %v1609_v34 = vpack.c.bf16 %v1201_v26, %v1200_v10  ;;  %v1177_v51 = vadd.f32 1.0, %v1652_v39  ;;  %v2126_v16 = vpop.f32.mrf.mxu0  ;;  %v1224_v38 = vmul.f32 %v1176_v28, %v1032_v43  ;;  %v1013_v43 = vmul.f32 0.5, %v2064_v2 }
 0x217   :  { %v1656_v56 = vpop.eup %1655  ;;  %1390 = vst [vmem:[%s2407_s5] sm:$0xff] %v1608_v37  ;;  %v1223_v25 = vmul.f32 %v1175_v33, %v1031_v46  ;;  %v1154_v30 = vadd.f32 1.0, %v1654_v7  ;;  %1675 = verf.f32 %v1065_v62  ;;  %v2140_v46 = vpop.f32.mrf.mxu1  ;;  %v1088_v2 = vmul.f32 0.70710677, %v2137_v8 }
 0x218   :  { %v1658_v57 = vpop.eup %1657  ;;  %1391 = vst [vmem:[%s2407_s5 + $0x8] sm:$0xff] %v1609_v34  ;;  %v1225_v32 = vmul.f32 %v1177_v51, %v1033_v52  ;;  %v1156_v31 = vadd.f32 1.0, %v1656_v56  ;;  %v1034_v52 = vmul.f32 0.5, %v2066_v3  ;;  %v786_v28 = vpop.f32.mrf.mxu0  ;;  %1677 = verf.f32 %v1086_v0 }
 0x219   :  { %v1660_v9 = vpop.eup %1659  ;;  %v1620_v48 = vpack.c.bf16 %v1223_v25, %v1222_v40  ;;  %v1155_v10 = vadd.f32 1.0, %v1658_v57  ;;  %v1202_v23 = vmul.f32 %v1154_v30, %v1010_v53  ;;  %v2152_v3 = vadd.f32 %v2109_v44, %v2030_v42  ;;  %v829_v40 = vpop.f32.mrf.mxu1 }
 0x21a   :  { %v1662_v18 = vpop.eup %1661  ;;  %v1621_v22 = vpack.c.bf16 %v1225_v32, %v1224_v38  ;;  %v1157_v26 = vadd.f32 1.0, %v1660_v9  ;;  %v1204_v41 = vmul.f32 %v1156_v31, %v1012_v61  ;;  %v2156_v37 = vadd.f32 %v2111_v63, %v2040_v50  ;;  %v788_v42 = vpop.f32.mrf.mxu0 }
 0x21b   :  { %v1664_v35 = vpop.eup %1663  ;;  %1402 = vst [vmem:[%s2407_s5 + $0x60] sm:$0xff] %v1620_v48  ;;  %v1203_v47 = vmul.f32 %v1155_v10, %v1011_v24  ;;  %v1178_v53 = vadd.f32 1.0, %v1662_v18  ;;  %v1036_v24 = vmul.f32 0.5, %v2068_v6  ;;  %v2160_v34 = vadd.f32 %v782_v4, %v2043_v54  ;;  %v831_v0 = vpop.f32.mrf.mxu1 }
 0x21c   :  { %1403 = vst [vmem:[%s2407_s5 + $0x68] sm:$0xff] %v1621_v22  ;;  %v1205_v39 = vmul.f32 %v1157_v26, %v1013_v43  ;;  %v1666_v33 = vpop.eup %1665  ;;  %v1180_v7 = vadd.f32 1.0, %v1664_v35  ;;  %v1035_v38 = vmul.f32 0.5, %v2088_v5  ;;  %1679 = verf.f32 %v1088_v2  ;;  %v868_v18 = vpop.f32.mrf.mxu0 }
 0x21d   :  { %v1610_v61 = vpack.c.bf16 %v1203_v47, %v1202_v23  ;;  %v1668_v51 = vpop.eup %1667  ;;  %v1179_v25 = vadd.f32 1.0, %v1666_v33  ;;  %v1037_v50 = vmul.f32 0.5, %v2090_v15  ;;  %v1087_v63 = vmul.f32 0.70710677, %v2152_v3 }
 0x21e   :  { %v1611_v56 = vpack.c.bf16 %v1205_v39, %v1204_v41  ;;  %v1670_v44 = vpop.eup %1669  ;;  %v1181_v6 = vadd.f32 1.0, %v1668_v51  ;;  %v1089_v4 = vmul.f32 0.70710677, %v2156_v37  ;;  %v1226_v5 = vmul.f32 %v1178_v53, %v1034_v52 }
 0x21f   :  { %1392 = vst [vmem:[%s2407_s5 + $0x10] sm:$0xff] %v1610_v61  ;;  %v1227_v30 = vmul.f32 %v1179_v25, %v1035_v38  ;;  %v1066_v62 = vmul.f32 0.70710677, %v2160_v34  ;;  %v2175_v57 = vrot.slane %v2056_v60, %v1985_v36  ;;  %v1228_v32 = vmul.f32 %v1180_v7, %v1036_v24  ;;  %v870_v61 = vpop.f32.mrf.mxu0 }
 0x220   :  { %1393 = vst [vmem:[%s2407_s5 + $0x18] sm:$0xff] %v1611_v56  ;;  %v1229_v31 = vmul.f32 %v1181_v6, %v1037_v50  ;;  %1681 = verf.f32 %v1087_v63  ;;  %v2179_v15 = vadd.f32 %v2124_v21, %v2046_v55  ;;  %v1672_v9 = vpop.eup %1671  ;;  %v1158_v10 = vadd.f32 1.0, %v1670_v44 }
 0x221   :  { %v1622_v48 = vpack.c.bf16 %v1227_v30, %v1226_v5  ;;  %1683 = verf.f32 %v1089_v4  ;;  %v2183_v43 = vadd.f32 %v2126_v16, %v2051_v58  ;;  %v1674_v22 = vpop.eup %1673  ;;  %v1014_v23 = vmul.f32 0.5, %v2093_v27 }
 0x222   :  { %v1623_v36 = vpack.c.bf16 %v1229_v31, %v1228_v32  ;;  %v1016_v26 = vmul.f32 0.5, %v2098_v29  ;;  %1685 = verf.f32 %v1066_v62  ;;  %v1015_v21 = vmul.f32 0.5, %v2114_v45  ;;  %v911_v45 = vpop.f32.mrf.mxu1 }
 0x223   :  { %1404 = vst [vmem:[%s2407_s5 + $0x70] sm:$0xff] %v1622_v48  ;;  %v1159_v52 = vadd.f32 1.0, %v1674_v22  ;;  %v1068_v35 = vmul.f32 0.70710677, %v2179_v15  ;;  %v1067_v16 = vmul.f32 0.70710677, %v2183_v43  ;;  %v2198_v27 = vadd.f32 %v2140_v46, %v2062_v1 }
 0x224   :  { %1405 = vst [vmem:[%s2407_s5 + $0x78] sm:$0xff] %v1623_v36  ;;  %v1160_v41 = vadd.f32 1.0, %v1672_v9  ;;  %v2201_v29 = vadd.f32 %v786_v28, %v2043_v54  ;;  %v2204_v47 = vadd.f32 %v829_v40, %v2046_v55  ;;  %v1676_v2 = vpop.eup %1675  ;;  %v1206_v39 = vmul.f32 %v1158_v10, %v1014_v23 }
 0x225   :  { %v1207_v53 = vmul.f32 %v1159_v52, %v1015_v21  ;;  %1687 = verf.f32 %v1068_v35  ;;  %v2207_v33 = vadd.f32 %v788_v42, %v2051_v58  ;;  %v1017_v24 = vmul.f32 0.5, %v2117_v49  ;;  %v1678_v54 = vpop.eup %1677  ;;  %v913_v49 = vpop.f32.mrf.mxu1 }
 0x226   :  { %v1161_v7 = vadd.f32 1.0, %v1676_v2  ;;  %1689 = verf.f32 %v1067_v16  ;;  %v1069_v46 = vmul.f32 0.70710677, %v2198_v27  ;;  %v1090_v55 = vmul.f32 0.70710677, %v2201_v29  ;;  %v872_v42 = vpop.f32.mrf.mxu0 }
 0x227   :  { %v1612_v28 = vpack.c.bf16 %v1207_v53, %v1206_v39  ;;  %v2213_v40 = vadd.f32 %v831_v0, %v2062_v1  ;;  %v2216_v51 = vadd.f32 %v868_v18, %v2073_v59  ;;  %v1208_v56 = vmul.f32 %v1160_v41, %v1016_v26  ;;  %v915_v32 = vpop.f32.mrf.mxu1 }
 0x228   :  { %v1209_v58 = vmul.f32 %v1161_v7, %v1017_v24  ;;  %1691 = verf.f32 %v1069_v46  ;;  %v1092_v38 = vmul.f32 0.70710677, %v2204_v47  ;;  %v1091_v25 = vmul.f32 0.70710677, %v2207_v33  ;;  %v874_v10 = vpop.f32.mrf.mxu0 }
 0x229   :  { %1394 = vst [vmem:[%s2407_s5 + $0x20] sm:$0xff] %v1612_v28  ;;  %1693 = verf.f32 %v1090_v55  ;;  %v1680_v44 = vpop.eup %1679  ;;  %v1038_v50 = vmul.f32 0.5, %v2121_v12  ;;  %v1182_v6 = vadd.f32 1.0, %v1678_v54  ;;  %v1093_v63 = vmul.f32 0.70710677, %v2213_v40 }
 0x22a   :  { %v1613_v1 = vpack.c.bf16 %v1209_v58, %v1208_v56  ;;  %1695 = verf.f32 %v1092_v38  ;;  %v1070_v4 = vmul.f32 0.70710677, %v2216_v51  ;;  %v1040_v5 = vmul.f32 0.5, %v2137_v8 }
 0x22b   :  { %1697 = verf.f32 %v1091_v25  ;;  %v2231_v30 = vadd.f32 %v911_v45, %v2077_v11  ;;  %v2234_v62 = vadd.f32 %v870_v61, %v2083_v19  ;;  %v2237_v12 = vadd.f32 %v913_v49, %v2175_v57  ;;  %v917_v61 = vpop.f32.mrf.mxu1 }
 0x22c   :  { %1395 = vst [vmem:[%s2407_s5 + $0x28] sm:$0xff] %v1613_v1  ;;  %v1184_v0 = vadd.f32 1.0, %v1680_v44  ;;  %v1039_v9 = vmul.f32 0.5, %v2152_v3  ;;  %1699 = verf.f32 %v1093_v63  ;;  %v2241_v48 = vadd.f32 %v872_v42, %v2073_v59 }
 0x22d   :  { %v1682_v31 = vpop.eup %1681  ;;  %v1041_v22 = vmul.f32 0.5, %v2156_v37  ;;  %1701 = verf.f32 %v1070_v4  ;;  %v1072_v36 = vmul.f32 0.70710677, %v2231_v30  ;;  %v1230_v26 = vmul.f32 %v1182_v6, %v1038_v50 }
 0x22e   :  { %v1684_v8 = vpop.eup %1683  ;;  %v1183_v18 = vadd.f32 1.0, %v1682_v31  ;;  %v1071_v52 = vmul.f32 0.70710677, %v2234_v62  ;;  %v2247_v35 = vadd.f32 %v915_v32, %v2077_v11  ;;  %v1073_v59 = vmul.f32 0.70710677, %v2237_v12 }
 0x22f   :  { %v1686_v23 = vpop.eup %1685  ;;  %v1185_v21 = vadd.f32 1.0, %v1684_v8  ;;  %1703 = verf.f32 %v1072_v36  ;;  %v2251_v16 = vadd.f32 %v874_v10, %v2083_v19  ;;  %v1232_v41 = vmul.f32 %v1184_v0, %v1040_v5 }
 0x230   :  { %v1231_v3 = vmul.f32 %v1183_v18, %v1039_v9  ;;  %1705 = verf.f32 %v1071_v52  ;;  %v1094_v45 = vmul.f32 0.70710677, %v2241_v48  ;;  %v1162_v53 = vadd.f32 1.0, %v1686_v23 }
 0x231   :  { %v1233_v37 = vmul.f32 %v1185_v21, %v1041_v22  ;;  %1707 = verf.f32 %v1073_v59  ;;  %v1018_v7 = vmul.f32 0.5, %v2160_v34  ;;  %v1096_v46 = vmul.f32 0.70710677, %v2247_v35 }
 0x232   :  { %v1688_v2 = vpop.eup %1687  ;;  %v1624_v39 = vpack.c.bf16 %v1231_v3, %v1230_v26  ;;  %1709 = verf.f32 %v1094_v45  ;;  %v1019_v54 = vmul.f32 0.5, %v2183_v43  ;;  %v1095_v55 = vmul.f32 0.70710677, %v2251_v16 }
 0x233   :  { %v1690_v24 = vpop.eup %1689  ;;  %v1625_v11 = vpack.c.bf16 %v1233_v37, %v1232_v41  ;;  %v1164_v19 = vadd.f32 1.0, %v1688_v2  ;;  %v1020_v34 = vmul.f32 0.5, %v2179_v15  ;;  %v1021_v58 = vmul.f32 0.5, %v2198_v27 }
 0x234   :  { %1406 = vst [vmem:[%s2407_s5 + $0x80] sm:$0xff] %v1624_v39  ;;  %v1163_v28 = vadd.f32 1.0, %v1690_v24  ;;  %1711 = verf.f32 %v1096_v46  ;;  %v2267_v38 = vadd.f32 %v917_v61, %v2175_v57  ;;  %v1210_v25 = vmul.f32 %v1162_v53, %v1018_v7  ;;  %v954_v57 = vpop.f32.mrf.mxu0 }
 0x235   :  { %v1692_v56 = vpop.eup %1691  ;;  %1407 = vst [vmem:[%s2407_s5 + $0x88] sm:$0xff] %v1625_v11  ;;  %1713 = verf.f32 %v1095_v55  ;;  %v2272_v6 = vrot.slane %v2056_v60, %v1991_v13  ;;  %v1212_v63 = vmul.f32 %v1164_v19, %v1020_v34  ;;  %v2278_v5 = vrot.slane %v2056_v60, %v1993_v14 }
 0x236   :  { %v1694_v49 = vpop.eup %1693  ;;  %v1211_v42 = vmul.f32 %v1163_v28, %v1019_v54  ;;  %v1165_v43 = vadd.f32 1.0, %v1692_v56  ;;  %v1097_v50 = vmul.f32 0.70710677, %v2267_v38  ;;  %v1042_v32 = vmul.f32 0.5, %v2201_v29 }
 0x237   :  { %v1696_v44 = vpop.eup %1695  ;;  %v1186_v1 = vadd.f32 1.0, %v1694_v49  ;;  %v1043_v31 = vmul.f32 0.5, %v2207_v33  ;;  %v2288_v18 = vrot.slane %v2056_v60, %v1999_v17  ;;  %v2291_v33 = vadd.f32 %v954_v57, %v2272_v6 }
 0x238   :  { %v1698_v15 = vpop.eup %1697  ;;  %v1614_v27 = vpack.c.bf16 %v1211_v42, %v1210_v25  ;;  %v2274_v4 = vmul.f32 %v1165_v43, %v1021_v58  ;;  %1715 = verf.f32 %v1097_v50  ;;  %v1444_v13 = vmul.f32 %v1211_v42, %v1211_v42 }
 0x239   :  { %v1187_v0 = vadd.f32 1.0, %v1698_v15  ;;  %v1700_v9 = vpop.eup %1699  ;;  %v1188_v8 = vadd.f32 1.0, %v1696_v44  ;;  %v1234_v22 = vmul.f32 %v1186_v1, %v1042_v32  ;;  %v1443_v23 = vmul.f32 %v1210_v25, %v1210_v25  ;;  %v956_v44 = vpop.f32.mrf.mxu0 }
 0x23a   :  { %1396 = vst [vmem:[%s2407_s5 + $0x30] sm:$0xff] %v1614_v27  ;;  %v1615_v10 = vpack.c.bf16 %v2274_v4, %v1212_v63  ;;  %v1702_v14 = vpop.eup %1701  ;;  %v1189_v36 = vadd.f32 1.0, %v1700_v9  ;;  %v1044_v26 = vmul.f32 0.5, %v2204_v47  ;;  %v1045_v21 = vmul.f32 0.5, %v2213_v40  ;;  %v997_v47 = vpop.f32.mrf.mxu1 }
 0x23b   :  { %v1235_v29 = vmul.f32 %v1187_v0, %v1043_v31  ;;  %v2300_v17 = vrot.slane %v2056_v60, %v2001_v20  ;;  %v1022_v59 = vmul.f32 0.5, %v2216_v51  ;;  %v1166_v41 = vadd.f32 1.0, %v1702_v14 }
 0x23c   :  { %1397 = vst [vmem:[%s2407_s5 + $0x38] sm:$0xff] %v1615_v10  ;;  %v1704_v52 = vpop.eup %1703  ;;  %v1024_v37 = vmul.f32 0.5, %v2231_v30  ;;  %v1414_v2 = vadd.f32 %v1211_v42, %v1210_v25  ;;  %v1467_v39 = vadd.f32 %v1444_v13, %v1443_v23  ;;  %v1236_v53 = vmul.f32 %v1188_v8, %v1044_v26  ;;  %v958_v23 = vpop.f32.mrf.mxu0 }
 0x23d   :  { %v1626_v3 = vpack.c.bf16 %v1235_v29, %v1234_v22  ;;  %v1706_v45 = vpop.eup %1705  ;;  %v2304_v61 = vmul.f32 %v1189_v36, %v1045_v21  ;;  %v1023_v20 = vmul.f32 0.5, %v2234_v62  ;;  %v1025_v40 = vmul.f32 0.5, %v2237_v12 }
 0x23e   :  { %v1708_v24 = vpop.eup %1707  ;;  %v1167_v60 = vadd.f32 1.0, %v1706_v45  ;;  %v1074_v51 = vmul.f32 0.70710677, %v2291_v33  ;;  %v1445_v11 = vmul.f32 %v1212_v63, %v1212_v63  ;;  %v1168_v46 = vadd.f32 1.0, %v1704_v52 }
 0x23f   :  { %1408 = vst [vmem:[%s2407_s5 + $0x90] sm:$0xff] %v1626_v3  ;;  %v1710_v30 = vpop.eup %1709  ;;  %v1627_v7 = vpack.c.bf16 %v2304_v61, %v1236_v53  ;;  %v1046_v19 = vmul.f32 0.5, %v2241_v48  ;;  %v1214_v54 = vmul.f32 %v1166_v41, %v1022_v59  ;;  %v1048_v55 = vmul.f32 0.5, %v2247_v35  ;;  %v999_v35 = vpop.f32.mrf.mxu1 }
 0x240   :  { %v1215_v28 = vmul.f32 %v1167_v60, %v1023_v20  ;;  %v2316_v56 = vadd.f32 %v997_v47, %v2278_v5  ;;  %v1415_v34 = vadd.f32 %v1414_v2, %v1212_v63  ;;  %v1468_v58 = vadd.f32 %v1467_v39, %v1445_v11 }
 0x241   :  { %v1712_v62 = vpop.eup %1711  ;;  %1409 = vst [vmem:[%s2407_s5 + $0x98] sm:$0xff] %v1627_v7  ;;  %v1169_v12 = vadd.f32 1.0, %v1708_v24  ;;  %1717 = verf.f32 %v1074_v51  ;;  %v1456_v25 = vmul.f32 %v1235_v29, %v1235_v29  ;;  %v1190_v48 = vadd.f32 1.0, %v1710_v30  ;;  %v960_v24 = vpop.f32.mrf.mxu0 }
 0x242   :  { %v1714_v49 = vpop.eup %1713  ;;  %v1616_v42 = vpack.c.bf16 %v1215_v28, %v1214_v54  ;;  %v1047_v43 = vmul.f32 0.5, %v2251_v16  ;;  %v1446_v1 = vmul.f32 %v2274_v4, %v2274_v4  ;;  %v1216_v50 = vmul.f32 %v1168_v46, %v1024_v37 }
 0x243   :  { %v2324_v15 = vmul.f32 %v1169_v12, %v1025_v40  ;;  %v1049_v63 = vmul.f32 0.5, %v2267_v38  ;;  %v1455_v27 = vmul.f32 %v1234_v22, %v1234_v22  ;;  %v1427_v57 = vadd.f32 %v1235_v29, %v1234_v22  ;;  %v1001_v22 = vpop.f32.mrf.mxu1 }
 0x244   :  { %1398 = vst [vmem:[%s2407_s5 + $0x40] sm:$0xff] %v1616_v42  ;;  %v1191_v32 = vadd.f32 1.0, %v1714_v49  ;;  %v1076_v31 = vmul.f32 0.70710677, %v2316_v56  ;;  %v1416_v0 = vadd.f32 %v1415_v34, %v2274_v4  ;;  %v1469_v9 = vadd.f32 %v1468_v58, %v1446_v1 }
 0x245   :  { %v1716_v16 = vpop.eup %1715  ;;  %v1617_v13 = vpack.c.bf16 %v2324_v15, %v1216_v50  ;;  %v1192_v10 = vadd.f32 1.0, %v1712_v62  ;;  %v1480_v8 = vadd.f32 %v1456_v25, %v1455_v27  ;;  %v1447_v14 = vmul.f32 %v1214_v54, %v1214_v54  ;;  %v1003_v20 = vpop.f32.mrf.mxu1 }
 0x246   :  { %v1238_v36 = vmul.f32 %v1190_v48, %v1046_v19  ;;  %v1239_v38 = vmul.f32 %v1191_v32, %v1047_v43  ;;  %v1193_v29 = vadd.f32 1.0, %v1716_v16  ;;  %1719 = verf.f32 %v1076_v31 }
 0x247   :  { %1399 = vst [vmem:[%s2407_s5 + $0x48] sm:$0xff] %v1617_v13  ;;  %v957_v26 = vadd.f32 %v956_v44, %v2288_v18  ;;  %v2338_v4 = vadd.f32 %v999_v35, %v2300_v17  ;;  %v1457_v21 = vmul.f32 %v1236_v53, %v1236_v53  ;;  %v1428_v52 = vadd.f32 %v1427_v57, %v1236_v53 }
 0x248   :  { %v1628_v3 = vpack.c.bf16 %v1239_v38, %v1238_v36  ;;  %v1417_v59 = vadd.f32 %v1416_v0, %v1214_v54  ;;  %v1240_v41 = vmul.f32 %v1192_v10, %v1048_v55  ;;  %v2340_v37 = vmul.f32 %v1193_v29, %v1049_v63 }
 0x249   :  { %v1075_v45 = vmul.f32 0.70710677, %v957_v26  ;;  %v1481_v2 = vadd.f32 %v1480_v8, %v1457_v21  ;;  %v1077_v39 = vmul.f32 0.70710677, %v2338_v4  ;;  %v959_v47 = vadd.f32 %v958_v23, %v2272_v6 }
 0x24a   :  { %1410 = vst [vmem:[%s2407_s5 + $0xa0] sm:$0xff] %v1628_v3  ;;  %v1470_v60 = vadd.f32 %v1469_v9, %v1447_v14  ;;  %v1448_v40 = vmul.f32 %v1215_v28, %v1215_v28  ;;  %v1629_v53 = vpack.c.bf16 %v2340_v37, %v1240_v41  ;;  %v1429_v51 = vadd.f32 %v1428_v52, %v2304_v61 }
 0x24b   :  { %1721 = verf.f32 %v1075_v45  ;;  %v1458_v30 = vmul.f32 %v2304_v61, %v2304_v61  ;;  %v1098_v11 = vmul.f32 0.70710677, %v959_v47  ;;  %v1418_v7 = vadd.f32 %v1417_v59, %v1215_v28 }
 0x24c   :  { %1723 = verf.f32 %v1077_v39  ;;  %1411 = vst [vmem:[%s2407_s5 + $0xa8] sm:$0xff] %v1629_v53  ;;  %v1002_v6 = vadd.f32 %v1001_v22, %v2278_v5  ;;  %v2356_v46 = vadd.f32 %v960_v24, %v2288_v18  ;;  %v2359_v19 = vadd.f32 %v1003_v20, %v2300_v17 }
 0x24d   :  { %v1482_v55 = vadd.f32 %v1481_v2, %v1458_v30  ;;  %v1459_v62 = vmul.f32 %v1238_v36, %v1238_v36  ;;  %1725 = verf.f32 %v1098_v11  ;;  %v1471_v61 = vadd.f32 %v1470_v60, %v1448_v40 }
 0x24e   :  { %v1718_v54 = vpop.eup %1717  ;;  %v1100_v58 = vmul.f32 0.70710677, %v1002_v6  ;;  %v1430_v28 = vadd.f32 %v1429_v51, %v1238_v36  ;;  %v1099_v12 = vmul.f32 0.70710677, %v2356_v46  ;;  %v1101_v49 = vmul.f32 0.70710677, %v2359_v19 }
 0x24f   :  { %v1170_v34 = vadd.f32 1.0, %v1718_v54  ;;  %v1449_v25 = vmul.f32 %v1216_v50, %v1216_v50  ;;  %v1419_v5 = vadd.f32 %v1418_v7, %v1216_v50  ;;  %v1026_v18 = vmul.f32 0.5, %v2291_v33 }
 0x250   :  { %1727 = verf.f32 %v1100_v58  ;;  %v1483_v42 = vadd.f32 %v1482_v55, %v1459_v62  ;;  %v1460_v17 = vmul.f32 %v1239_v38, %v1239_v38  ;;  %v1431_v35 = vadd.f32 %v1430_v28, %v1239_v38 }
 0x251   :  { %1729 = verf.f32 %v1099_v12  ;;  %v1218_v48 = vmul.f32 %v1170_v34, %v1026_v18  ;;  %v1472_v43 = vadd.f32 %v1471_v61, %v1449_v25  ;;  %v1420_v1 = vadd.f32 %v1419_v5, %v2324_v15 }
 0x252   :  { %1731 = verf.f32 %v1101_v49  ;;  %v1450_v63 = vmul.f32 %v2324_v15, %v2324_v15  ;;  %v1484_v27 = vadd.f32 %v1483_v42, %v1460_v17  ;;  %v1461_v33 = vmul.f32 %v1240_v41, %v1240_v41 }
 0x253   :  { %v1720_v44 = vpop.eup %1719  ;;  %v1451_v57 = vmul.f32 %v1218_v48, %v1218_v48  ;;  %v1432_v16 = vadd.f32 %v1431_v35, %v1240_v41  ;;  %v1028_v9 = vmul.f32 0.5, %v2316_v56  ;;  %v1027_v13 = vmul.f32 0.5, %v957_v26 }
 0x254   :  { %v1172_v32 = vadd.f32 1.0, %v1720_v44  ;;  %v1473_v50 = vadd.f32 %v1472_v43, %v1450_v63  ;;  %v1421_v8 = vadd.f32 %v1420_v1, %v1218_v48  ;;  %v1029_v14 = vmul.f32 0.5, %v2338_v4 }
 0x255   :  { %v1485_v38 = vadd.f32 %v1484_v27, %v1461_v33  ;;  %v1462_v15 = vmul.f32 %v2340_v37, %v2340_v37  ;;  %v1433_v52 = vadd.f32 %v1432_v16, %v2340_v37  ;;  %v1050_v59 = vmul.f32 0.5, %v959_v47 }
 0x256   :  { %v1220_v22 = vmul.f32 %v1172_v32, %v1028_v9  ;;  %v1474_v21 = vadd.f32 %v1473_v50, %v1451_v57  ;;  %v1052_v24 = vmul.f32 0.5, %v1002_v6  ;;  %v1051_v11 = vmul.f32 0.5, %v2356_v46 }
 0x257   :  { %v1486_v20 = vadd.f32 %v1485_v38, %v1462_v15  ;;  %v1053_v54 = vmul.f32 0.5, %v2359_v19 }
 0x258   :  { %v1722_v31 = vpop.eup %1721  ;;  %v1453_v51 = vmul.f32 %v1220_v22, %v1220_v22 }
 0x259   :  { %v1724_v0 = vpop.eup %1723  ;;  %v1171_v10 = vadd.f32 1.0, %v1722_v31 }
 0x25a   :  { %v1173_v36 = vadd.f32 1.0, %v1724_v0  ;;  %v1726_v23 = vpop.eup %1725 }
 0x25b   :  { %v1219_v29 = vmul.f32 %v1171_v10, %v1027_v13  ;;  %v1194_v41 = vadd.f32 1.0, %v1726_v23 }
 0x25c   :  { %v1221_v3 = vmul.f32 %v1173_v36, %v1029_v14 }
 0x25d   :  { %v1618_v56 = vpack.c.bf16 %v1219_v29, %v1218_v48  ;;  %v1422_v26 = vadd.f32 %v1421_v8, %v1219_v29  ;;  %v1452_v45 = vmul.f32 %v1219_v29, %v1219_v29  ;;  %v1728_v2 = vpop.eup %1727  ;;  %v1242_v4 = vmul.f32 %v1194_v41, %v1050_v59 }
 0x25e   :  { %v1619_v39 = vpack.c.bf16 %v1221_v3, %v1220_v22  ;;  %v1730_v60 = vpop.eup %1729  ;;  %v1196_v40 = vadd.f32 1.0, %v1728_v2  ;;  %v1454_v49 = vmul.f32 %v1221_v3, %v1221_v3 }
 0x25f   :  { %1400 = vst [vmem:[%s2407_s5 + $0x50] sm:$0xff] %v1618_v56  ;;  %v1423_v53 = vadd.f32 %v1422_v26, %v1220_v22  ;;  %v1475_v37 = vadd.f32 %v1474_v21, %v1452_v45  ;;  %v1732_v30 = vpop.eup %1731  ;;  %v1463_v47 = vmul.f32 %v1242_v4, %v1242_v4  ;;  %v1195_v7 = vadd.f32 1.0, %v1730_v60 }
 0x260   :  { %1401 = vst [vmem:[%s2407_s5 + $0x58] sm:$0xff] %v1619_v39  ;;  %v1434_v6 = vadd.f32 %v1433_v52, %v1242_v4  ;;  %v1197_v55 = vadd.f32 1.0, %v1732_v30  ;;  %v1244_v34 = vmul.f32 %v1196_v40, %v1052_v24 }
 0x261   :  { %v1424_v62 = vadd.f32 %v1423_v53, %v1221_v3  ;;  %v1476_v61 = vadd.f32 %v1475_v37, %v1453_v51  ;;  %v1243_v58 = vmul.f32 %v1195_v7, %v1051_v11  ;;  %v1487_v28 = vadd.f32 %v1486_v20, %v1463_v47 }
 0x262   :  { %v1245_v12 = vmul.f32 %v1197_v55, %v1053_v54  ;;  %v1465_v19 = vmul.f32 %v1244_v34, %v1244_v34 }
 0x263   :  { %1425 = vadd.xlane.f32.xlu0 %v1424_v62  ;;  %v1630_v25 = vpack.c.bf16 %v1243_v58, %v1242_v4  ;;  %v1435_v5 = vadd.f32 %v1434_v6, %v1243_v58  ;;  %v1464_v18 = vmul.f32 %v1243_v58, %v1243_v58  ;;  %v1477_v17 = vadd.f32 %v1476_v61, %v1454_v49 }
 0x264   :  { %v1631_v42 = vpack.c.bf16 %v1245_v12, %v1244_v34  ;;  %v1466_v35 = vmul.f32 %v1245_v12, %v1245_v12 }
 0x265   :  { %1412 = vst [vmem:[%s2407_s5 + $0xb0] sm:$0xff] %v1630_v25  ;;  %v1436_v46 = vadd.f32 %v1435_v5, %v1244_v34  ;;  %v1488_v48 = vadd.f32 %v1487_v28, %v1464_v18 }
 0x266   :  { %1413 = vst [vmem:[%s2407_s5 + $0xb8] sm:$0xff] %v1631_v42 }
 0x267   :  { %1478 = vadd.xlane.f32.xlu0 %v1477_v17  ;;  %v1437_v43 = vadd.f32 %v1436_v46, %v1245_v12  ;;  %v1489_v44 = vadd.f32 %v1488_v48, %v1465_v19 }
 0x269   :  { %1438 = vadd.xlane.f32.xlu1 %v1437_v43  ;;  %v1490_v1 = vadd.f32 %v1489_v44, %v1466_v35 }
 0x26d   :  { %1491 = vadd.xlane.f32.xlu1 %v1490_v1 }
 0x2ec   :  { %v1426_v63 = vpop.xlane.xlu0 %1425 }
 0x2ed   :  { %v1441_v27 = vmul.f32 0.0006510417, %v1426_v63 }
 0x2ef   :  { %1500 = vst.msk [vmem:[%s2408_s6] sm:$0xff] %vm1499_vm1, %v1441_v27  ;;  %v1495_v32 = vmul.f32 %v1441_v27, %v1441_v27 }
 0x2f0   :  { %v1479_v57 = vpop.xlane.xlu0 %1478 }
 0x2f1   :  { %v1493_v50 = vmul.f32 0.0006510417, %v1479_v57 }
 0x2f2   :  { %v1439_v31 = vpop.xlane.xlu1 %1438 }
 0x2f3   :  { %v1497_v33 = vsub.f32 %v1493_v50, %v1495_v32  ;;  %v1442_v16 = vmul.f32 0.0006510417, %v1439_v31 }
 0x2f5   :  { %v1502_v0 = vmax.f32 %v1497_v33, 0.0  ;;  %1501 = vst.msk [vmem:[%s2408_s6 + $0x8] sm:$0xff] %vm1499_vm1, %v1442_v16  ;;  %v1496_v10 = vmul.f32 %v1442_v16, %v1442_v16 }
 0x2f6   :  { %v1492_v13 = vpop.xlane.xlu1 %1491 }
 0x2f7   :  { %v1504_v9 = vadd.f32 1e-05, %v1502_v0  ;;  %v1494_v8 = vmul.f32 0.0006510417, %v1492_v13 }
 0x2f9   :  { %1733 = vrsqrt.f32 %v1504_v9  ;;  %v1498_v14 = vsub.f32 %v1494_v8, %v1496_v10 }
 0x2fb   :  { %v1503_v36 = vmax.f32 %v1498_v14, 0.0 }
 0x2fd   :  { %v1505_v38 = vadd.f32 1e-05, %v1503_v36 }
 0x2ff   :  { %1735 = vrsqrt.f32 %v1505_v38 }
 0x306   :  { %v1734_v23 = vpop.eup %1733 }
 0x307   :  { %1508 = vst.msk [vmem:[%s2409_s7] sm:$0xff] %vm1499_vm1, %v1734_v23 }
 0x30c   :  { %v1736_v15 = vpop.eup %1735 }
 0x30d   :  { %1509 = vst.msk [vmem:[%s2409_s7 + $0x8] sm:$0xff] %vm1499_vm1, %v1736_v15 }

// kernel: branchformer_forward.15
= control target key start
LH: loop header
LB: loop body
LE: loop exit
PB: predicated region body
PF: predicated region fallthrough
CT: control target
= control target key end

     0   :  { %v217_v0 = vmov 0.0   ;;  %vm218_vm0 = vmmov 0   ;;  %vm53_vm1 = vcmask 261120   ;;  %s291_s4 = inlined_call_operand.vmem [shape: bf16[32,32], index: 4, kind: input, shape index: {}]   ;;  %s292_s3 = inlined_call_operand.vmem [shape: bf16[32,32], index: 3, kind: input, shape index: {}]   ;;  %s293_s2 = inlined_call_operand.vmem [shape: bf16[16,32], index: 2, kind: input, shape index: {}]   ;;  %s294_s1 = inlined_call_operand.vmem [shape: bf16[16,32], index: 1, kind: input, shape index: {}]   ;;  %s295_s5 = inlined_call_operand.vmem [shape: f32[1,32], index: 5, kind: input, shape index: {}]   ;;  %s296_s0 = inlined_call_operand.vmem [shape: f32[16,32], index: 0, kind: input, shape index: {}]   ;;  %s297_s6 = inlined_call_operand.vmem [shape: f32[16,32], index: 6, kind: output, shape index: {}]  }
   0x1   :  { %193 = vmatprep.subr.bf16.mxu0 %v217_v0  ;;  %201 = vmatprep.subr.bf16.mxu1 %v217_v0  ;;  %v211_v1 = vld [vmem:[%s291_s4 + $0x8] sm:$0xff]   ;;  %v213_v3 = vld [vmem:[%s291_s4] sm:$0xff]  }
   0x2   :  { %v212_v2 = vld [vmem:[%s292_s3 + $0x8] sm:$0xff]   ;;  %197 = vmatprep.mubr.msk.bf16.mxu0 %vm218_vm0, %v217_v0  ;;  %205 = vmatprep.mubr.msk.bf16.mxu1 %vm218_vm0, %v217_v0  ;;  %v214_v4 = vld [vmem:[%s292_s3] sm:$0xff]  }
   0x3   :  { %194 = vmatpush3.bf16.msra.mxu0 %v211_v1  ;;  %202 = vmatpush3.bf16.msra.mxu1 %v212_v2  ;;  %v215_v5 = vld [vmem:[%s293_s2] sm:$0xff]   ;;  %v169_v20 = vld [vmem:[%s296_s0 + $0x8] sm:$0xff] }
   0x4   :  { %195 = vmatprep.subr.bf16.mxu0 %v217_v0  ;;  %203 = vmatprep.subr.bf16.mxu1 %v217_v0  ;;  %v216_v6 = vld [vmem:[%s294_s1] sm:$0xff]  }
   0x5   :  { %v186_v9 = vld [vmem:[%s295_s5] ss:$0 sm:$0xff] }
   0x6   :  { %v168_v12 = vld [vmem:[%s296_s0] sm:$0xff] }
   0x7   :  { %196 = vmatpush3.bf16.msra.mxu0 %v213_v3  ;;  %204 = vmatpush3.bf16.msra.mxu1 %v214_v4 }
   0xa   :  { %198 = vmatmul.mubr.msk.bf16.vlgmr.msra.gmra.mxu0 %vm53_vm1, %v215_v5  ;;  %206 = vmatmul.mubr.msk.bf16.vlgmr.msra.gmra.mxu1 %vm53_vm1, %v216_v6 }
  0xca   :  { %v91_v7 = vpop.f32.mrf.mxu0  ;;  %v152_v8 = vpop.f32.mrf.mxu1 }
  0xcb   :  { %v153_v10 = vadd.f32 %v152_v8, %v91_v7 }
  0xcc   :  { %v199_v11 = vpop.f32.mrf.mxu0  ;;  %v207_v13 = vpop.f32.mrf.mxu1 }
  0xcd   :  { %v166_v14 = vadd.f32 %v186_v9, %v153_v10 }
  0xce   :  { %v94_v15 = vpop.f32.mrf.mxu0  ;;  %v155_v16 = vpop.f32.mrf.mxu1 }
  0xcf   :  { %v170_v17 = vadd.f32 %v168_v12, %v166_v14  ;;  %v156_v18 = vadd.f32 %v155_v16, %v94_v15 }
  0xd0   :  { %v200_v19 = vpop.f32.mrf.mxu0  ;;  %v208_v21 = vpop.f32.mrf.mxu1 }
  0xd1   :  { %172 = vst.msk [vmem:[%s297_s6] sm:$0xff] %vm53_vm1, %v170_v17  ;;  %v167_v22 = vadd.f32 %v186_v9, %v156_v18 }
  0xd3   :  { %v171_v23 = vadd.f32 %v169_v20, %v167_v22 }
  0xd5   :  { %173 = vst.msk [vmem:[%s297_s6 + $0x8] sm:$0xff] %vm53_vm1, %v171_v23 }

</bundles_post_ra>
